<compile_context>
chip_gen: v6e
topology: v6e:2x2x1
jax: 0.10.0
libtpu: 0.0.40
codegen_flags: <defaults>
</compile_context>

<pallas_src>
import functools

import jax
import jax.numpy as jnp
from jax.experimental import pallas as pl
from jax.experimental.pallas import tpu as pltpu


FEAT = 512   # feature width of the extractor (matches nn.Linear(512, h_size))


def _round_up(x, m):
    return (x + m - 1) // m * m


# ----------------------------------------------------------------------------
# Fused per-sample kernel: 3x3 conv (3 shifted-row-window matmuls) + bias +
# ReLU + mean pool + both VAE heads.
# ----------------------------------------------------------------------------
def _fused_encoder_kernel(x_ref, wc_ref, bc_ref, wh_ref, bh_ref, out_ref, *,
                          hw, w):
    # x_ref:  ((H+2)*W, 3*C)  bf16  kw-expanded, H/W-zero-padded rows (1 sample)
    # wc_ref: (3, 3*C, 512)   bf16  conv weight, one (3*C, 512) slab per kh tap
    # bc_ref: (1, 512)        f32   conv bias
    # wh_ref: (512, NP)       bf16  packed [fc_mean | fc_logvar] weights
    # bh_ref: (1, NP)         f32   packed head bias
    # out_ref:(1, NP)         f32   packed [mean | logvar] row for this sample

    # 3x3 conv as three kh-shifted row windows x three MXU matmuls (K = 3*C),
    # accumulated in f32.  Row window [kh*W, kh*W + HW) maps output pixel
    # (h, w) to padded-input row h+kh, with the kw/c taps packed in the lanes.
    pre = jnp.dot(x_ref[pl.ds(0, hw), :], wc_ref[0],
                  preferred_element_type=jnp.float32)
    for kh in (1, 2):
        pre = pre + jnp.dot(x_ref[pl.ds(kh * w, hw), :], wc_ref[kh],
                            preferred_element_type=jnp.float32)

    h = jnp.maximum(pre + bc_ref[...], 0.0)                      # (HW, 512) f32

    # Global average pool as a (1, HW) @ (HW, 512) MXU matmul (scale folded in).
    pool = jnp.full((1, hw), 1.0 / hw, dtype=jnp.float32)
    feats = jnp.dot(pool, h, preferred_element_type=jnp.float32)  # (1, 512)

    # Fused fc_mean / fc_logvar heads into one lane-dense output row.
    out = jnp.dot(feats.astype(jnp.bfloat16), wh_ref[...],
                  preferred_element_type=jnp.float32) + bh_ref[...]
    out_ref[...] = out.astype(out_ref.dtype)


# ----------------------------------------------------------------------------
# Forward wrapper: host-side layout glue + one pallas_call.
# ----------------------------------------------------------------------------
def conv_vencoder_forward(x_nchw, params, *, h_size):
    B, C, H, W = x_nchw.shape
    HW = H * W
    RW = (H + 2) * W            # rows per sample of the kw-expanded input
    K3C = 3 * C                 # contraction dim per kh tap (no 128 padding)
    NP = _round_up(max(2 * h_size, 128), 128)

    # Host-side layout: only a 3x kw-tap expansion of the zero-padded input.
    #   xkw[b, hh*W + w, kw*C + c] == xpad[b, hh, w + kw, c]
    x_nhwc = jnp.transpose(x_nchw, (0, 2, 3, 1))                   # (B,H,W,C)
    xp = jnp.pad(x_nhwc, ((0, 0), (1, 1), (1, 1), (0, 0)))         # (B,H+2,W+2,C)
    xkw = jnp.stack([xp[:, :, kw:kw + W, :] for kw in range(3)], axis=3)
    xkw = xkw.reshape(B, RW, K3C).astype(jnp.bfloat16)

    # Packed / padded weights (streamed operands in bf16, biases in f32).
    wc = params["conv_w"].astype(jnp.bfloat16)                     # (3, 3C, 512)
    bc = params["conv_b"]                                          # (1, 512)
    wh = jnp.concatenate([params["wm"], params["wl"]], axis=1)     # (512, 2h)
    wh = jnp.pad(wh, ((0, 0), (0, NP - 2 * h_size))).astype(jnp.bfloat16)
    bh = jnp.concatenate([params["bm"], params["bl"]], axis=1)
    bh = jnp.pad(bh, ((0, 0), (0, NP - 2 * h_size)))               # (1, NP)

    flops = B * (6 * HW * K3C * FEAT + 4 * HW * FEAT + 2 * FEAT * NP)
    bytes_accessed = (xkw.size * 2 + wc.size * 2 + wh.size * 2
                      + bc.size * 4 + bh.size * 4 + B * NP * 4)

    kernel = functools.partial(_fused_encoder_kernel, hw=HW, w=W)

    out = pl.pallas_call(
        kernel,
        out_shape=jax.ShapeDtypeStruct((B, 1, NP), jnp.float32),
        grid_spec=pltpu.PrefetchScalarGridSpec(
            num_scalar_prefetch=0,
            grid=(B,),
            in_specs=[
                pl.BlockSpec((None, RW, K3C), lambda b: (b, 0, 0)),   # input rows
                pl.BlockSpec((3, K3C, FEAT), lambda b: (0, 0, 0)),    # conv w
                pl.BlockSpec((1, FEAT), lambda b: (0, 0)),            # conv b
                pl.BlockSpec((FEAT, NP), lambda b: (0, 0)),           # heads w
                pl.BlockSpec((1, NP), lambda b: (0, 0)),              # heads b
            ],
            out_specs=pl.BlockSpec((None, 1, NP), lambda b: (b, 0, 0)),
        ),
        compiler_params=pltpu.CompilerParams(
            dimension_semantics=("parallel",)),
        cost_estimate=pl.CostEstimate(
            flops=flops, transcendentals=0, bytes_accessed=bytes_accessed),
    )(xkw, wc, bc, wh, bh)

    return out[:, 0, :h_size], out[:, 0, h_size:2 * h_size]


# ----------------------------------------------------------------------------
# Parameter init (PyTorch-equivalent layouts, pre-arranged for the kernel).
# ----------------------------------------------------------------------------
def init_params(key, in_ch, h_size, feat_dim=FEAT):
    k1, k2, k3, k4, k5, k6 = jax.random.split(key, 6)
    # Conv2d(in_ch, 512, 3, padding=1): PyTorch weight layout (512, in_ch, 3, 3);
    # stored as (kh, kw*C + c, 512) to match the kernel's kw-expanded lanes.
    w_oihw = jax.random.normal(k1, (feat_dim, in_ch, 3, 3), jnp.float32) * 0.05
    conv_w = jnp.transpose(w_oihw, (2, 3, 1, 0)).reshape(3, 3 * in_ch, feat_dim)
    conv_b = jax.random.normal(k2, (1, feat_dim), jnp.float32) * 0.05
    # nn.Linear(512, h_size): PyTorch weight (h_size, 512); stored transposed.
    wm = jax.random.normal(k3, (feat_dim, h_size), jnp.float32) * 0.05
    bm = jax.random.normal(k4, (1, h_size), jnp.float32) * 0.05
    wl = jax.random.normal(k5, (feat_dim, h_size), jnp.float32) * 0.05
    bl = jax.random.normal(k6, (1, h_size), jnp.float32) * 0.05
    return {"conv_w": conv_w, "conv_b": conv_b,
            "wm": wm, "bm": bm, "wl": wl, "bl": bl}


if __name__ == "__main__":
    B, C, H, W = 2, 4, 16, 16      # small NCHW input
    h_size = 32                    # args.h_size

    key = jax.random.PRNGKey(0)
    kx, kp = jax.random.split(key)
    x = jax.random.normal(kx, (B, C, H, W), jnp.float32)
    params = init_params(kp, C, h_size)

    fwd = jax.jit(functools.partial(conv_vencoder_forward, h_size=h_size))
    mean, logvar = fwd(x, params)
    jax.block_until_ready((mean, logvar))

    # Pure-JAX f32 reference (same math as the PyTorch module, no Pallas).
    x_nhwc = jnp.transpose(x, (0, 2, 3, 1))
    w_hwio = params["conv_w"].reshape(3, 3, C, FEAT)
    conv = jax.lax.conv_general_dilated(
        x_nhwc, w_hwio, window_strides=(1, 1), padding=((1, 1), (1, 1)),
        dimension_numbers=("NHWC", "HWIO", "NHWC"))
    feats_ref = jnp.mean(jnp.maximum(conv + params["conv_b"][0], 0.0),
                         axis=(1, 2))
    mean_ref = feats_ref @ params["wm"] + params["bm"]
    logvar_ref = feats_ref @ params["wl"] + params["bl"]

    assert mean.shape == (B, h_size) and logvar.shape == (B, h_size)
    # bf16 streamed operands with f32 accumulation: relaxed tolerance.
    assert jnp.allclose(mean, mean_ref, atol=2e-2, rtol=2e-2), (
        float(jnp.max(jnp.abs(mean - mean_ref))))
    assert jnp.allclose(logvar, logvar_ref, atol=2e-2, rtol=2e-2), (
        float(jnp.max(jnp.abs(logvar - logvar_ref))))

    print("KERNEL_OK")
</pallas_src>

<mosaic_0001>
module attributes {stable_mosaic.version = 11 : i64} {
  func.func @_fused_encoder_kernel(%arg0: i32, %arg1: memref<1x288x12xbf16, #tpu.memory_space<vmem>>, %arg2: memref<3x12x512xbf16, #tpu.memory_space<vmem>>, %arg3: memref<1x512xf32, #tpu.memory_space<vmem>>, %arg4: memref<512x128xbf16, #tpu.memory_space<vmem>>, %arg5: memref<1x128xf32, #tpu.memory_space<vmem>>, %arg6: memref<1x1x128xf32, #tpu.memory_space<vmem>>) attributes {dimension_semantics = [#tpu.dimension_semantics<parallel>], iteration_bounds = array<i64: 2>, scalar_prefetch = 0 : i64, scratch_operands = 0 : i64, tpu.core_type = #tpu.core_type<tc>, window_params = [{transform_indices = @transform_0, window_bounds = array<i64: 1, 288, 12>}, {pipeline_mode = #tpu.pipeline_mode<synchronous>, transform_indices = @transform_1, window_bounds = array<i64: 3, 12, 512>}, {pipeline_mode = #tpu.pipeline_mode<synchronous>, transform_indices = @transform_2, window_bounds = array<i64: 1, 512>}, {pipeline_mode = #tpu.pipeline_mode<synchronous>, transform_indices = @transform_3, window_bounds = array<i64: 512, 128>}, {pipeline_mode = #tpu.pipeline_mode<synchronous>, transform_indices = @transform_4, window_bounds = array<i64: 1, 128>}, {transform_indices = @transform_5, window_bounds = array<i64: 1, 1, 128>}]} {
    %c0 = arith.constant 0 : index
    %c0_0 = arith.constant 0 : index
    %c0_1 = arith.constant 0 : index
    %0 = vector.load %arg1[%c0, %c0_0, %c0_1] : memref<1x288x12xbf16, #tpu.memory_space<vmem>>, vector<1x256x12xbf16>
    %1 = vector.shape_cast %0 : vector<1x256x12xbf16> to vector<256x12xbf16>
    %c0_2 = arith.constant 0 : index
    %c0_3 = arith.constant 0 : index
    %c0_4 = arith.constant 0 : index
    %2 = vector.load %arg2[%c0_2, %c0_3, %c0_4] : memref<3x12x512xbf16, #tpu.memory_space<vmem>>, vector<1x12x512xbf16>
    %3 = vector.shape_cast %2 : vector<1x12x512xbf16> to vector<12x512xbf16>
    %cst = arith.constant dense<0.000000e+00> : vector<256x512xf32>
    %4 = tpu.matmul %1, %3, %cst {dimension_numbers = #tpu.dot_dimension_numbers<[1], [0], [0], [1], [0, 0, 1, 1], [], []>} : vector<256x12xbf16>, vector<12x512xbf16>, vector<256x512xf32> -> vector<256x512xf32>
    %c0_5 = arith.constant 0 : index
    %c16 = arith.constant 16 : index
    %c0_6 = arith.constant 0 : index
    %5 = vector.load %arg1[%c0_5, %c16, %c0_6] : memref<1x288x12xbf16, #tpu.memory_space<vmem>>, vector<1x256x12xbf16>
    %6 = vector.shape_cast %5 : vector<1x256x12xbf16> to vector<256x12xbf16>
    %c1 = arith.constant 1 : index
    %c0_7 = arith.constant 0 : index
    %c0_8 = arith.constant 0 : index
    %7 = vector.load %arg2[%c1, %c0_7, %c0_8] : memref<3x12x512xbf16, #tpu.memory_space<vmem>>, vector<1x12x512xbf16>
    %8 = vector.shape_cast %7 : vector<1x12x512xbf16> to vector<12x512xbf16>
    %cst_9 = arith.constant dense<0.000000e+00> : vector<256x512xf32>
    %9 = tpu.matmul %6, %8, %cst_9 {dimension_numbers = #tpu.dot_dimension_numbers<[1], [0], [0], [1], [0, 0, 1, 1], [], []>} : vector<256x12xbf16>, vector<12x512xbf16>, vector<256x512xf32> -> vector<256x512xf32>
    %10 = arith.addf %4, %9 : vector<256x512xf32>
    %c0_10 = arith.constant 0 : index
    %c32 = arith.constant 32 : index
    %c0_11 = arith.constant 0 : index
    %11 = vector.load %arg1[%c0_10, %c32, %c0_11] : memref<1x288x12xbf16, #tpu.memory_space<vmem>>, vector<1x256x12xbf16>
    %12 = vector.shape_cast %11 : vector<1x256x12xbf16> to vector<256x12xbf16>
    %c2 = arith.constant 2 : index
    %c0_12 = arith.constant 0 : index
    %c0_13 = arith.constant 0 : index
    %13 = vector.load %arg2[%c2, %c0_12, %c0_13] : memref<3x12x512xbf16, #tpu.memory_space<vmem>>, vector<1x12x512xbf16>
    %14 = vector.shape_cast %13 : vector<1x12x512xbf16> to vector<12x512xbf16>
    %cst_14 = arith.constant dense<0.000000e+00> : vector<256x512xf32>
    %15 = tpu.matmul %12, %14, %cst_14 {dimension_numbers = #tpu.dot_dimension_numbers<[1], [0], [0], [1], [0, 0, 1, 1], [], []>} : vector<256x12xbf16>, vector<12x512xbf16>, vector<256x512xf32> -> vector<256x512xf32>
    %16 = arith.addf %10, %15 : vector<256x512xf32>
    %c0_15 = arith.constant 0 : index
    %c0_16 = arith.constant 0 : index
    %17 = vector.load %arg3[%c0_15, %c0_16] : memref<1x512xf32, #tpu.memory_space<vmem>>, vector<1x512xf32>
    %18 = vector.broadcast %17 : vector<1x512xf32> to vector<256x512xf32>
    %19 = arith.addf %16, %18 : vector<256x512xf32>
    %cst_17 = arith.constant 0.000000e+00 : f32
    %20 = vector.broadcast %cst_17 : f32 to vector<256x512xf32>
    %21 = arith.maximumf %19, %20 : vector<256x512xf32>
    %cst_18 = arith.constant 3.906250e-03 : f32
    %22 = vector.broadcast %cst_18 : f32 to vector<1x256xf32>
    %cst_19 = arith.constant dense<0.000000e+00> : vector<1x512xf32>
    %23 = tpu.matmul %22, %21, %cst_19 {dimension_numbers = #tpu.dot_dimension_numbers<[1], [0], [0], [1], [0, 0, 1, 1], [], []>} : vector<1x256xf32>, vector<256x512xf32>, vector<1x512xf32> -> vector<1x512xf32>
    %24 = arith.truncf %23 : vector<1x512xf32> to vector<1x512xbf16>
    %c0_20 = arith.constant 0 : index
    %c0_21 = arith.constant 0 : index
    %25 = vector.load %arg4[%c0_20, %c0_21] : memref<512x128xbf16, #tpu.memory_space<vmem>>, vector<512x128xbf16>
    %cst_22 = arith.constant dense<0.000000e+00> : vector<1x128xf32>
    %26 = tpu.matmul %24, %25, %cst_22 {dimension_numbers = #tpu.dot_dimension_numbers<[1], [0], [0], [1], [0, 0, 1, 1], [], []>} : vector<1x512xbf16>, vector<512x128xbf16>, vector<1x128xf32> -> vector<1x128xf32>
    %c0_23 = arith.constant 0 : index
    %c0_24 = arith.constant 0 : index
    %27 = vector.load %arg5[%c0_23, %c0_24] : memref<1x128xf32, #tpu.memory_space<vmem>>, vector<1x128xf32>
    %28 = arith.addf %26, %27 : vector<1x128xf32>
    %c0_25 = arith.constant 0 : index
    %c0_26 = arith.constant 0 : index
    %c0_27 = arith.constant 0 : index
    %29 = vector.load %arg6[%c0_25, %c0_26, %c0_27] : memref<1x1x128xf32, #tpu.memory_space<vmem>>, vector<1x1x128xf32>
    %30 = vector.shape_cast %29 : vector<1x1x128xf32> to vector<1x128xf32>
    %31 = vector.shape_cast %28 : vector<1x128xf32> to vector<1x1x128xf32>
    tpu.vector_store %arg6[%c0_25, %c0_26, %c0_27], %31 {strides = array<i32>} : memref<1x1x128xf32, #tpu.memory_space<vmem>>, vector<1x1x128xf32>,
    return
  }
  func.func @transform_0(%arg0: i32) -> (i32, i32, i32) {
    %c0_i32 = arith.constant 0 : i32
    %c0_i32_0 = arith.constant 0 : i32
    %c0_i32_1 = arith.constant 0 : i32
    return %arg0, %c0_i32, %c0_i32_0 : i32, i32, i32
  }
  func.func @transform_1(%arg0: i32) -> (i32, i32, i32) {
    %c0_i32 = arith.constant 0 : i32
    %c0_i32_0 = arith.constant 0 : i32
    %c0_i32_1 = arith.constant 0 : i32
    %c0_i32_2 = arith.constant 0 : i32
    return %c0_i32, %c0_i32_0, %c0_i32_1 : i32, i32, i32
  }
  func.func @transform_2(%arg0: i32) -> (i32, i32) {
    %c0_i32 = arith.constant 0 : i32
    %c0_i32_0 = arith.constant 0 : i32
    %c0_i32_1 = arith.constant 0 : i32
    return %c0_i32, %c0_i32_0 : i32, i32
  }
  func.func @transform_3(%arg0: i32) -> (i32, i32) {
    %c0_i32 = arith.constant 0 : i32
    %c0_i32_0 = arith.constant 0 : i32
    %c0_i32_1 = arith.constant 0 : i32
    return %c0_i32, %c0_i32_0 : i32, i32
  }
  func.func @transform_4(%arg0: i32) -> (i32, i32) {
    %c0_i32 = arith.constant 0 : i32
    %c0_i32_0 = arith.constant 0 : i32
    %c0_i32_1 = arith.constant 0 : i32
    return %c0_i32, %c0_i32_0 : i32, i32
  }
  func.func @transform_5(%arg0: i32) -> (i32, i32, i32) {
    %c0_i32 = arith.constant 0 : i32
    %c0_i32_0 = arith.constant 0 : i32
    %c0_i32_1 = arith.constant 0 : i32
    return %arg0, %c0_i32, %c0_i32_0 : i32, i32, i32
  }
}

</mosaic_0001>

<bundles_post_ra>
// kernel: conv_vencoder_forward.1
= control target key start
LH: loop header
LB: loop body
LE: loop exit
PB: predicated region body
PF: predicated region fallthrough
CT: control target
= control target key end

     0   :  { %s3120_s18 = smov 0   ;;  %s5149_s0 = inlined_call_operand.vmem [shape: bf16[2,288,12], index: 0, kind: input, shape index: {}]   ;;  %s5150_s1 = inlined_call_operand.vmem [shape: bf16[3,12,512], index: 1, kind: input, shape index: {}]   ;;  %s5151_s2 = inlined_call_operand.vmem [shape: f32[1,512], index: 2, kind: input, shape index: {}]   ;;  %s5152_s3 = inlined_call_operand.vmem [shape: bf16[512,128], index: 3, kind: input, shape index: {}]   ;;  %s5153_s4 = inlined_call_operand.vmem [shape: f32[1,128], index: 4, kind: input, shape index: {}]   ;;  %s5154_s5 = inlined_call_operand.vmem [shape: f32[2,1,128], index: 5, kind: output, shape index: {}]  }
   0x1 LB: > { %s2747_s19 = sadd.s32 4294967295, %s3086_s18   ;;  %p2751_p0 = scmp.ge.s32.totalorder %s3086_s18, 1  ;;  %s3086_s18 = sphi %s3120_s18, %s15_s18  }
   0x2   : > { %p187_p1 = scmp.lt.s32.totalorder %s3086_s18, 3 }
   0x4   : > { %p188_p2 = pnand %p2751_p0, %p187_p1 }
   0x6   : > { %191 = sbr.rel (%p188_p2) target bundleno = 1041 (0x411), region = 40 }
   0xb   : > { %v2997_v0 = vld [vmem:[%s5150_s1 + $0x24] ss:$16 sps:$4 sm:$0x3f]   ;;  %vm410_vm0 = vcmask 1045504   ;;  %p213_p3 = scmp.lt.s32.totalorder %s2747_s19, 1  ;;  %v3088_v3 = vmov 0  }
   0xc   : > { %2777 = vmatprep.subr.msk.bf16.mxu0 %vm410_vm0, %v2997_v0  ;;  %v2999_v1 = vld [vmem:[%s5150_s1 + $0x2c] ss:$16 sps:$4 sm:$0x3f]   ;;  %v3001_v2 = vld [vmem:[%s5150_s1 + $0x20] ss:$16 sps:$4 sm:$0x3f]   ;;  %455 = vmatprep.mubr.bf16.mxu0 %v3088_v3 }
   0xd   : > { %v3002_v4 = vld [vmem:[%s5150_s1 + $0x28] ss:$16 sps:$4 sm:$0x3f]   ;;  %648 = vmatprep.mubr.bf16.mxu1 %v3088_v3  ;;  %s5826_s19 = smov (!%p213_p3, %s2747_s19), 1  ;;  %2794 = vmatprep.subr.msk.bf16.mxu1 %vm410_vm0, %v2999_v1  ;;  %v412_v5 = vsel %vm410_vm0, %v3001_v2, 0  ;;  %vm361_vm1 = vcmask 97280  }
   0xe   : > { %v3008_v6 = vld [vmem:[%s5150_s1 + $0x4] ss:$16 sps:$4 sm:$0x3f]   ;;  %438 = vmatpush1.bf16.msra.mxu0 %v412_v5  ;;  %v418_v7 = vsel %vm410_vm0, %v3002_v4, 0  ;;  %s2986_s30 = smul.u32 144, %s5826_s19  ;;  %s220_s26 = scalar_lea.vmem %s5154_s5, %s5826_s19 }
   0xf   : > { %v3010_v8 = vld [vmem:[%s5150_s1] ss:$16 sps:$4 sm:$0x3f]   ;;  %631 = vmatpush1.bf16.msra.mxu1 %v418_v7  ;;  %2816 = vmatprep.subr.msk.bf16.mxu0 %vm410_vm0, %v3008_v6  ;;  %v3011_v9 = vld [vmem:[%s5150_s1 + $0xc] ss:$16 sps:$4 sm:$0x3f]  }
  0x10   : > { %s3162_s12 = scalar_lea.vmem %s5149_s0, %s2986_s30  ;;  %v3013_v10 = vld [vmem:[%s5150_s1 + $0x8] ss:$16 sps:$4 sm:$0x3f]   ;;  %2833 = vmatprep.subr.msk.bf16.mxu1 %vm410_vm0, %v3011_v9  ;;  %v834_v12 = vsel %vm410_vm0, %v3010_v8, 0 }
  0x11   : > { %v3168_v11 = vld [vmem:[%s3162_s12 + $0x8] sm:$0xff]   ;;  %v840_v13 = vsel %vm410_vm0, %v3013_v10, 0  ;;  %v3180_v14 = vld [vmem:[%s3162_s12 + $0x10] sm:$0xff]   ;;  %v3189_v15 = vld [vmem:[%s3162_s12 + $0x18] sm:$0xff]  }
  0x12   : > { %2778 = vmatmul.mubr.msk.bf16.vlgmr.msra.gmra.mxu0 %vm361_vm1, %v3168_v11  ;;  %2795 = vmatmul.mubr.msk.bf16.vlgmr.msra.gmra.mxu1 %vm361_vm1, %v3168_v11  ;;  %v3198_v16 = vld [vmem:[%s3162_s12 + $0x20] sm:$0xff]   ;;  %v3207_v17 = vld [vmem:[%s3162_s12 + $0x28] sm:$0xff]   ;;  %v3223_v20 = vld [vmem:[%s3162_s12 + $0x30] sm:$0xff]  }
  0x13   : > { %465 = vmatprep.mubr.bf16.mxu0 %v3088_v3  ;;  %658 = vmatprep.mubr.bf16.mxu1 %v3088_v3  ;;  %v3026_v18 = vld [vmem:[%s5150_s1 + $0x44] ss:$16 sps:$4 sm:$0x3f]   ;;  %v3029_v19 = vld [vmem:[%s5150_s1 + $0x4c] ss:$16 sps:$4 sm:$0x3f]  }
  0x14   : > { %860 = vmatpush1.bf16.msra.mxu0 %v834_v12  ;;  %1053 = vmatpush1.bf16.msra.mxu1 %v840_v13  ;;  %v3233_v21 = vld [vmem:[%s3162_s12 + $0x38] sm:$0xff]   ;;  %v3242_v22 = vld [vmem:[%s3162_s12 + $0x40] sm:$0xff]   ;;  %v3251_v23 = vld [vmem:[%s3162_s12 + $0x48] sm:$0xff]  }
  0x15   : > { %2874 = vmatprep.subr.msk.bf16.mxu0 %vm410_vm0, %v3026_v18  ;;  %2891 = vmatprep.subr.msk.bf16.mxu1 %vm410_vm0, %v3029_v19  ;;  %v3260_v24 = vld [vmem:[%s3162_s12 + $0x50] sm:$0xff]   ;;  %v3269_v25 = vld [vmem:[%s3162_s12 + $0x58] sm:$0xff]   ;;  %v3278_v26 = vld [vmem:[%s3162_s12 + $0x60] sm:$0xff]  }
  0x16   : > { %v3287_v27 = vld [vmem:[%s3162_s12 + $0x68] sm:$0xff]   ;;  %v3296_v28 = vld [vmem:[%s3162_s12 + $0x70] sm:$0xff]   ;;  %v3305_v29 = vld [vmem:[%s3162_s12 + $0x78] sm:$0xff]  }
  0x17   : > { %v3024_v30 = vld [vmem:[%s3162_s12 + $0x80] sm:$0xff]   ;;  %v3031_v32 = vld [vmem:[%s5150_s1 + $0x48] ss:$16 sps:$4 sm:$0x3f]  }
  0x18   : > { %v3028_v31 = vld [vmem:[%s5150_s1 + $0x40] ss:$16 sps:$4 sm:$0x3f]   ;;  %v1419_v35 = vsel %vm410_vm0, %v3031_v32, 0 }
  0x19   : > { %v3025_v33 = vld [vmem:[%s3162_s12] sm:$0xff]   ;;  %v1413_v34 = vsel %vm410_vm0, %v3028_v31, 0 }
  0x1a   : > { %2779 = vmatmul.mubr.msk.bf16.gmra.mxu0 %vm361_vm1, %v3180_v14  ;;  %2796 = vmatmul.mubr.msk.bf16.gmra.mxu1 %vm361_vm1, %v3180_v14 }
  0x1b   : > { %475 = vmatprep.mubr.bf16.mxu0 %v3088_v3  ;;  %668 = vmatprep.mubr.bf16.mxu1 %v3088_v3 }
  0x22   : > { %2780 = vmatmul.mubr.msk.bf16.gmra.mxu0 %vm361_vm1, %v3189_v15  ;;  %2797 = vmatmul.mubr.msk.bf16.gmra.mxu1 %vm361_vm1, %v3189_v15 }
  0x23   : > { %485 = vmatprep.mubr.bf16.mxu0 %v3088_v3  ;;  %678 = vmatprep.mubr.bf16.mxu1 %v3088_v3 }
  0x2a   : > { %2781 = vmatmul.mubr.msk.bf16.gmra.mxu0 %vm361_vm1, %v3198_v16  ;;  %2798 = vmatmul.mubr.msk.bf16.gmra.mxu1 %vm361_vm1, %v3198_v16 }
  0x2b   : > { %495 = vmatprep.mubr.bf16.mxu0 %v3088_v3  ;;  %688 = vmatprep.mubr.bf16.mxu1 %v3088_v3 }
  0x32   : > { %2782 = vmatmul.mubr.msk.bf16.gmra.mxu0 %vm361_vm1, %v3207_v17  ;;  %2799 = vmatmul.mubr.msk.bf16.gmra.mxu1 %vm361_vm1, %v3207_v17 }
  0x33   : > { %505 = vmatprep.mubr.bf16.mxu0 %v3088_v3  ;;  %698 = vmatprep.mubr.bf16.mxu1 %v3088_v3 }
  0x3a   : > { %2783 = vmatmul.mubr.msk.bf16.gmra.mxu0 %vm361_vm1, %v3223_v20  ;;  %2800 = vmatmul.mubr.msk.bf16.gmra.mxu1 %vm361_vm1, %v3223_v20 }
  0x3b   : > { %515 = vmatprep.mubr.bf16.mxu0 %v3088_v3  ;;  %708 = vmatprep.mubr.bf16.mxu1 %v3088_v3 }
  0x42   : > { %2784 = vmatmul.mubr.msk.bf16.gmra.mxu0 %vm361_vm1, %v3233_v21  ;;  %2801 = vmatmul.mubr.msk.bf16.gmra.mxu1 %vm361_vm1, %v3233_v21 }
  0x43   : > { %525 = vmatprep.mubr.bf16.mxu0 %v3088_v3  ;;  %718 = vmatprep.mubr.bf16.mxu1 %v3088_v3 }
  0x4a   : > { %2785 = vmatmul.mubr.msk.bf16.gmra.mxu0 %vm361_vm1, %v3242_v22  ;;  %2802 = vmatmul.mubr.msk.bf16.gmra.mxu1 %vm361_vm1, %v3242_v22 }
  0x4b   : > { %535 = vmatprep.mubr.bf16.mxu0 %v3088_v3  ;;  %728 = vmatprep.mubr.bf16.mxu1 %v3088_v3 }
  0x52   : > { %2786 = vmatmul.mubr.msk.bf16.gmra.mxu0 %vm361_vm1, %v3251_v23  ;;  %2803 = vmatmul.mubr.msk.bf16.gmra.mxu1 %vm361_vm1, %v3251_v23 }
  0x53   : > { %545 = vmatprep.mubr.bf16.mxu0 %v3088_v3  ;;  %738 = vmatprep.mubr.bf16.mxu1 %v3088_v3 }
  0x5a   : > { %2787 = vmatmul.mubr.msk.bf16.gmra.mxu0 %vm361_vm1, %v3260_v24  ;;  %2804 = vmatmul.mubr.msk.bf16.gmra.mxu1 %vm361_vm1, %v3260_v24 }
  0x5b   : > { %555 = vmatprep.mubr.bf16.mxu0 %v3088_v3  ;;  %748 = vmatprep.mubr.bf16.mxu1 %v3088_v3 }
  0x62   : > { %2788 = vmatmul.mubr.msk.bf16.gmra.mxu0 %vm361_vm1, %v3269_v25  ;;  %2805 = vmatmul.mubr.msk.bf16.gmra.mxu1 %vm361_vm1, %v3269_v25 }
  0x63   : > { %565 = vmatprep.mubr.bf16.mxu0 %v3088_v3  ;;  %758 = vmatprep.mubr.bf16.mxu1 %v3088_v3 }
  0x6a   : > { %2789 = vmatmul.mubr.msk.bf16.gmra.mxu0 %vm361_vm1, %v3278_v26  ;;  %2806 = vmatmul.mubr.msk.bf16.gmra.mxu1 %vm361_vm1, %v3278_v26 }
  0x6b   : > { %575 = vmatprep.mubr.bf16.mxu0 %v3088_v3  ;;  %768 = vmatprep.mubr.bf16.mxu1 %v3088_v3 }
  0x72   : > { %2790 = vmatmul.mubr.msk.bf16.gmra.mxu0 %vm361_vm1, %v3287_v27  ;;  %2807 = vmatmul.mubr.msk.bf16.gmra.mxu1 %vm361_vm1, %v3287_v27 }
  0x73   : > { %585 = vmatprep.mubr.bf16.mxu0 %v3088_v3  ;;  %778 = vmatprep.mubr.bf16.mxu1 %v3088_v3 }
  0x7a   : > { %2791 = vmatmul.mubr.msk.bf16.gmra.mxu0 %vm361_vm1, %v3296_v28  ;;  %2808 = vmatmul.mubr.msk.bf16.gmra.mxu1 %vm361_vm1, %v3296_v28 }
  0x7b   : > { %595 = vmatprep.mubr.bf16.mxu0 %v3088_v3  ;;  %788 = vmatprep.mubr.bf16.mxu1 %v3088_v3 }
  0x82   : > { %2792 = vmatmul.mubr.msk.bf16.gmra.mxu0 %vm361_vm1, %v3305_v29  ;;  %2809 = vmatmul.mubr.msk.bf16.gmra.mxu1 %vm361_vm1, %v3305_v29 }
  0x83   : > { %605 = vmatprep.mubr.bf16.mxu0 %v3088_v3  ;;  %798 = vmatprep.mubr.bf16.mxu1 %v3088_v3 }
  0x8a   : > { %2793 = vmatmul.mubr.msk.bf16.gmra.mxu0 %vm361_vm1, %v3024_v30  ;;  %2810 = vmatmul.mubr.msk.bf16.gmra.mxu1 %vm361_vm1, %v3024_v30 }
  0x8b   : > { %877 = vmatprep.mubr.bf16.mxu0 %v3088_v3  ;;  %1070 = vmatprep.mubr.bf16.mxu1 %v3088_v3 }
  0x92   : > { %2817 = vmatmul.mubr.msk.bf16.vlgmr.msra.gmra.mxu0 %vm361_vm1, %v3025_v33  ;;  %2834 = vmatmul.mubr.msk.bf16.vlgmr.msra.gmra.mxu1 %vm361_vm1, %v3025_v33 }
  0x93   : > { %887 = vmatprep.mubr.bf16.mxu0 %v3088_v3  ;;  %1080 = vmatprep.mubr.bf16.mxu1 %v3088_v3 }
  0x94   : > { %1439 = vmatpush1.bf16.msra.mxu0 %v1413_v34  ;;  %1632 = vmatpush1.bf16.msra.mxu1 %v1419_v35 }
  0x9a   : > { %2818 = vmatmul.mubr.msk.bf16.gmra.mxu0 %vm361_vm1, %v3168_v11  ;;  %2835 = vmatmul.mubr.msk.bf16.gmra.mxu1 %vm361_vm1, %v3168_v11 }
  0x9b   : > { %897 = vmatprep.mubr.bf16.mxu0 %v3088_v3  ;;  %1090 = vmatprep.mubr.bf16.mxu1 %v3088_v3 }
  0xa2   : > { %2819 = vmatmul.mubr.msk.bf16.gmra.mxu0 %vm361_vm1, %v3180_v14  ;;  %2836 = vmatmul.mubr.msk.bf16.gmra.mxu1 %vm361_vm1, %v3180_v14 }
  0xa3   : > { %907 = vmatprep.mubr.bf16.mxu0 %v3088_v3  ;;  %1100 = vmatprep.mubr.bf16.mxu1 %v3088_v3 }
  0xaa   : > { %2820 = vmatmul.mubr.msk.bf16.gmra.mxu0 %vm361_vm1, %v3189_v15  ;;  %2837 = vmatmul.mubr.msk.bf16.gmra.mxu1 %vm361_vm1, %v3189_v15 }
  0xab   : > { %917 = vmatprep.mubr.bf16.mxu0 %v3088_v3  ;;  %1110 = vmatprep.mubr.bf16.mxu1 %v3088_v3 }
  0xb2   : > { %2821 = vmatmul.mubr.msk.bf16.gmra.mxu0 %vm361_vm1, %v3198_v16  ;;  %2838 = vmatmul.mubr.msk.bf16.gmra.mxu1 %vm361_vm1, %v3198_v16 }
  0xb3   : > { %927 = vmatprep.mubr.bf16.mxu0 %v3088_v3  ;;  %1120 = vmatprep.mubr.bf16.mxu1 %v3088_v3 }
  0xba   : > { %2822 = vmatmul.mubr.msk.bf16.gmra.mxu0 %vm361_vm1, %v3207_v17  ;;  %2839 = vmatmul.mubr.msk.bf16.gmra.mxu1 %vm361_vm1, %v3207_v17 }
  0xbb   : > { %937 = vmatprep.mubr.bf16.mxu0 %v3088_v3  ;;  %1130 = vmatprep.mubr.bf16.mxu1 %v3088_v3 }
  0xc2   : > { %2823 = vmatmul.mubr.msk.bf16.gmra.mxu0 %vm361_vm1, %v3223_v20  ;;  %2840 = vmatmul.mubr.msk.bf16.gmra.mxu1 %vm361_vm1, %v3223_v20 }
  0xc3   : > { %947 = vmatprep.mubr.bf16.mxu0 %v3088_v3  ;;  %1140 = vmatprep.mubr.bf16.mxu1 %v3088_v3 }
  0xca   : > { %2824 = vmatmul.mubr.msk.bf16.gmra.mxu0 %vm361_vm1, %v3233_v21  ;;  %2841 = vmatmul.mubr.msk.bf16.gmra.mxu1 %vm361_vm1, %v3233_v21 }
  0xcb   : > { %957 = vmatprep.mubr.bf16.mxu0 %v3088_v3  ;;  %1150 = vmatprep.mubr.bf16.mxu1 %v3088_v3 }
  0xd2   : > { %v3373_v36 = vpop.f32.mrf.mxu0  ;;  %v3375_v37 = vpop.f32.mrf.mxu1  ;;  %2825 = vmatmul.mubr.msk.bf16.gmra.mxu0 %vm361_vm1, %v3242_v22  ;;  %2842 = vmatmul.mubr.msk.bf16.gmra.mxu1 %vm361_vm1, %v3242_v22 }
  0xd3   : > { %967 = vmatprep.mubr.bf16.mxu0 %v3088_v3  ;;  %1160 = vmatprep.mubr.bf16.mxu1 %v3088_v3 }
  0xd4   : > { %v3383_v38 = vpop.f32.mrf.mxu0  ;;  %v3385_v39 = vpop.f32.mrf.mxu1 }
  0xd6   : > { %v3387_v40 = vpop.f32.mrf.mxu0  ;;  %v3389_v41 = vpop.f32.mrf.mxu1 }
  0xd8   : > { %v3391_v42 = vpop.f32.mrf.mxu0  ;;  %v3393_v43 = vpop.f32.mrf.mxu1 }
  0xda   : > { %v3395_v44 = vpop.f32.mrf.mxu0  ;;  %v3397_v45 = vpop.f32.mrf.mxu1  ;;  %2826 = vmatmul.mubr.msk.bf16.gmra.mxu0 %vm361_vm1, %v3251_v23  ;;  %2843 = vmatmul.mubr.msk.bf16.gmra.mxu1 %vm361_vm1, %v3251_v23 }
  0xdb   : > { %977 = vmatprep.mubr.bf16.mxu0 %v3088_v3  ;;  %1170 = vmatprep.mubr.bf16.mxu1 %v3088_v3 }
  0xdc   : > { %v3405_v46 = vpop.f32.mrf.mxu0  ;;  %v3407_v47 = vpop.f32.mrf.mxu1 }
  0xde   : > { %v3409_v48 = vpop.f32.mrf.mxu0  ;;  %v3411_v49 = vpop.f32.mrf.mxu1 }
  0xe0   : > { %v3413_v50 = vpop.f32.mrf.mxu0  ;;  %v3415_v51 = vpop.f32.mrf.mxu1 }
  0xe2   : > { %v3417_v52 = vpop.f32.mrf.mxu0  ;;  %v3419_v53 = vpop.f32.mrf.mxu1  ;;  %2827 = vmatmul.mubr.msk.bf16.gmra.mxu0 %vm361_vm1, %v3260_v24  ;;  %2844 = vmatmul.mubr.msk.bf16.gmra.mxu1 %vm361_vm1, %v3260_v24 }
  0xe3   : > { %987 = vmatprep.mubr.bf16.mxu0 %v3088_v3  ;;  %1180 = vmatprep.mubr.bf16.mxu1 %v3088_v3 }
  0xe4   : > { %v3427_v54 = vpop.f32.mrf.mxu0  ;;  %v3429_v55 = vpop.f32.mrf.mxu1 }
  0xe6   : > { %v3431_v56 = vpop.f32.mrf.mxu0  ;;  %v3433_v57 = vpop.f32.mrf.mxu1 }
  0xe8   : > { %v3435_v58 = vpop.f32.mrf.mxu0  ;;  %v3437_v59 = vpop.f32.mrf.mxu1 }
  0xea   : > { %v3439_v60 = vpop.f32.mrf.mxu0  ;;  %v3441_v61 = vpop.f32.mrf.mxu1  ;;  %2828 = vmatmul.mubr.msk.bf16.gmra.mxu0 %vm361_vm1, %v3269_v25  ;;  %2845 = vmatmul.mubr.msk.bf16.gmra.mxu1 %vm361_vm1, %v3269_v25 }
  0xeb   : > { %997 = vmatprep.mubr.bf16.mxu0 %v3088_v3  ;;  %1190 = vmatprep.mubr.bf16.mxu1 %v3088_v3 }
  0xec   : > { %v3449_v62 = vpop.f32.mrf.mxu0  ;;  %v3451_v63 = vpop.f32.mrf.mxu1 }
  0xed   : > { %5165 = vst [vmem:[#allocation2_spill] sm:$0xff] %v3451_v63 }
  0xee   : > { %v3453_v0 = vpop.f32.mrf.mxu0  ;;  %v3455_v1 = vpop.f32.mrf.mxu1 }
  0xef   : > { %5166 = vst [vmem:[#allocation3_spill] sm:$0xff] %v3453_v0  ;;  %5167 = vst [vmem:[#allocation4_spill] sm:$0xff] %v3455_v1 }
  0xf0   : > { %v3457_v2 = vpop.f32.mrf.mxu0  ;;  %v3459_v4 = vpop.f32.mrf.mxu1 }
  0xf1   : > { %5168 = vst [vmem:[#allocation5_spill] sm:$0xff] %v3457_v2  ;;  %5169 = vst [vmem:[#allocation6_spill] sm:$0xff] %v3459_v4  ;;  %v3044_v4 = vld [vmem:[%s3162_s12 + $0x70] sm:$0xff]  }
  0xf2   : > { %v3461_v5 = vpop.f32.mrf.mxu0  ;;  %v3463_v6 = vpop.f32.mrf.mxu1  ;;  %2829 = vmatmul.mubr.msk.bf16.gmra.mxu0 %vm361_vm1, %v3278_v26  ;;  %2846 = vmatmul.mubr.msk.bf16.gmra.mxu1 %vm361_vm1, %v3278_v26 }
  0xf3   : > { %5170 = vst [vmem:[#allocation7_spill] sm:$0xff] %v3461_v5  ;;  %5171 = vst [vmem:[#allocation8_spill] sm:$0xff] %v3463_v6  ;;  %1007 = vmatprep.mubr.bf16.mxu0 %v3088_v3  ;;  %1200 = vmatprep.mubr.bf16.mxu1 %v3088_v3 }
  0xf4   : > { %v3471_v7 = vpop.f32.mrf.mxu0  ;;  %v3473_v8 = vpop.f32.mrf.mxu1 }
  0xf5   : > { %5172 = vst [vmem:[#allocation9_spill] sm:$0xff] %v3471_v7  ;;  %5173 = vst [vmem:[#allocation10_spill] sm:$0xff] %v3473_v8 }
  0xf6   : > { %v3475_v9 = vpop.f32.mrf.mxu0  ;;  %v3477_v10 = vpop.f32.mrf.mxu1 }
  0xf7   : > { %5174 = vst [vmem:[#allocation11_spill] sm:$0xff] %v3475_v9  ;;  %5175 = vst [vmem:[#allocation12_spill] sm:$0xff] %v3477_v10 }
  0xf8   : > { %v3479_v11 = vpop.f32.mrf.mxu0  ;;  %v3481_v12 = vpop.f32.mrf.mxu1 }
  0xf9   : > { %5176 = vst [vmem:[#allocation13_spill] sm:$0xff] %v3479_v11  ;;  %5177 = vst [vmem:[#allocation14_spill] sm:$0xff] %v3481_v12  ;;  %v3043_v12 = vld [vmem:[%s3162_s12 + $0x68] sm:$0xff]  }
  0xfa   : > { %v3483_v13 = vpop.f32.mrf.mxu0  ;;  %v3485_v14 = vpop.f32.mrf.mxu1  ;;  %2830 = vmatmul.mubr.msk.bf16.gmra.mxu0 %vm361_vm1, %v3287_v27  ;;  %2847 = vmatmul.mubr.msk.bf16.gmra.mxu1 %vm361_vm1, %v3287_v27 }
  0xfb   : > { %5178 = vst [vmem:[#allocation15_spill] sm:$0xff] %v3483_v13  ;;  %5179 = vst [vmem:[#allocation16_spill] sm:$0xff] %v3485_v14  ;;  %1017 = vmatprep.mubr.bf16.mxu0 %v3088_v3  ;;  %1210 = vmatprep.mubr.bf16.mxu1 %v3088_v3 }
  0xfc   : > { %v3493_v15 = vpop.f32.mrf.mxu0  ;;  %v3495_v16 = vpop.f32.mrf.mxu1 }
  0xfd   : > { %5180 = vst [vmem:[#allocation17_spill] sm:$0xff] %v3493_v15  ;;  %5181 = vst [vmem:[#allocation18_spill] sm:$0xff] %v3495_v16 }
  0xfe   : > { %v3497_v17 = vpop.f32.mrf.mxu0  ;;  %v3499_v18 = vpop.f32.mrf.mxu1 }
  0xff   : > { %5182 = vst [vmem:[#allocation19_spill] sm:$0xff] %v3497_v17  ;;  %5183 = vst [vmem:[#allocation20_spill] sm:$0xff] %v3499_v18 }
 0x100   : > { %v3501_v19 = vpop.f32.mrf.mxu0  ;;  %v3503_v20 = vpop.f32.mrf.mxu1 }
 0x101   : > { %5184 = vst [vmem:[#allocation21_spill] sm:$0xff] %v3501_v19  ;;  %5185 = vst [vmem:[#allocation22_spill] sm:$0xff] %v3503_v20  ;;  %v3042_v20 = vld [vmem:[%s3162_s12 + $0x60] sm:$0xff]  }
 0x102   : > { %v3505_v21 = vpop.f32.mrf.mxu0  ;;  %v3507_v22 = vpop.f32.mrf.mxu1  ;;  %2831 = vmatmul.mubr.msk.bf16.gmra.mxu0 %vm361_vm1, %v3296_v28  ;;  %2848 = vmatmul.mubr.msk.bf16.gmra.mxu1 %vm361_vm1, %v3296_v28 }
 0x103   : > { %5186 = vst [vmem:[#allocation23_spill] sm:$0xff] %v3505_v21  ;;  %5187 = vst [vmem:[#allocation24_spill] sm:$0xff] %v3507_v22  ;;  %1027 = vmatprep.mubr.bf16.mxu0 %v3088_v3  ;;  %1220 = vmatprep.mubr.bf16.mxu1 %v3088_v3 }
 0x104   : > { %v3515_v23 = vpop.f32.mrf.mxu0  ;;  %v3517_v24 = vpop.f32.mrf.mxu1 }
 0x105   : > { %5188 = vst [vmem:[#allocation25_spill] sm:$0xff] %v3515_v23  ;;  %5189 = vst [vmem:[#allocation26_spill] sm:$0xff] %v3517_v24 }
 0x106   : > { %v3519_v25 = vpop.f32.mrf.mxu0  ;;  %v3521_v26 = vpop.f32.mrf.mxu1 }
 0x107   : > { %5190 = vst [vmem:[#allocation27_spill] sm:$0xff] %v3519_v25  ;;  %5191 = vst [vmem:[#allocation28_spill] sm:$0xff] %v3521_v26 }
 0x108   : > { %v3523_v27 = vpop.f32.mrf.mxu0  ;;  %v3525_v30 = vpop.f32.mrf.mxu1 }
 0x109   : > { %5192 = vst [vmem:[#allocation29_spill] sm:$0xff] %v3523_v27  ;;  %5193 = vst [vmem:[#allocation30_spill] sm:$0xff] %v3525_v30 }
 0x10a   : > { %v3527_v31 = vpop.f32.mrf.mxu0  ;;  %v3529_v28 = vpop.f32.mrf.mxu1  ;;  %2832 = vmatmul.mubr.msk.bf16.gmra.mxu0 %vm361_vm1, %v3305_v29  ;;  %2849 = vmatmul.mubr.msk.bf16.gmra.mxu1 %vm361_vm1, %v3305_v29 }
 0x10b   : > { %5194 = vst [vmem:[#allocation31_spill] sm:$0xff] %v3527_v31  ;;  %5195 = vst [vmem:[#allocation32_spill] sm:$0xff] %v3529_v28  ;;  %1456 = vmatprep.mubr.bf16.mxu0 %v3088_v3  ;;  %1649 = vmatprep.mubr.bf16.mxu1 %v3088_v3  ;;  %v3032_v28 = vld [vmem:[%s3162_s12 + $0x10] sm:$0xff]  }
 0x10c   : > { %v3537_v32 = vpop.f32.mrf.mxu0  ;;  %v3539_v33 = vpop.f32.mrf.mxu1 }
 0x10d   : > { %5196 = vst [vmem:[#allocation33_spill] sm:$0xff] %v3537_v32  ;;  %5197 = vst [vmem:[#allocation34_spill] sm:$0xff] %v3539_v33 }
 0x10e   : > { %v3541_v34 = vpop.f32.mrf.mxu0  ;;  %v3543_v35 = vpop.f32.mrf.mxu1 }
 0x10f   : > { %5198 = vst [vmem:[#allocation35_spill] sm:$0xff] %v3541_v34  ;;  %5199 = vst [vmem:[#allocation36_spill] sm:$0xff] %v3543_v35 }
 0x110   : > { %v3546_v31 = vpop.f32.mrf.mxu0  ;;  %v3548_v30 = vpop.f32.mrf.mxu1 }
 0x111   : > { %5200 = vst [vmem:[#allocation37_spill] sm:$0xff] %v3546_v31  ;;  %5201 = vst [vmem:[#allocation38_spill] sm:$0xff] %v3548_v30 }
 0x112   : > { %v3550_v27 = vpop.f32.mrf.mxu0  ;;  %v3552_v29 = vpop.f32.mrf.mxu1  ;;  %2875 = vmatmul.mubr.msk.bf16.vlgmr.msra.gmra.mxu0 %vm361_vm1, %v3032_v28  ;;  %2892 = vmatmul.mubr.msk.bf16.vlgmr.msra.gmra.mxu1 %vm361_vm1, %v3032_v28 }
 0x113   : > { %5202 = vst [vmem:[#allocation39_spill] sm:$0xff] %v3550_v27  ;;  %5203 = vst [vmem:[#allocation40_spill] sm:$0xff] %v3552_v29  ;;  %1466 = vmatprep.mubr.bf16.mxu0 %v3088_v3  ;;  %1659 = vmatprep.mubr.bf16.mxu1 %v3088_v3  ;;  %v3033_v27 = vld [vmem:[%s3162_s12 + $0x18] sm:$0xff]  }
 0x114   : > { %v3558_v34 = vpop.f32.mrf.mxu0  ;;  %v3560_v35 = vpop.f32.mrf.mxu1 }
 0x115   : > { %5204 = vst [vmem:[#allocation41_spill] sm:$0xff] %v3558_v34  ;;  %5205 = vst [vmem:[#allocation42_spill] sm:$0xff] %v3560_v35 }
 0x116   : > { %v3562_v31 = vpop.f32.mrf.mxu0  ;;  %v3564_v30 = vpop.f32.mrf.mxu1 }
 0x117   : > { %5206 = vst [vmem:[#allocation43_spill] sm:$0xff] %v3562_v31  ;;  %5207 = vst [vmem:[#allocation44_spill] sm:$0xff] %v3564_v30 }
 0x118   : > { %v3567_v33 = vpop.f32.mrf.mxu0  ;;  %v3569_v29 = vpop.f32.mrf.mxu1 }
 0x119   : > { %5208 = vst [vmem:[#allocation45_spill] sm:$0xff] %v3567_v33  ;;  %5209 = vst [vmem:[#allocation46_spill] sm:$0xff] %v3569_v29 }
 0x11a   : > { %v3571_v32 = vpop.f32.mrf.mxu0  ;;  %v3573_v28 = vpop.f32.mrf.mxu1  ;;  %2876 = vmatmul.mubr.msk.bf16.gmra.mxu0 %vm361_vm1, %v3033_v27  ;;  %2893 = vmatmul.mubr.msk.bf16.gmra.mxu1 %vm361_vm1, %v3033_v27 }
 0x11b   : > { %5210 = vst [vmem:[#allocation47_spill] sm:$0xff] %v3571_v32  ;;  %5211 = vst [vmem:[#allocation48_spill] sm:$0xff] %v3573_v28  ;;  %1476 = vmatprep.mubr.bf16.mxu0 %v3088_v3  ;;  %1669 = vmatprep.mubr.bf16.mxu1 %v3088_v3  ;;  %v3034_v32 = vld [vmem:[%s3162_s12 + $0x20] sm:$0xff]  }
 0x11c   : > { %v3579_v31 = vpop.f32.mrf.mxu0  ;;  %v3581_v30 = vpop.f32.mrf.mxu1 }
 0x11d   : > { %5212 = vst [vmem:[#allocation49_spill] sm:$0xff] %v3579_v31  ;;  %5213 = vst [vmem:[#allocation50_spill] sm:$0xff] %v3581_v30 }
 0x11e   : > { %v3583_v33 = vpop.f32.mrf.mxu0  ;;  %v3585_v29 = vpop.f32.mrf.mxu1 }
 0x11f   : > { %5214 = vst [vmem:[#allocation51_spill] sm:$0xff] %v3583_v33  ;;  %5215 = vst [vmem:[#allocation52_spill] sm:$0xff] %v3585_v29 }
 0x120   : > { %v3588_v35 = vpop.f32.mrf.mxu0  ;;  %v3590_v28 = vpop.f32.mrf.mxu1 }
 0x121   : > { %5216 = vst [vmem:[#allocation53_spill] sm:$0xff] %v3588_v35  ;;  %5217 = vst [vmem:[#allocation54_spill] sm:$0xff] %v3590_v28 }
 0x122   : > { %v3592_v34 = vpop.f32.mrf.mxu0  ;;  %v3594_v27 = vpop.f32.mrf.mxu1  ;;  %2877 = vmatmul.mubr.msk.bf16.gmra.mxu0 %vm361_vm1, %v3034_v32  ;;  %2894 = vmatmul.mubr.msk.bf16.gmra.mxu1 %vm361_vm1, %v3034_v32 }
 0x123   : > { %5218 = vst [vmem:[#allocation55_spill] sm:$0xff] %v3592_v34  ;;  %5219 = vst [vmem:[#allocation56_spill] sm:$0xff] %v3594_v27  ;;  %1486 = vmatprep.mubr.bf16.mxu0 %v3088_v3  ;;  %1679 = vmatprep.mubr.bf16.mxu1 %v3088_v3  ;;  %v3035_v34 = vld [vmem:[%s3162_s12 + $0x28] sm:$0xff]  }
 0x124   : > { %v3600_v33 = vpop.f32.mrf.mxu0  ;;  %v3602_v29 = vpop.f32.mrf.mxu1 }
 0x125   : > { %5220 = vst [vmem:[#allocation57_spill] sm:$0xff] %v3600_v33  ;;  %5221 = vst [vmem:[#allocation58_spill] sm:$0xff] %v3602_v29 }
 0x126   : > { %v3604_v35 = vpop.f32.mrf.mxu0  ;;  %v3606_v28 = vpop.f32.mrf.mxu1 }
 0x127   : > { %5222 = vst [vmem:[#allocation59_spill] sm:$0xff] %v3604_v35  ;;  %5223 = vst [vmem:[#allocation60_spill] sm:$0xff] %v3606_v28 }
 0x128   : > { %v3609_v30 = vpop.f32.mrf.mxu0  ;;  %v3611_v27 = vpop.f32.mrf.mxu1 }
 0x129   : > { %5224 = vst [vmem:[#allocation61_spill] sm:$0xff] %v3609_v30  ;;  %5225 = vst [vmem:[#allocation62_spill] sm:$0xff] %v3611_v27 }
 0x12a   : > { %v3613_v31 = vpop.f32.mrf.mxu0  ;;  %v3615_v32 = vpop.f32.mrf.mxu1  ;;  %2878 = vmatmul.mubr.msk.bf16.gmra.mxu0 %vm361_vm1, %v3035_v34  ;;  %2895 = vmatmul.mubr.msk.bf16.gmra.mxu1 %vm361_vm1, %v3035_v34 }
 0x12b   : > { %5226 = vst [vmem:[#allocation63_spill] sm:$0xff] %v3613_v31  ;;  %5227 = vst [vmem:[#allocation64_spill] sm:$0xff] %v3615_v32  ;;  %1496 = vmatprep.mubr.bf16.mxu0 %v3088_v3  ;;  %1689 = vmatprep.mubr.bf16.mxu1 %v3088_v3  ;;  %v3036_v31 = vld [vmem:[%s3162_s12 + $0x30] sm:$0xff]  }
 0x12c   : > { %v3621_v35 = vpop.f32.mrf.mxu0  ;;  %v3623_v28 = vpop.f32.mrf.mxu1 }
 0x12d   : > { %5228 = vst [vmem:[#allocation65_spill] sm:$0xff] %v3621_v35  ;;  %5229 = vst [vmem:[#allocation66_spill] sm:$0xff] %v3623_v28 }
 0x12e   : > { %v3625_v30 = vpop.f32.mrf.mxu0  ;;  %v3627_v27 = vpop.f32.mrf.mxu1 }
 0x12f   : > { %5230 = vst [vmem:[#allocation67_spill] sm:$0xff] %v3625_v30  ;;  %5231 = vst [vmem:[#allocation68_spill] sm:$0xff] %v3627_v27 }
 0x130   : > { %v3630_v29 = vpop.f32.mrf.mxu0  ;;  %v3632_v32 = vpop.f32.mrf.mxu1 }
 0x131   : > { %5232 = vst [vmem:[#allocation69_spill] sm:$0xff] %v3630_v29  ;;  %5233 = vst [vmem:[#allocation70_spill] sm:$0xff] %v3632_v32 }
 0x132   : > { %v3634_v33 = vpop.f32.mrf.mxu0  ;;  %v3636_v34 = vpop.f32.mrf.mxu1  ;;  %2879 = vmatmul.mubr.msk.bf16.gmra.mxu0 %vm361_vm1, %v3036_v31  ;;  %2896 = vmatmul.mubr.msk.bf16.gmra.mxu1 %vm361_vm1, %v3036_v31 }
 0x133   : > { %5234 = vst [vmem:[#allocation71_spill] sm:$0xff] %v3634_v33  ;;  %5235 = vst [vmem:[#allocation72_spill] sm:$0xff] %v3636_v34  ;;  %1506 = vmatprep.mubr.bf16.mxu0 %v3088_v3  ;;  %1699 = vmatprep.mubr.bf16.mxu1 %v3088_v3  ;;  %v3037_v33 = vld [vmem:[%s3162_s12 + $0x38] sm:$0xff]  }
 0x134   : > { %v3642_v30 = vpop.f32.mrf.mxu0  ;;  %v3644_v27 = vpop.f32.mrf.mxu1 }
 0x135   : > { %5236 = vst [vmem:[#allocation73_spill] sm:$0xff] %v3642_v30  ;;  %5237 = vst [vmem:[#allocation74_spill] sm:$0xff] %v3644_v27 }
 0x136   : > { %v3646_v29 = vpop.f32.mrf.mxu0  ;;  %v3648_v32 = vpop.f32.mrf.mxu1 }
 0x137   : > { %5238 = vst [vmem:[#allocation75_spill] sm:$0xff] %v3646_v29  ;;  %5239 = vst [vmem:[#allocation76_spill] sm:$0xff] %v3648_v32 }
 0x138   : > { %v3651_v28 = vpop.f32.mrf.mxu0  ;;  %v3653_v34 = vpop.f32.mrf.mxu1 }
 0x139   : > { %5240 = vst [vmem:[#allocation77_spill] sm:$0xff] %v3651_v28  ;;  %5241 = vst [vmem:[#allocation78_spill] sm:$0xff] %v3653_v34 }
 0x13a   : > { %v3655_v35 = vpop.f32.mrf.mxu0  ;;  %v3657_v31 = vpop.f32.mrf.mxu1  ;;  %2880 = vmatmul.mubr.msk.bf16.gmra.mxu0 %vm361_vm1, %v3037_v33  ;;  %2897 = vmatmul.mubr.msk.bf16.gmra.mxu1 %vm361_vm1, %v3037_v33 }
 0x13b   : > { %5242 = vst [vmem:[#allocation79_spill] sm:$0xff] %v3655_v35  ;;  %5243 = vst [vmem:[#allocation80_spill] sm:$0xff] %v3657_v31  ;;  %1516 = vmatprep.mubr.bf16.mxu0 %v3088_v3  ;;  %1709 = vmatprep.mubr.bf16.mxu1 %v3088_v3  ;;  %v3038_v35 = vld [vmem:[%s3162_s12 + $0x40] sm:$0xff]  }
 0x13c   : > { %v3663_v29 = vpop.f32.mrf.mxu0  ;;  %v3665_v32 = vpop.f32.mrf.mxu1 }
 0x13d   : > { %5244 = vst [vmem:[#allocation81_spill] sm:$0xff] %v3663_v29  ;;  %5245 = vst [vmem:[#allocation82_spill] sm:$0xff] %v3665_v32 }
 0x13e   : > { %v3667_v28 = vpop.f32.mrf.mxu0  ;;  %v3669_v34 = vpop.f32.mrf.mxu1 }
 0x13f   : > { %5246 = vst [vmem:[#allocation83_spill] sm:$0xff] %v3667_v28  ;;  %5247 = vst [vmem:[#allocation84_spill] sm:$0xff] %v3669_v34 }
 0x140   : > { %v3672_v27 = vpop.f32.mrf.mxu0  ;;  %v3674_v31 = vpop.f32.mrf.mxu1 }
 0x141   : > { %5248 = vst [vmem:[#allocation85_spill] sm:$0xff] %v3672_v27  ;;  %5249 = vst [vmem:[#allocation86_spill] sm:$0xff] %v3674_v31 }
 0x142   : > { %v3676_v30 = vpop.f32.mrf.mxu0  ;;  %v3678_v33 = vpop.f32.mrf.mxu1  ;;  %2881 = vmatmul.mubr.msk.bf16.gmra.mxu0 %vm361_vm1, %v3038_v35  ;;  %2898 = vmatmul.mubr.msk.bf16.gmra.mxu1 %vm361_vm1, %v3038_v35 }
 0x143   : > { %5250 = vst [vmem:[#allocation87_spill] sm:$0xff] %v3676_v30  ;;  %5251 = vst [vmem:[#allocation88_spill] sm:$0xff] %v3678_v33  ;;  %1526 = vmatprep.mubr.bf16.mxu0 %v3088_v3  ;;  %1719 = vmatprep.mubr.bf16.mxu1 %v3088_v3  ;;  %v3039_v30 = vld [vmem:[%s3162_s12 + $0x48] sm:$0xff]  }
 0x144   : > { %v3684_v28 = vpop.f32.mrf.mxu0  ;;  %v3686_v34 = vpop.f32.mrf.mxu1 }
 0x145   : > { %5252 = vst [vmem:[#allocation89_spill] sm:$0xff] %v3684_v28  ;;  %5253 = vst [vmem:[#allocation90_spill] sm:$0xff] %v3686_v34 }
 0x146   : > { %v3688_v27 = vpop.f32.mrf.mxu0  ;;  %v3690_v31 = vpop.f32.mrf.mxu1 }
 0x147   : > { %5254 = vst [vmem:[#allocation91_spill] sm:$0xff] %v3688_v27  ;;  %5255 = vst [vmem:[#allocation92_spill] sm:$0xff] %v3690_v31 }
 0x148   : > { %v3693_v32 = vpop.f32.mrf.mxu0  ;;  %v3695_v33 = vpop.f32.mrf.mxu1 }
 0x149   : > { %5256 = vst [vmem:[#allocation93_spill] sm:$0xff] %v3693_v32  ;;  %5257 = vst [vmem:[#allocation94_spill] sm:$0xff] %v3695_v33 }
 0x14a   : > { %v3697_v29 = vpop.f32.mrf.mxu0  ;;  %v3699_v35 = vpop.f32.mrf.mxu1  ;;  %2882 = vmatmul.mubr.msk.bf16.gmra.mxu0 %vm361_vm1, %v3039_v30  ;;  %2899 = vmatmul.mubr.msk.bf16.gmra.mxu1 %vm361_vm1, %v3039_v30 }
 0x14b   : > { %5258 = vst [vmem:[#allocation95_spill] sm:$0xff] %v3697_v29  ;;  %5259 = vst [vmem:[#allocation96_spill] sm:$0xff] %v3699_v35  ;;  %1536 = vmatprep.mubr.bf16.mxu0 %v3088_v3  ;;  %1729 = vmatprep.mubr.bf16.mxu1 %v3088_v3  ;;  %v3040_v29 = vld [vmem:[%s3162_s12 + $0x50] sm:$0xff]  }
 0x14c   : > { %v3705_v27 = vpop.f32.mrf.mxu0  ;;  %v3707_v31 = vpop.f32.mrf.mxu1 }
 0x14d   : > { %5260 = vst [vmem:[#allocation97_spill] sm:$0xff] %v3705_v27  ;;  %5261 = vst [vmem:[#allocation98_spill] sm:$0xff] %v3707_v31  ;;  %v3041_v31 = vld [vmem:[%s3162_s12 + $0x58] sm:$0xff]  }
 0x14e   : > { %v3709_v32 = vpop.f32.mrf.mxu0  ;;  %v3711_v33 = vpop.f32.mrf.mxu1 }
 0x14f   : > { %5262 = vst [vmem:[#allocation99_spill] sm:$0xff] %v3709_v32  ;;  %5263 = vst [vmem:[#allocation100_spill] sm:$0xff] %v3711_v33 }
 0x150   : > { %v3714_v34 = vpop.f32.mrf.mxu0  ;;  %v3716_v35 = vpop.f32.mrf.mxu1 }
 0x151   : > { %5264 = vst [vmem:[#allocation101_spill] sm:$0xff] %v3714_v34  ;;  %5265 = vst [vmem:[#allocation102_spill] sm:$0xff] %v3716_v35 }
 0x152   : > { %v3718_v28 = vpop.f32.mrf.mxu0  ;;  %v3720_v30 = vpop.f32.mrf.mxu1  ;;  %2883 = vmatmul.mubr.msk.bf16.gmra.mxu0 %vm361_vm1, %v3040_v29  ;;  %2900 = vmatmul.mubr.msk.bf16.gmra.mxu1 %vm361_vm1, %v3040_v29 }
 0x153   : > { %1546 = vmatprep.mubr.bf16.mxu0 %v3088_v3  ;;  %1739 = vmatprep.mubr.bf16.mxu1 %v3088_v3 }
 0x154   : > { %v3726_v32 = vpop.f32.mrf.mxu0  ;;  %v3728_v33 = vpop.f32.mrf.mxu1 }
 0x156   : > { %v3730_v34 = vpop.f32.mrf.mxu0  ;;  %v3732_v35 = vpop.f32.mrf.mxu1 }
 0x158   : > { %v3735_v27 = vpop.f32.mrf.mxu0  ;;  %v3737_v26 = vpop.f32.mrf.mxu1 }
 0x15a   : > { %v3739_v25 = vpop.f32.mrf.mxu0  ;;  %v3741_v29 = vpop.f32.mrf.mxu1  ;;  %2884 = vmatmul.mubr.msk.bf16.gmra.mxu0 %vm361_vm1, %v3041_v31  ;;  %2901 = vmatmul.mubr.msk.bf16.gmra.mxu1 %vm361_vm1, %v3041_v31 }
 0x15b   : > { %1556 = vmatprep.mubr.bf16.mxu0 %v3088_v3  ;;  %1749 = vmatprep.mubr.bf16.mxu1 %v3088_v3 }
 0x15c   : > { %v3747_v24 = vpop.f32.mrf.mxu0  ;;  %v3749_v23 = vpop.f32.mrf.mxu1 }
 0x15e   : > { %v3751_v22 = vpop.f32.mrf.mxu0  ;;  %v3753_v21 = vpop.f32.mrf.mxu1 }
 0x160   : > { %v3756_v19 = vpop.f32.mrf.mxu0  ;;  %v3758_v18 = vpop.f32.mrf.mxu1 }
 0x162   : > { %v3760_v17 = vpop.f32.mrf.mxu0  ;;  %v3762_v31 = vpop.f32.mrf.mxu1  ;;  %2885 = vmatmul.mubr.msk.bf16.gmra.mxu0 %vm361_vm1, %v3042_v20  ;;  %2902 = vmatmul.mubr.msk.bf16.gmra.mxu1 %vm361_vm1, %v3042_v20 }
 0x163   : > { %1566 = vmatprep.mubr.bf16.mxu0 %v3088_v3  ;;  %1759 = vmatprep.mubr.bf16.mxu1 %v3088_v3 }
 0x164   : > { %v3768_v16 = vpop.f32.mrf.mxu0  ;;  %v3770_v15 = vpop.f32.mrf.mxu1 }
 0x166   : > { %v3772_v14 = vpop.f32.mrf.mxu0  ;;  %v3774_v13 = vpop.f32.mrf.mxu1 }
 0x168   : > { %v3777_v11 = vpop.f32.mrf.mxu0  ;;  %v3779_v10 = vpop.f32.mrf.mxu1 }
 0x16a   : > { %v3781_v9 = vpop.f32.mrf.mxu0  ;;  %v3783_v20 = vpop.f32.mrf.mxu1  ;;  %2886 = vmatmul.mubr.msk.bf16.gmra.mxu0 %vm361_vm1, %v3043_v12  ;;  %2903 = vmatmul.mubr.msk.bf16.gmra.mxu1 %vm361_vm1, %v3043_v12 }
 0x16b   : > { %1576 = vmatprep.mubr.bf16.mxu0 %v3088_v3  ;;  %1769 = vmatprep.mubr.bf16.mxu1 %v3088_v3 }
 0x16c   : > { %v3789_v8 = vpop.f32.mrf.mxu0  ;;  %v3791_v7 = vpop.f32.mrf.mxu1 }
 0x16d   : > { %5266 = vst [vmem:[#allocation103_spill] sm:$0xff] %v3789_v8  ;;  %5267 = vst [vmem:[#allocation104_spill] sm:$0xff] %v3791_v7 }
 0x16e   : > { %v3793_v6 = vpop.f32.mrf.mxu0  ;;  %v3795_v5 = vpop.f32.mrf.mxu1 }
 0x16f   : > { %5268 = vst [vmem:[#allocation105_spill] sm:$0xff] %v3793_v6  ;;  %5269 = vst [vmem:[#allocation106_spill] sm:$0xff] %v3795_v5 }
 0x170   : > { %v3798_v2 = vpop.f32.mrf.mxu0  ;;  %v3800_v1 = vpop.f32.mrf.mxu1 }
 0x171   : > { %5270 = vst [vmem:[#allocation107_spill] sm:$0xff] %v3798_v2  ;;  %5271 = vst [vmem:[#allocation108_spill] sm:$0xff] %v3800_v1 }
 0x172   : > { %v3802_v0 = vpop.f32.mrf.mxu0  ;;  %v3804_v12 = vpop.f32.mrf.mxu1  ;;  %2887 = vmatmul.mubr.msk.bf16.gmra.mxu0 %vm361_vm1, %v3044_v4  ;;  %2904 = vmatmul.mubr.msk.bf16.gmra.mxu1 %vm361_vm1, %v3044_v4 }
 0x173   : > { %5272 = vst [vmem:[#allocation109_spill] sm:$0xff] %v3802_v0  ;;  %5273 = vst [vmem:[#allocation110_spill] sm:$0xff] %v3804_v12  ;;  %1586 = vmatprep.mubr.bf16.mxu0 %v3088_v3  ;;  %1779 = vmatprep.mubr.bf16.mxu1 %v3088_v3  ;;  %v3045_v0 = vld [vmem:[%s3162_s12 + $0x78] sm:$0xff]  }
 0x174   : > { %v3810_v6 = vpop.f32.mrf.mxu0  ;;  %v3812_v5 = vpop.f32.mrf.mxu1 }
 0x175   : > { %5274 = vst [vmem:[#allocation111_spill] sm:$0xff] %v3810_v6  ;;  %5275 = vst [vmem:[#allocation112_spill] sm:$0xff] %v3812_v5 }
 0x176   : > { %v3814_v2 = vpop.f32.mrf.mxu0  ;;  %v3816_v1 = vpop.f32.mrf.mxu1 }
 0x177   : > { %5276 = vst [vmem:[#allocation113_spill] sm:$0xff] %v3814_v2  ;;  %5277 = vst [vmem:[#allocation114_spill] sm:$0xff] %v3816_v1 }
 0x178   : > { %v3819_v7 = vpop.f32.mrf.mxu0  ;;  %v3821_v12 = vpop.f32.mrf.mxu1 }
 0x179   : > { %5278 = vst [vmem:[#allocation115_spill] sm:$0xff] %v3819_v7  ;;  %5279 = vst [vmem:[#allocation116_spill] sm:$0xff] %v3821_v12 }
 0x17a   : > { %v3823_v63 = vpop.f32.mrf.mxu0  ;;  %v3825_v4 = vpop.f32.mrf.mxu1  ;;  %2888 = vmatmul.mubr.msk.bf16.gmra.mxu0 %vm361_vm1, %v3045_v0  ;;  %2905 = vmatmul.mubr.msk.bf16.gmra.mxu1 %vm361_vm1, %v3045_v0 }
 0x17b   : > { %5280 = vst [vmem:[#allocation117_spill] sm:$0xff] %v3823_v63  ;;  %5281 = vst [vmem:[#allocation118_spill] sm:$0xff] %v3825_v4  ;;  %1596 = vmatprep.mubr.bf16.mxu0 %v3088_v3  ;;  %1789 = vmatprep.mubr.bf16.mxu1 %v3088_v3  ;;  %v3046_v63 = vld [vmem:[%s3162_s12 + $0x80] sm:$0xff]  }
 0x17c   : > { %v3831_v2 = vpop.f32.mrf.mxu0  ;;  %v3833_v1 = vpop.f32.mrf.mxu1 }
 0x17d   : > { %5282 = vst [vmem:[#allocation119_spill] sm:$0xff] %v3831_v2  ;;  %5283 = vst [vmem:[#allocation120_spill] sm:$0xff] %v3833_v1 }
 0x17e   : > { %v3835_v7 = vpop.f32.mrf.mxu0  ;;  %v3837_v12 = vpop.f32.mrf.mxu1 }
 0x17f   : > { %5284 = vst [vmem:[#allocation121_spill] sm:$0xff] %v3835_v7  ;;  %5285 = vst [vmem:[#allocation122_spill] sm:$0xff] %v3837_v12 }
 0x180   : > { %v3840_v5 = vpop.f32.mrf.mxu0  ;;  %v3842_v4 = vpop.f32.mrf.mxu1 }
 0x181   : > { %5286 = vst [vmem:[#allocation123_spill] sm:$0xff] %v3840_v5  ;;  %5287 = vst [vmem:[#allocation124_spill] sm:$0xff] %v3842_v4  ;;  %v3047_v4 = vld [vmem:[%s3162_s12 + $0x88] sm:$0xff]  }
 0x182   : > { %v3844_v6 = vpop.f32.mrf.mxu0  ;;  %v3846_v0 = vpop.f32.mrf.mxu1  ;;  %2889 = vmatmul.mubr.msk.bf16.gmra.mxu0 %vm361_vm1, %v3046_v63  ;;  %2906 = vmatmul.mubr.msk.bf16.gmra.mxu1 %vm361_vm1, %v3046_v63 }
 0x183   : > { %5288 = vst [vmem:[#allocation125_spill] sm:$0xff] %v3844_v6  ;;  %5289 = vst [vmem:[#allocation126_spill] sm:$0xff] %v3846_v0  ;;  %1606 = vmatprep.mubr.bf16.mxu0 %v3088_v3  ;;  %1799 = vmatprep.mubr.bf16.mxu1 %v3088_v3 }
 0x184   : > { %v3852_v7 = vpop.f32.mrf.mxu0  ;;  %v3854_v12 = vpop.f32.mrf.mxu1 }
 0x185   : > { %5290 = vst [vmem:[#allocation127_spill] sm:$0xff] %v3852_v7  ;;  %5291 = vst [vmem:[#allocation128_spill] sm:$0xff] %v3854_v12 }
 0x186   : > { %v3856_v1 = vpop.f32.mrf.mxu0  ;;  %v3858_v5 = vpop.f32.mrf.mxu1 }
 0x187   : > { %5292 = vst [vmem:[#allocation129_spill] sm:$0xff] %v3856_v1  ;;  %5293 = vst [vmem:[#allocation130_spill] sm:$0xff] %v3858_v5 }
 0x188   : > { %v3861_v6 = vpop.f32.mrf.mxu0  ;;  %v3863_v0 = vpop.f32.mrf.mxu1 }
 0x189   : > { %5294 = vst [vmem:[#allocation131_spill] sm:$0xff] %v3861_v6  ;;  %5295 = vst [vmem:[#allocation132_spill] sm:$0xff] %v3863_v0 }
 0x18a   : > { %v3865_v2 = vpop.f32.mrf.mxu0  ;;  %v3867_v63 = vpop.f32.mrf.mxu1  ;;  %2890 = vmatmul.mubr.msk.bf16.gmra.mxu0 %vm361_vm1, %v3047_v4  ;;  %2907 = vmatmul.mubr.msk.bf16.gmra.mxu1 %vm361_vm1, %v3047_v4 }
 0x18b   : > { %5296 = vst [vmem:[#allocation133_spill] sm:$0xff] %v3865_v2  ;;  %5297 = vst [vmem:[#allocation134_spill] sm:$0xff] %v3867_v63 }
 0x18c   : > { %v3871_v3 = vpop.f32.mrf.mxu0  ;;  %v3873_v12 = vpop.f32.mrf.mxu1 }
 0x18d   : > { %5298 = vst [vmem:[#allocation135_spill] sm:$0xff] %v3871_v3  ;;  %5299 = vst [vmem:[#allocation136_spill] sm:$0xff] %v3873_v12 }
 0x18e   : > { %v3875_v1 = vpop.f32.mrf.mxu0  ;;  %v3877_v5 = vpop.f32.mrf.mxu1 }
 0x18f   : > { %5300 = vst [vmem:[#allocation137_spill] sm:$0xff] %v3875_v1  ;;  %5301 = vst [vmem:[#allocation138_spill] sm:$0xff] %v3877_v5 }
 0x190   : > { %v3879_v7 = vpop.f32.mrf.mxu0  ;;  %v3881_v6 = vpop.f32.mrf.mxu1 }
 0x191   : > { %5302 = vst [vmem:[#allocation139_spill] sm:$0xff] %v3879_v7  ;;  %5303 = vst [vmem:[#allocation140_spill] sm:$0xff] %v3881_v6 }
 0x192   : > { %v3883_v0 = vpop.f32.mrf.mxu0  ;;  %v3885_v2 = vpop.f32.mrf.mxu1 }
 0x193   : > { %5304 = vst [vmem:[#allocation141_spill] sm:$0xff] %v3883_v0  ;;  %5305 = vst [vmem:[#allocation142_spill] sm:$0xff] %v3885_v2 }
 0x194   : > { %v3887_v63 = vpop.f32.mrf.mxu0  ;;  %v3889_v8 = vpop.f32.mrf.mxu1 }
 0x195   : > { %5306 = vst [vmem:[#allocation143_spill] sm:$0xff] %v3887_v63  ;;  %5307 = vst [vmem:[#allocation144_spill] sm:$0xff] %v3889_v8 }
 0x196   : > { %v3891_v4 = vpop.f32.mrf.mxu0  ;;  %v3893_v3 = vpop.f32.mrf.mxu1 }
 0x197   : > { %5308 = vst [vmem:[#allocation145_spill] sm:$0xff] %v3891_v4  ;;  %5309 = vst [vmem:[#allocation146_spill] sm:$0xff] %v3893_v3 }
 0x198   : > { %v3895_v12 = vpop.f32.mrf.mxu0  ;;  %v3897_v1 = vpop.f32.mrf.mxu1 }
 0x199   : > { %5310 = vst [vmem:[#allocation147_spill] sm:$0xff] %v3895_v12  ;;  %5311 = vst [vmem:[#allocation148_spill] sm:$0xff] %v3897_v1 }
 0x19a   : > { %v3899_v5 = vpop.f32.mrf.mxu0  ;;  %v3901_v7 = vpop.f32.mrf.mxu1 }
 0x19b   : > { %5312 = vst [vmem:[#allocation149_spill] sm:$0xff] %v3899_v5  ;;  %5313 = vst [vmem:[#allocation150_spill] sm:$0xff] %v3901_v7 }
 0x19c   : > { %v3903_v6 = vpop.f32.mrf.mxu0  ;;  %v3905_v0 = vpop.f32.mrf.mxu1 }
 0x19d   : > { %5314 = vst [vmem:[#allocation151_spill] sm:$0xff] %v3903_v6  ;;  %5315 = vst [vmem:[#allocation152_spill] sm:$0xff] %v3905_v0 }
 0x19e   : > { %v3907_v2 = vpop.f32.mrf.mxu0  ;;  %v3909_v63 = vpop.f32.mrf.mxu1 }
 0x19f   : > { %5316 = vst [vmem:[#allocation153_spill] sm:$0xff] %v3907_v2  ;;  %5317 = vst [vmem:[#allocation154_spill] sm:$0xff] %v3909_v63 }
 0x1a0   : > { %v3911_v8 = vpop.f32.mrf.mxu0  ;;  %v3913_v4 = vpop.f32.mrf.mxu1 }
 0x1a1   : > { %5318 = vst [vmem:[#allocation155_spill] sm:$0xff] %v3911_v8  ;;  %5319 = vst [vmem:[#allocation156_spill] sm:$0xff] %v3913_v4 }
 0x1a2   : > { %v3915_v3 = vpop.f32.mrf.mxu0  ;;  %v3917_v12 = vpop.f32.mrf.mxu1 }
 0x1a3   : > { %5320 = vst [vmem:[#allocation157_spill] sm:$0xff] %v3915_v3  ;;  %5321 = vst [vmem:[#allocation158_spill] sm:$0xff] %v3917_v12 }
 0x1a4   : > { %v3919_v1 = vpop.f32.mrf.mxu0  ;;  %v3921_v5 = vpop.f32.mrf.mxu1 }
 0x1a5   : > { %5322 = vst [vmem:[#allocation159_spill] sm:$0xff] %v3919_v1  ;;  %5323 = vst [vmem:[#allocation160_spill] sm:$0xff] %v3921_v5 }
 0x1a6   : > { %v3923_v7 = vpop.f32.mrf.mxu0  ;;  %v3925_v6 = vpop.f32.mrf.mxu1 }
 0x1a7   : > { %5324 = vst [vmem:[#allocation161_spill] sm:$0xff] %v3923_v7  ;;  %5325 = vst [vmem:[#allocation162_spill] sm:$0xff] %v3925_v6 }
 0x1a8   : > { %v3927_v0 = vpop.f32.mrf.mxu0  ;;  %v3929_v2 = vpop.f32.mrf.mxu1 }
 0x1a9   : > { %5326 = vst [vmem:[#allocation163_spill] sm:$0xff] %v3927_v0  ;;  %5327 = vst [vmem:[#allocation164_spill] sm:$0xff] %v3929_v2 }
 0x1aa   : > { %v3931_v63 = vpop.f32.mrf.mxu0  ;;  %v3933_v8 = vpop.f32.mrf.mxu1 }
 0x1ab   : > { %5328 = vst [vmem:[#allocation165_spill] sm:$0xff] %v3931_v63  ;;  %5329 = vst [vmem:[#allocation166_spill] sm:$0xff] %v3933_v8 }
 0x1ac   : > { %v3935_v4 = vpop.f32.mrf.mxu0  ;;  %v3937_v3 = vpop.f32.mrf.mxu1 }
 0x1ad   : > { %5330 = vst [vmem:[#allocation167_spill] sm:$0xff] %v3935_v4  ;;  %5331 = vst [vmem:[#allocation168_spill] sm:$0xff] %v3937_v3 }
 0x1ae   : > { %v3939_v12 = vpop.f32.mrf.mxu0  ;;  %v3941_v1 = vpop.f32.mrf.mxu1 }
 0x1af   : > { %5332 = vst [vmem:[#allocation169_spill] sm:$0xff] %v3939_v12  ;;  %5333 = vst [vmem:[#allocation170_spill] sm:$0xff] %v3941_v1 }
 0x1b0   : > { %v3943_v5 = vpop.f32.mrf.mxu0  ;;  %v3945_v7 = vpop.f32.mrf.mxu1 }
 0x1b1   : > { %5334 = vst [vmem:[#allocation171_spill] sm:$0xff] %v3943_v5  ;;  %5335 = vst [vmem:[#allocation172_spill] sm:$0xff] %v3945_v7 }
 0x1b2   : > { %v3947_v6 = vpop.f32.mrf.mxu0  ;;  %v3949_v0 = vpop.f32.mrf.mxu1 }
 0x1b3   : > { %5336 = vst [vmem:[#allocation173_spill] sm:$0xff] %v3947_v6  ;;  %5337 = vst [vmem:[#allocation174_spill] sm:$0xff] %v3949_v0 }
 0x1b4   : > { %v3951_v2 = vpop.f32.mrf.mxu0  ;;  %v3953_v63 = vpop.f32.mrf.mxu1 }
 0x1b5   : > { %5338 = vst [vmem:[#allocation175_spill] sm:$0xff] %v3951_v2  ;;  %5339 = vst [vmem:[#allocation176_spill] sm:$0xff] %v3953_v63 }
 0x1b6   : > { %v3955_v8 = vpop.f32.mrf.mxu0  ;;  %v3957_v4 = vpop.f32.mrf.mxu1 }
 0x1b7   : > { %5340 = vst [vmem:[#allocation177_spill] sm:$0xff] %v3955_v8  ;;  %5341 = vst [vmem:[#allocation178_spill] sm:$0xff] %v3957_v4 }
 0x1b8   : > { %v3959_v3 = vpop.f32.mrf.mxu0  ;;  %v3961_v12 = vpop.f32.mrf.mxu1 }
 0x1b9   : > { %5342 = vst [vmem:[#allocation179_spill] sm:$0xff] %v3959_v3  ;;  %5343 = vst [vmem:[#allocation180_spill] sm:$0xff] %v3961_v12 }
 0x1ba   : > { %v3963_v1 = vpop.f32.mrf.mxu0  ;;  %v3965_v5 = vpop.f32.mrf.mxu1 }
 0x1bb   : > { %5344 = vst [vmem:[#allocation181_spill] sm:$0xff] %v3963_v1  ;;  %5345 = vst [vmem:[#allocation182_spill] sm:$0xff] %v3965_v5 }
 0x1bc   : > { %v3967_v7 = vpop.f32.mrf.mxu0  ;;  %v3969_v6 = vpop.f32.mrf.mxu1 }
 0x1bd   : > { %5346 = vst [vmem:[#allocation183_spill] sm:$0xff] %v3967_v7  ;;  %5347 = vst [vmem:[#allocation184_spill] sm:$0xff] %v3969_v6 }
 0x1be   : > { %v3971_v0 = vpop.f32.mrf.mxu0  ;;  %v3973_v2 = vpop.f32.mrf.mxu1 }
 0x1bf   : > { %5348 = vst [vmem:[#allocation185_spill] sm:$0xff] %v3971_v0  ;;  %5349 = vst [vmem:[#allocation186_spill] sm:$0xff] %v3973_v2 }
 0x1c0   : > { %v3975_v63 = vpop.f32.mrf.mxu0  ;;  %v3977_v8 = vpop.f32.mrf.mxu1 }
 0x1c1   : > { %5350 = vst [vmem:[#allocation187_spill] sm:$0xff] %v3975_v63  ;;  %5351 = vst [vmem:[#allocation188_spill] sm:$0xff] %v3977_v8 }
 0x1c2   : > { %v3979_v4 = vpop.f32.mrf.mxu0  ;;  %v3981_v3 = vpop.f32.mrf.mxu1 }
 0x1c3   : > { %5352 = vst [vmem:[#allocation189_spill] sm:$0xff] %v3979_v4  ;;  %5353 = vst [vmem:[#allocation190_spill] sm:$0xff] %v3981_v3 }
 0x1c4   : > { %v3983_v12 = vpop.f32.mrf.mxu0  ;;  %v3985_v1 = vpop.f32.mrf.mxu1 }
 0x1c5   : > { %5354 = vst [vmem:[#allocation191_spill] sm:$0xff] %v3983_v12  ;;  %5355 = vst [vmem:[#allocation192_spill] sm:$0xff] %v3985_v1 }
 0x1c6   : > { %v3987_v5 = vpop.f32.mrf.mxu0  ;;  %v3989_v7 = vpop.f32.mrf.mxu1 }
 0x1c7   : > { %5356 = vst [vmem:[#allocation193_spill] sm:$0xff] %v3987_v5  ;;  %5357 = vst [vmem:[#allocation194_spill] sm:$0xff] %v3989_v7 }
 0x1c8   : > { %v3991_v6 = vpop.f32.mrf.mxu0  ;;  %v3993_v0 = vpop.f32.mrf.mxu1 }
 0x1c9   : > { %5358 = vst [vmem:[#allocation195_spill] sm:$0xff] %v3991_v6  ;;  %5359 = vst [vmem:[#allocation196_spill] sm:$0xff] %v3993_v0  ;;  %v880_v6 = vadd.f32 %v3718_v28, %v3373_v36  ;;  %v1077_v28 = vadd.f32 %v3732_v35, %v3389_v41  ;;  %v1083_v41 = vadd.f32 %v3741_v29, %v3397_v45 }
 0x1ca   : > { %v3995_v2 = vpop.f32.mrf.mxu0  ;;  %v3997_v63 = vpop.f32.mrf.mxu1  ;;  %v894_v45 = vadd.f32 %v3751_v22, %v3409_v48  ;;  %v1087_v29 = vadd.f32 %v3753_v21, %v3411_v49  ;;  %v900_v21 = vadd.f32 %v3760_v17, %v3417_v52  ;;  %v904_v52 = vadd.f32 %v3772_v14, %v3431_v56 }
 0x1cb   : > { %5360 = vst [vmem:[#allocation197_spill] sm:$0xff] %v3995_v2  ;;  %5361 = vst [vmem:[#allocation198_spill] sm:$0xff] %v3997_v63  ;;  %v1073_v2 = vadd.f32 %v3720_v30, %v3375_v37  ;;  %v884_v37 = vadd.f32 %v3730_v34, %v3387_v40  ;;  %v890_v40 = vadd.f32 %v3739_v25, %v3395_v44 }
 0x1cc   : > { %v3999_v8 = vpop.f32.mrf.mxu0  ;;  %v4001_v4 = vpop.f32.mrf.mxu1  ;;  %v1085_v30 = vadd.f32 %v3749_v23, %v3407_v47  ;;  %v1089_v47 = vadd.f32 %v3758_v18, %v3415_v51  ;;  %v902_v51 = vadd.f32 %v3768_v16, %v3427_v54  ;;  %v1095_v18 = vadd.f32 %v3770_v15, %v3429_v55 }
 0x1cd   : > { %5362 = vst [vmem:[#allocation199_spill] sm:$0xff] %v3999_v8  ;;  %5363 = vst [vmem:[#allocation200_spill] sm:$0xff] %v4001_v4  ;;  %v882_v8 = vadd.f32 %v3726_v32, %v3383_v38  ;;  %v1940_v15 = vlaneseq }
 0x1ce   : > { %v4003_v3 = vpop.f32.mrf.mxu0  ;;  %v4005_v12 = vpop.f32.mrf.mxu1 }
 0x1cf   : > { %5364 = vst [vmem:[#allocation201_spill] sm:$0xff] %v4003_v3  ;;  %5365 = vst [vmem:[#allocation202_spill] sm:$0xff] %v4005_v12  ;;  %v1075_v3 = vadd.f32 %v3728_v33, %v3385_v39  ;;  %v886_v39 = vadd.f32 %v3735_v27, %v3391_v42 }
 0x1d0   : > { %v4007_v1 = vpop.f32.mrf.mxu0  ;;  %v4009_v5 = vpop.f32.mrf.mxu1 }
 0x1d1   : > { %5366 = vst [vmem:[#allocation203_spill] sm:$0xff] %v4007_v1  ;;  %5367 = vst [vmem:[#allocation204_spill] sm:$0xff] %v4009_v5 }
 0x1d2   : > { %v1458_v0 = vpop.f32.mrf.mxu0  ;;  %v1651_v63 = vpop.f32.mrf.mxu1 }
 0x1d3   : > { %v4019_v4 = vadd.f32 %v1458_v0, %v880_v6  ;;  %v4021_v12 = vadd.f32 %v1651_v63, %v1073_v2  ;;  %v1079_v2 = vadd.f32 %v3737_v26, %v3393_v43  ;;  %v892_v26 = vadd.f32 %v3747_v24, %v3405_v46 }
 0x1d4   : > { %v1460_v1 = vpop.f32.mrf.mxu0  ;;  %v1653_v5 = vpop.f32.mrf.mxu1  ;;  %v896_v46 = vadd.f32 %v3756_v19, %v3413_v50 }
 0x1d5   : > { %5368 = vst [vmem:[#allocation205_spill] sm:$0xff] %v4019_v4  ;;  %5369 = vst [vmem:[#allocation206_spill] sm:$0xff] %v4021_v12  ;;  %v4023_v7 = vadd.f32 %v1460_v1, %v882_v8  ;;  %v4025_v36 = vadd.f32 %v1653_v5, %v1075_v3 }
 0x1d6   : > { %v1462_v38 = vpop.f32.mrf.mxu0  ;;  %v1655_v32 = vpop.f32.mrf.mxu1 }
 0x1d7   : > { %5370 = vst [vmem:[#allocation207_spill] sm:$0xff] %v4023_v7  ;;  %5371 = vst [vmem:[#allocation208_spill] sm:$0xff] %v4025_v36  ;;  %v4035_v6 = vadd.f32 %v1462_v38, %v884_v37  ;;  %v4037_v1 = vadd.f32 %v1655_v32, %v1077_v28  ;;  %v1093_v38 = vadd.f32 %v3762_v31, %v3419_v53  ;;  %v5412_v36 = vld [vmem:[#allocation112_spill] sm:$0xff]  ;;  %v5414_v7 = vld [vmem:[#allocation113_spill] sm:$0xff] }
 0x1d8   : > { %v1464_v5 = vpop.f32.mrf.mxu0  ;;  %v1657_v8 = vpop.f32.mrf.mxu1  ;;  %v1097_v53 = vadd.f32 %v3774_v13, %v3433_v57  ;;  %v1941_v57 = vshrl.u32 %v1940_v15, 7  ;;  %v5399_v15 = vld [vmem:[#allocation4_spill] sm:$0xff] }
 0x1d9   : > { %5372 = vst [vmem:[#allocation209_spill] sm:$0xff] %v4035_v6  ;;  %5373 = vst [vmem:[#allocation210_spill] sm:$0xff] %v4037_v1  ;;  %v4043_v34 = vadd.f32 %v1464_v5, %v886_v39  ;;  %v4045_v33 = vadd.f32 %v1657_v8, %v1079_v2  ;;  %v5416_v1 = vld [vmem:[#allocation114_spill] sm:$0xff]  ;;  %v5418_v6 = vld [vmem:[#allocation115_spill] sm:$0xff] }
 0x1da   : > { %v1468_v42 = vpop.f32.mrf.mxu0  ;;  %v1661_v27 = vpop.f32.mrf.mxu1 }
 0x1db   : > { %5374 = vst [vmem:[#allocation211_spill] sm:$0xff] %v4043_v34  ;;  %5375 = vst [vmem:[#allocation212_spill] sm:$0xff] %v4045_v33  ;;  %v4047_v35 = vadd.f32 %v1468_v42, %v890_v40  ;;  %v4049_v43 = vadd.f32 %v1661_v27, %v1083_v41  ;;  %v5420_v33 = vld [vmem:[#allocation116_spill] sm:$0xff] }
 0x1dc   : > { %v1470_v44 = vpop.f32.mrf.mxu0  ;;  %v1663_v25 = vpop.f32.mrf.mxu1 }
 0x1dd   : > { %5376 = vst [vmem:[#allocation213_spill] sm:$0xff] %v4047_v35  ;;  %5377 = vst [vmem:[#allocation214_spill] sm:$0xff] %v4049_v43  ;;  %v4059_v0 = vadd.f32 %v1470_v44, %v892_v26  ;;  %v4061_v63 = vadd.f32 %v1663_v25, %v1085_v30  ;;  %v1942_v30 = vsub.s32 0, %v1941_v57  ;;  %v1950_v44 = vsub.s32 2, %v1941_v57  ;;  %v5421_v43 = vld [vmem:[#allocation15_spill] sm:$0xff]  ;;  %v5422_v35 = vld [vmem:[#allocation117_spill] sm:$0xff] }
 0x1de   : > { %v1472_v3 = vpop.f32.mrf.mxu0  ;;  %v1665_v37 = vpop.f32.mrf.mxu1  ;;  %v1946_v25 = vsub.s32 1, %v1941_v57 }
 0x1df   : > { %5378 = vst [vmem:[#allocation215_spill] sm:$0xff] %v4059_v0  ;;  %5379 = vst [vmem:[#allocation216_spill] sm:$0xff] %v4061_v63  ;;  %v4067_v23 = vadd.f32 %v1472_v3, %v894_v45  ;;  %v4069_v24 = vadd.f32 %v1665_v37, %v1087_v29  ;;  %v1938_v3 = vld [vmem:[%s5151_s2] sm:$0xf]  ;;  %v1954_v37 = vsub.s32 3, %v1941_v57  ;;  %v5427_v0 = vld [vmem:[#allocation119_spill] sm:$0xff] }
 0x1e0   : > { %v1474_v48 = vpop.f32.mrf.mxu0  ;;  %v1667_v22 = vpop.f32.mrf.mxu1  ;;  %v5400_v57 = vld [vmem:[#allocation106_spill] sm:$0xff] }
 0x1e1   : > { %5380 = vst [vmem:[#allocation217_spill] sm:$0xff] %v4067_v23  ;;  %5381 = vst [vmem:[#allocation218_spill] sm:$0xff] %v4069_v24  ;;  %v4071_v28 = vadd.f32 %v1474_v48, %v896_v46  ;;  %v4073_v49 = vadd.f32 %v1667_v22, %v1089_v47  ;;  %v4126_v48 = vrot.slane %v1938_v3, %v1942_v30  ;;  %v5402_v30 = vld [vmem:[#allocation107_spill] sm:$0xff]  ;;  %v5424_v63 = vld [vmem:[#allocation118_spill] sm:$0xff] }
 0x1e2   : > { %v1478_v50 = vpop.f32.mrf.mxu0  ;;  %v1671_v19 = vpop.f32.mrf.mxu1  ;;  %v4128_v22 = vrot.slane %v1938_v3, %v1950_v44  ;;  %v5155_v44 = vmov 0.00390625   ;;  %v5431_v24 = vld [vmem:[#allocation120_spill] sm:$0xff]  ;;  %v5434_v23 = vld [vmem:[#allocation121_spill] sm:$0xff] }
 0x1e3   : > { %5382 = vst [vmem:[#allocation219_spill] sm:$0xff] %v4071_v28  ;;  %5383 = vst [vmem:[#allocation220_spill] sm:$0xff] %v4073_v49  ;;  %v4083_v32 = vadd.f32 %v1478_v50, %v900_v21  ;;  %v4085_v39 = vadd.f32 %v1671_v19, %v1093_v38  ;;  %v4130_v21 = vrot.slane %v1938_v3, %v1946_v25  ;;  %2280 = vmatprep.mubr.f32.mxu0 %v5155_v44  ;;  %v5403_v25 = vld [vmem:[#allocation6_spill] sm:$0xff]  ;;  %v5439_v28 = vld [vmem:[#allocation123_spill] sm:$0xff] }
 0x1e4   : > { %v1480_v2 = vpop.f32.mrf.mxu0  ;;  %v1673_v5 = vpop.f32.mrf.mxu1  ;;  %5390 = vst [vmem:[#allocation227_spill] sm:$0xff] %v4126_v48  ;;  %5391 = vst [vmem:[#allocation228_spill] sm:$0xff] %v4128_v22  ;;  %v4138_v19 = vadd.f32 %v3777_v11, %v3435_v58  ;;  %v5395_v58 = vld [vmem:[#allocation2_spill] sm:$0xff]  ;;  %v5396_v11 = vld [vmem:[#allocation104_spill] sm:$0xff]  ;;  %2351 = vmatprep.mubr.f32.mxu1 %v5155_v44 }
 0x1e5   : > { %5384 = vst [vmem:[#allocation221_spill] sm:$0xff] %v4083_v32  ;;  %5385 = vst [vmem:[#allocation222_spill] sm:$0xff] %v4085_v39  ;;  %v4091_v17 = vadd.f32 %v1480_v2, %v902_v51  ;;  %v4093_v31 = vadd.f32 %v1673_v5, %v1095_v18  ;;  %v4142_v51 = vadd.f32 %v3779_v10, %v3437_v59  ;;  %v5411_v44 = vld [vmem:[#allocation10_spill] sm:$0xff]  ;;  %v5441_v39 = vld [vmem:[#allocation124_spill] sm:$0xff] }
 0x1e6   : > { %v1482_v54 = vpop.f32.mrf.mxu0  ;;  %v1675_v16 = vpop.f32.mrf.mxu1  ;;  %5392 = vst [vmem:[#allocation229_spill] sm:$0xff] %v4130_v21  ;;  %v4146_v18 = vadd.f32 %v3781_v9, %v3439_v60  ;;  %v4148_v2 = vrot.slane %v1938_v3, %v1954_v37  ;;  %v4152_v5 = vadd.f32 %v3783_v20, %v3441_v61  ;;  %v5397_v60 = vld [vmem:[#allocation3_spill] sm:$0xff]  ;;  %v5398_v9 = vld [vmem:[#allocation105_spill] sm:$0xff]  ;;  %v4172_v61 = vadd.f32 %v5400_v57, %v5399_v15  ;;  %v5404_v3 = vld [vmem:[#allocation108_spill] sm:$0xff] }
 0x1e7   : > { %5386 = vst [vmem:[#allocation223_spill] sm:$0xff] %v4091_v17  ;;  %5387 = vst [vmem:[#allocation224_spill] sm:$0xff] %v4093_v31  ;;  %v4095_v8 = vadd.f32 %v1482_v54, %v904_v52  ;;  %v4097_v55 = vadd.f32 %v1675_v16, %v1097_v53  ;;  %v5394_v52 = vld [vmem:[#allocation103_spill] sm:$0xff]  ;;  %v4160_v54 = vadd.f32 %v5396_v11, %v5395_v58  ;;  %v5401_v20 = vld [vmem:[#allocation5_spill] sm:$0xff] }
 0x1e8   : > { %v4099_v40 = vpop.f32.mrf.mxu0  ;;  %v4101_v41 = vpop.f32.mrf.mxu1  ;;  %5393 = vst [vmem:[#allocation230_spill] sm:$0xff] %v4148_v2  ;;  %v4156_v53 = vadd.f32 %v5394_v52, %v3449_v62  ;;  %v4168_v16 = vadd.f32 %v5398_v9, %v5397_v60  ;;  %v4176_v62 = vadd.f32 %v5402_v30, %v5401_v20  ;;  %v4182_v37 = vadd.f32 %v5404_v3, %v5403_v25  ;;  %v5405_v52 = vld [vmem:[#allocation7_spill] sm:$0xff]  ;;  %v5406_v58 = vld [vmem:[#allocation109_spill] sm:$0xff]  ;;  %v5407_v60 = vld [vmem:[#allocation8_spill] sm:$0xff] }
 0x1e9   : > { %5388 = vst [vmem:[#allocation225_spill] sm:$0xff] %v4095_v8  ;;  %5389 = vst [vmem:[#allocation226_spill] sm:$0xff] %v4097_v55  ;;  %v4186_v11 = vadd.f32 %v5406_v58, %v5405_v52  ;;  %v5408_v9 = vld [vmem:[#allocation110_spill] sm:$0xff]  ;;  %v5409_v57 = vld [vmem:[#allocation9_spill] sm:$0xff]  ;;  %v4202_v25 = vadd.f32 %v5412_v36, %v5411_v44  ;;  %v4222_v36 = vadd.f32 %v5422_v35, %v5421_v43 }
 0x1ea   : > { %v4103_v42 = vpop.f32.mrf.mxu0  ;;  %v4105_v56 = vpop.f32.mrf.mxu1  ;;  %v4190_v15 = vadd.f32 %v5408_v9, %v5407_v60  ;;  %v5410_v20 = vld [vmem:[#allocation111_spill] sm:$0xff]  ;;  %v5415_v58 = vld [vmem:[#allocation12_spill] sm:$0xff]  ;;  %v5417_v9 = vld [vmem:[#allocation13_spill] sm:$0xff] }
 0x1eb   : > { %v4194_v30 = vadd.f32 %v5410_v20, %v5409_v57  ;;  %v5413_v3 = vld [vmem:[#allocation11_spill] sm:$0xff]  ;;  %v4210_v60 = vadd.f32 %v5416_v1, %v5415_v58  ;;  %v4214_v57 = vadd.f32 %v5418_v6, %v5417_v9  ;;  %v5419_v20 = vld [vmem:[#allocation14_spill] sm:$0xff]  ;;  %v5423_v44 = vld [vmem:[#allocation16_spill] sm:$0xff] }
 0x1ec   : > { %v4107_v13 = vpop.f32.mrf.mxu0  ;;  %v4109_v14 = vpop.f32.mrf.mxu1  ;;  %v4206_v52 = vadd.f32 %v5414_v7, %v5413_v3  ;;  %v4218_v34 = vadd.f32 %v5420_v33, %v5419_v20  ;;  %v4226_v7 = vadd.f32 %v5424_v63, %v5423_v44  ;;  %v5426_v3 = vld [vmem:[#allocation17_spill] sm:$0xff]  ;;  %v5430_v9 = vld [vmem:[#allocation18_spill] sm:$0xff]  ;;  %v5433_v20 = vld [vmem:[#allocation19_spill] sm:$0xff] }
 0x1ed   : > { %v4230_v1 = vadd.f32 %v5427_v0, %v5426_v3  ;;  %v4238_v33 = vadd.f32 %v5431_v24, %v5430_v9  ;;  %v4242_v35 = vadd.f32 %v5434_v23, %v5433_v20  ;;  %v5435_v43 = vld [vmem:[#allocation20_spill] sm:$0xff]  ;;  %v5436_v49 = vld [vmem:[#allocation122_spill] sm:$0xff]  ;;  %v5438_v44 = vld [vmem:[#allocation21_spill] sm:$0xff] }
 0x1ee   : > { %v4111_v27 = vpop.f32.mrf.mxu0  ;;  %v4113_v26 = vpop.f32.mrf.mxu1  ;;  %5425 = vst [vmem:[#allocation103_spill] sm:$0xff] %v4226_v7  ;;  %v4246_v63 = vadd.f32 %v5436_v49, %v5435_v43  ;;  %v4250_v0 = vadd.f32 %v5439_v28, %v5438_v44  ;;  %v5440_v3 = vld [vmem:[#allocation22_spill] sm:$0xff]  ;;  %v5442_v31 = vld [vmem:[#allocation23_spill] sm:$0xff]  ;;  %v5443_v17 = vld [vmem:[#allocation125_spill] sm:$0xff] }
 0x1ef   : > { %5428 = vst [vmem:[#allocation2_spill] sm:$0xff] %v4230_v1  ;;  %5432 = vst [vmem:[#allocation3_spill] sm:$0xff] %v4238_v33  ;;  %v4254_v32 = vadd.f32 %v5441_v39, %v5440_v3  ;;  %v4258_v24 = vadd.f32 %v5443_v17, %v5442_v31  ;;  %v5445_v9 = vld [vmem:[#allocation24_spill] sm:$0xff]  ;;  %v5446_v55 = vld [vmem:[#allocation126_spill] sm:$0xff] }
 0x1f0   : > { %v4115_v45 = vpop.f32.mrf.mxu0  ;;  %v4117_v29 = vpop.f32.mrf.mxu1  ;;  %5437 = vst [vmem:[#allocation105_spill] sm:$0xff] %v4246_v63  ;;  %v4262_v23 = vadd.f32 %v5446_v55, %v5445_v9  ;;  %v5448_v20 = vld [vmem:[#allocation25_spill] sm:$0xff]  ;;  %v5449_v8 = vld [vmem:[#allocation127_spill] sm:$0xff]  ;;  %v5453_v44 = vld [vmem:[#allocation26_spill] sm:$0xff] }
 0x1f1   : > { %5444 = vst [vmem:[#allocation4_spill] sm:$0xff] %v4258_v24  ;;  %v4266_v49 = vadd.f32 %v5449_v8, %v5448_v20  ;;  %v5454_v2 = vld [vmem:[#allocation128_spill] sm:$0xff]  ;;  %v5456_v3 = vld [vmem:[#allocation27_spill] sm:$0xff]  ;;  %v5457_v63 = vld [vmem:[#allocation129_spill] sm:$0xff] }
 0x1f2   : > { %v4122_v46 = vpop.f32.mrf.mxu0  ;;  %v4124_v47 = vpop.f32.mrf.mxu1  ;;  %5447 = vst [vmem:[#allocation106_spill] sm:$0xff] %v4262_v23  ;;  %v4274_v39 = vadd.f32 %v5454_v2, %v5453_v44  ;;  %v4278_v17 = vadd.f32 %v5457_v63, %v5456_v3  ;;  %v5459_v31 = vld [vmem:[#allocation28_spill] sm:$0xff]  ;;  %v5460_v24 = vld [vmem:[#allocation130_spill] sm:$0xff]  ;;  %v5462_v9 = vld [vmem:[#allocation29_spill] sm:$0xff] }
 0x1f3   : > { %5450 = vst [vmem:[#allocation5_spill] sm:$0xff] %v4266_v49  ;;  %v4282_v55 = vadd.f32 %v5460_v24, %v5459_v31  ;;  %v5463_v23 = vld [vmem:[#allocation131_spill] sm:$0xff]  ;;  %v5465_v20 = vld [vmem:[#allocation30_spill] sm:$0xff]  ;;  %v5466_v49 = vld [vmem:[#allocation132_spill] sm:$0xff] }
 0x1f4   : > { %v4132_v38 = vpop.f32.mrf.mxu0  ;;  %v4134_v50 = vpop.f32.mrf.mxu1  ;;  %5455 = vst [vmem:[#allocation108_spill] sm:$0xff] %v4274_v39  ;;  %5458 = vst [vmem:[#allocation7_spill] sm:$0xff] %v4278_v17  ;;  %v4286_v8 = vadd.f32 %v5463_v23, %v5462_v9  ;;  %v4290_v33 = vadd.f32 %v5466_v49, %v5465_v20  ;;  %v5471_v44 = vld [vmem:[#allocation32_spill] sm:$0xff]  ;;  %v5472_v39 = vld [vmem:[#allocation134_spill] sm:$0xff] }
 0x1f5   : > { %5461 = vst [vmem:[#allocation109_spill] sm:$0xff] %v4282_v55  ;;  %v4298_v63 = vadd.f32 %v5472_v39, %v5471_v44  ;;  %v5474_v3 = vld [vmem:[#allocation33_spill] sm:$0xff]  ;;  %v5475_v17 = vld [vmem:[#allocation135_spill] sm:$0xff]  ;;  %v5478_v23 = vld [vmem:[#allocation34_spill] sm:$0xff] }
 0x1f6   : > { %v4162_v59 = vpop.f32.mrf.mxu0  ;;  %v4164_v10 = vpop.f32.mrf.mxu1  ;;  %5464 = vst [vmem:[#allocation8_spill] sm:$0xff] %v4286_v8  ;;  %5467 = vst [vmem:[#allocation110_spill] sm:$0xff] %v4290_v33  ;;  %v4302_v24 = vadd.f32 %v5475_v17, %v5474_v3  ;;  %v5479_v9 = vld [vmem:[#allocation136_spill] sm:$0xff]  ;;  %v5481_v49 = vld [vmem:[#allocation35_spill] sm:$0xff] }
 0x1f7   : > { %5473 = vst [vmem:[#allocation111_spill] sm:$0xff] %v4298_v63  ;;  %v4308_v8 = vadd.f32 %v5479_v9, %v5478_v23  ;;  %v5482_v20 = vld [vmem:[#allocation137_spill] sm:$0xff]  ;;  %v5488_v44 = vld [vmem:[#allocation139_spill] sm:$0xff]  ;;  %v5490_v17 = vld [vmem:[#allocation38_spill] sm:$0xff] }
 0x1f8   : > { %v4196_v12 = vpop.f32.mrf.mxu0  ;;  %v4198_v4 = vpop.f32.mrf.mxu1  ;;  %5476 = vst [vmem:[#allocation10_spill] sm:$0xff] %v4302_v24  ;;  %v4312_v33 = vadd.f32 %v5482_v20, %v5481_v49  ;;  %v5487_v39 = vld [vmem:[#allocation37_spill] sm:$0xff]  ;;  %v5491_v3 = vld [vmem:[#allocation140_spill] sm:$0xff] }
 0x1f9   : > { %5480 = vst [vmem:[#allocation11_spill] sm:$0xff] %v4308_v8  ;;  %v4320_v63 = vadd.f32 %v5488_v44, %v5487_v39  ;;  %v4324_v24 = vadd.f32 %v5491_v3, %v5490_v17  ;;  %v5494_v1 = vld [vmem:[#allocation141_spill] sm:$0xff]  ;;  %v5496_v9 = vld [vmem:[#allocation40_spill] sm:$0xff]  ;;  %v5497_v8 = vld [vmem:[#allocation142_spill] sm:$0xff] }
 0x1fa   : > { %v4232_v58 = vpop.f32.mrf.mxu0  ;;  %v4234_v6 = vpop.f32.mrf.mxu1  ;;  %5483 = vst [vmem:[#allocation113_spill] sm:$0xff] %v4312_v33  ;;  %v4332_v49 = vadd.f32 %v5497_v8, %v5496_v9  ;;  %v5499_v20 = vld [vmem:[#allocation41_spill] sm:$0xff]  ;;  %v5500_v33 = vld [vmem:[#allocation143_spill] sm:$0xff]  ;;  %v5502_v39 = vld [vmem:[#allocation42_spill] sm:$0xff] }
 0x1fb   : > { %5429 = vst [vmem:[#allocation104_spill] sm:$0xff] %v4234_v6  ;;  %5489 = vst [vmem:[#allocation114_spill] sm:$0xff] %v4320_v63  ;;  %v5503_v44 = vld [vmem:[#allocation144_spill] sm:$0xff]  ;;  %v5505_v17 = vld [vmem:[#allocation43_spill] sm:$0xff] }
 0x1fc   : > { %v4268_v43 = vpop.f32.mrf.mxu0  ;;  %v4270_v28 = vpop.f32.mrf.mxu1  ;;  %5492 = vst [vmem:[#allocation13_spill] sm:$0xff] %v4324_v24  ;;  %5498 = vst [vmem:[#allocation14_spill] sm:$0xff] %v4332_v49  ;;  %v4340_v63 = vadd.f32 %v5503_v44, %v5502_v39  ;;  %v5506_v3 = vld [vmem:[#allocation145_spill] sm:$0xff]  ;;  %v5512_v9 = vld [vmem:[#allocation147_spill] sm:$0xff] }
 0x1fd   : > { %5451 = vst [vmem:[#allocation107_spill] sm:$0xff] %v4268_v43  ;;  %5452 = vst [vmem:[#allocation6_spill] sm:$0xff] %v4270_v28  ;;  %v5468_v28 = vld [vmem:[#allocation31_spill] sm:$0xff]  ;;  %v5469_v43 = vld [vmem:[#allocation133_spill] sm:$0xff]  ;;  %v4344_v24 = vadd.f32 %v5506_v3, %v5505_v17  ;;  %v1834_v3 = vadd.f32 %v4103_v42, %v4146_v18 }
 0x1fe   : > { %v4294_v2 = vadd.f32 %v5469_v43, %v5468_v28  ;;  %v1512_v31 = vpop.f32.mrf.mxu0  ;;  %v4304_v55 = vpop.f32.mrf.mxu1  ;;  %v5484_v43 = vld [vmem:[#allocation36_spill] sm:$0xff]  ;;  %v5485_v28 = vld [vmem:[#allocation138_spill] sm:$0xff]  ;;  %5504 = vst [vmem:[#allocation15_spill] sm:$0xff] %v4340_v63  ;;  %v5511_v8 = vld [vmem:[#allocation45_spill] sm:$0xff] }
 0x1ff   : > { %5477 = vst [vmem:[#allocation112_spill] sm:$0xff] %v4304_v55  ;;  %v5493_v55 = vld [vmem:[#allocation39_spill] sm:$0xff]  ;;  %5507 = vst [vmem:[#allocation117_spill] sm:$0xff] %v4344_v24  ;;  %v4352_v49 = vadd.f32 %v5512_v9, %v5511_v8  ;;  %v5518_v7 = vld [vmem:[#allocation149_spill] sm:$0xff] }
 0x200   : > { %5470 = vst [vmem:[#allocation9_spill] sm:$0xff] %v4294_v2  ;;  %v4316_v2 = vadd.f32 %v5485_v28, %v5484_v43  ;;  %v4328_v23 = vadd.f32 %v5494_v1, %v5493_v55  ;;  %v4336_v43 = vadd.f32 %v5500_v33, %v5499_v20  ;;  %v1514_v28 = vpop.f32.mrf.mxu0  ;;  %v5508_v1 = vld [vmem:[#allocation44_spill] sm:$0xff]  ;;  %v5509_v55 = vld [vmem:[#allocation146_spill] sm:$0xff]  ;;  %v5517_v6 = vld [vmem:[#allocation47_spill] sm:$0xff] }
 0x201   : > { %5513 = vst [vmem:[#allocation118_spill] sm:$0xff] %v4352_v49  ;;  %v5514_v33 = vld [vmem:[#allocation46_spill] sm:$0xff]  ;;  %v5515_v20 = vld [vmem:[#allocation148_spill] sm:$0xff]  ;;  %v4360_v39 = vadd.f32 %v5518_v7, %v5517_v6  ;;  %v5524_v8 = vld [vmem:[#allocation151_spill] sm:$0xff] }
 0x202   : > { %5486 = vst [vmem:[#allocation12_spill] sm:$0xff] %v4316_v2  ;;  %5495 = vst [vmem:[#allocation115_spill] sm:$0xff] %v4328_v23  ;;  %v1707_v2 = vpop.f32.mrf.mxu1  ;;  %v4348_v23 = vadd.f32 %v5509_v55, %v5508_v1  ;;  %v5520_v44 = vld [vmem:[#allocation48_spill] sm:$0xff]  ;;  %v5521_v63 = vld [vmem:[#allocation150_spill] sm:$0xff]  ;;  %v1518_v1 = vpop.f32.mrf.mxu0 }
 0x203   : > { %5501 = vst [vmem:[#allocation116_spill] sm:$0xff] %v4336_v43  ;;  %v4356_v43 = vadd.f32 %v5515_v20, %v5514_v33  ;;  %5519 = vst [vmem:[#allocation119_spill] sm:$0xff] %v4360_v39  ;;  %v4364_v17 = vadd.f32 %v5521_v63, %v5520_v44  ;;  %v5526_v49 = vld [vmem:[#allocation50_spill] sm:$0xff]  ;;  %v5527_v33 = vld [vmem:[#allocation152_spill] sm:$0xff]  ;;  %v1836_v63 = vadd.f32 %v4105_v56, %v4152_v5 }
 0x204   : > { %5510 = vst [vmem:[#allocation16_spill] sm:$0xff] %v4348_v23  ;;  %v1711_v55 = vpop.f32.mrf.mxu1  ;;  %v5523_v23 = vld [vmem:[#allocation49_spill] sm:$0xff]  ;;  %v4374_v20 = vadd.f32 %v5527_v33, %v5526_v49  ;;  %v5532_v44 = vld [vmem:[#allocation52_spill] sm:$0xff]  ;;  %v5536_v39 = vld [vmem:[#allocation155_spill] sm:$0xff] }
 0x205   : > { %5516 = vst [vmem:[#allocation17_spill] sm:$0xff] %v4356_v43  ;;  %5522 = vst [vmem:[#allocation18_spill] sm:$0xff] %v4364_v17  ;;  %v4370_v9 = vadd.f32 %v5524_v8, %v5523_v23  ;;  %v5529_v43 = vld [vmem:[#allocation51_spill] sm:$0xff]  ;;  %v5530_v7 = vld [vmem:[#allocation153_spill] sm:$0xff] }
 0x206   : > { %5528 = vst [vmem:[#allocation19_spill] sm:$0xff] %v4374_v20  ;;  %v4378_v6 = vadd.f32 %v5530_v7, %v5529_v43  ;;  %v5533_v17 = vld [vmem:[#allocation154_spill] sm:$0xff]  ;;  %v5535_v18 = vld [vmem:[#allocation53_spill] sm:$0xff]  ;;  %v5539_v8 = vld [vmem:[#allocation156_spill] sm:$0xff]  ;;  %v1520_v43 = vpop.f32.mrf.mxu0  ;;  %v1713_v7 = vpop.f32.mrf.mxu1 }
 0x207   : > { %5525 = vst [vmem:[#allocation120_spill] sm:$0xff] %v4370_v9  ;;  %v4384_v42 = vadd.f32 %v5533_v17, %v5532_v44  ;;  %v4388_v24 = vadd.f32 %v5536_v39, %v5535_v18  ;;  %v5538_v23 = vld [vmem:[#allocation54_spill] sm:$0xff]  ;;  %v5540_v49 = vld [vmem:[#allocation55_spill] sm:$0xff]  ;;  %v5541_v33 = vld [vmem:[#allocation157_spill] sm:$0xff] }
 0x208   : > { %5531 = vst [vmem:[#allocation121_spill] sm:$0xff] %v4378_v6  ;;  %v4392_v9 = vadd.f32 %v5539_v8, %v5538_v23  ;;  %v4396_v20 = vadd.f32 %v5541_v33, %v5540_v49  ;;  %v5542_v6 = vld [vmem:[#allocation56_spill] sm:$0xff]  ;;  %v5543_v56 = vld [vmem:[#allocation158_spill] sm:$0xff]  ;;  %v5544_v17 = vld [vmem:[#allocation57_spill] sm:$0xff]  ;;  %v1839_v23 = vadd.f32 %v4115_v45, %v4176_v62  ;;  %v4414_v8 = vadd.f32 %v4099_v40, %v4138_v19 }
 0x209   : > { %5534 = vst [vmem:[#allocation20_spill] sm:$0xff] %v4384_v42  ;;  %5537 = vst [vmem:[#allocation122_spill] sm:$0xff] %v4388_v24  ;;  %v4400_v5 = vadd.f32 %v5543_v56, %v5542_v6  ;;  %v5545_v44 = vld [vmem:[#allocation159_spill] sm:$0xff]  ;;  %v5547_v39 = vld [vmem:[#allocation58_spill] sm:$0xff]  ;;  %v4418_v49 = vadd.f32 %v4101_v41, %v4142_v51  ;;  %v4421_v6 = vadd.f32 %v4126_v48, %v1834_v3  ;;  %v1522_v56 = vpop.f32.mrf.mxu0 }
 0x20a   : > { %v4404_v42 = vadd.f32 %v5545_v44, %v5544_v17  ;;  %v5548_v18 = vld [vmem:[#allocation160_spill] sm:$0xff]  ;;  %5550 = vst [vmem:[#allocation22_spill] sm:$0xff] %v4414_v8  ;;  %v1842_v33 = vadd.f32 %v4122_v46, %v4186_v11  ;;  %v1715_v17 = vpop.f32.mrf.mxu1  ;;  %v4426_v44 = vadd.f32 %v4128_v22, %v1836_v63  ;;  %v4430_v45 = vadd.f32 %v4107_v13, %v4156_v53 }
 0x20b   : > { %v4408_v24 = vadd.f32 %v5548_v18, %v5547_v39  ;;  %5551 = vst [vmem:[#allocation124_spill] sm:$0xff] %v4418_v49  ;;  %5552 = vst [vmem:[#allocation23_spill] sm:$0xff] %v4421_v6  ;;  %v1843_v40 = vadd.f32 %v4132_v38, %v4194_v30  ;;  %v1846_v41 = vadd.f32 %v4162_v59, %v4206_v52  ;;  %v1524_v38 = vpop.f32.mrf.mxu0  ;;  %v5554_v30 = vld [vmem:[#allocation103_spill] sm:$0xff]  ;;  %v5562_v3 = vld [vmem:[#allocation4_spill] sm:$0xff] }
 0x20c   : > { %5546 = vst [vmem:[#allocation21_spill] sm:$0xff] %v4404_v42  ;;  %5553 = vst [vmem:[#allocation125_spill] sm:$0xff] %v4426_v44  ;;  %v4438_v19 = vadd.f32 %v4109_v14, %v4160_v54  ;;  %v4442_v46 = vadd.f32 %v4111_v27, %v4168_v16  ;;  %v4446_v51 = vadd.f32 %v4113_v26, %v4172_v61  ;;  %v1717_v53 = vpop.f32.mrf.mxu1  ;;  %v5563_v18 = vld [vmem:[#allocation106_spill] sm:$0xff]  ;;  %v5571_v44 = vld [vmem:[#allocation108_spill] sm:$0xff] }
 0x20d   : > { %5549 = vst [vmem:[#allocation123_spill] sm:$0xff] %v4408_v24  ;;  %v4450_v13 = vadd.f32 %v4117_v29, %v4182_v37  ;;  %v4453_v59 = vadd.f32 %v4130_v21, %v1839_v23  ;;  %v4457_v14 = vadd.f32 %v4124_v47, %v4190_v15  ;;  %v1850_v27 = vadd.f32 %v4232_v58, %v4222_v36  ;;  %v1528_v47 = vpop.f32.mrf.mxu0  ;;  %v5557_v36 = vld [vmem:[#allocation107_spill] sm:$0xff]  ;;  %v5576_v42 = vld [vmem:[#allocation114_spill] sm:$0xff] }
 0x20e   : > { %v1854_v54 = vadd.f32 %v1512_v31, %v4242_v35  ;;  %v4463_v26 = vadd.f32 %v4126_v48, %v1842_v33  ;;  %v4467_v29 = vadd.f32 %v4134_v50, %v4202_v25  ;;  %v4471_v16 = vadd.f32 %v4164_v10, %v4210_v60  ;;  %v1721_v62 = vpop.f32.mrf.mxu1  ;;  %v5555_v25 = vld [vmem:[#allocation104_spill] sm:$0xff]  ;;  %v5556_v60 = vld [vmem:[#allocation2_spill] sm:$0xff]  ;;  %v5558_v35 = vld [vmem:[#allocation3_spill] sm:$0xff] }
 0x20f   : > { %v1855_v61 = vadd.f32 %v1514_v28, %v4250_v0  ;;  %v4475_v37 = vadd.f32 %v4130_v21, %v1843_v40  ;;  %v4478_v11 = vadd.f32 %v4126_v48, %v1846_v41  ;;  %v4482_v15 = vadd.f32 %v4196_v12, %v4214_v57  ;;  %v5559_v0 = vld [vmem:[#allocation6_spill] sm:$0xff]  ;;  %v1530_v12 = vpop.f32.mrf.mxu0  ;;  %v5564_v33 = vld [vmem:[#allocation8_spill] sm:$0xff]  ;;  %v5565_v41 = vld [vmem:[#allocation9_spill] sm:$0xff] }
 0x210   : > { %v1857_v50 = vadd.f32 %v1707_v2, %v4254_v32  ;;  %v4487_v10 = vadd.f32 %v4198_v4, %v4218_v34  ;;  %v4491_v52 = vadd.f32 %v5555_v25, %v5554_v30  ;;  %v4495_v58 = vadd.f32 %v5557_v36, %v5556_v60  ;;  %v1723_v57 = vpop.f32.mrf.mxu1  ;;  %v5560_v34 = vld [vmem:[#allocation105_spill] sm:$0xff]  ;;  %v5561_v2 = vld [vmem:[#allocation112_spill] sm:$0xff]  ;;  %v5566_v60 = vld [vmem:[#allocation230_spill] sm:$0xff] }
 0x211   : > { %v4499_v31 = vadd.f32 %v5559_v0, %v5558_v35  ;;  %v4502_v32 = vadd.f32 %v4126_v48, %v1850_v27  ;;  %v4505_v4 = vadd.f32 %v4126_v48, %v1854_v54  ;;  %v4509_v28 = vadd.f32 %v5561_v2, %v5560_v34  ;;  %v1532_v27 = vpop.f32.mrf.mxu0  ;;  %v5567_v36 = vld [vmem:[#allocation10_spill] sm:$0xff]  ;;  %v5568_v0 = vld [vmem:[#allocation113_spill] sm:$0xff]  ;;  %v5569_v2 = vld [vmem:[#allocation12_spill] sm:$0xff] }
 0x212   : > { %v1858_v63 = vadd.f32 %v1518_v1, %v5562_v3  ;;  %v4513_v39 = vadd.f32 %v4130_v21, %v1855_v61  ;;  %v1860_v23 = vadd.f32 %v1711_v55, %v5563_v18  ;;  %v1863_v40 = vadd.f32 %v1524_v38, %v5564_v33  ;;  %v1725_v25 = vpop.f32.mrf.mxu1  ;;  %v5570_v3 = vld [vmem:[#allocation5_spill] sm:$0xff]  ;;  %v5572_v55 = vld [vmem:[#allocation111_spill] sm:$0xff] }
 0x213   : > { %v1866_v30 = vadd.f32 %v1528_v47, %v5565_v41  ;;  %v4519_v54 = vadd.f32 %v5566_v60, %v1857_v50  ;;  %v1867_v35 = vadd.f32 %v1530_v12, %v5567_v36  ;;  %v1870_v34 = vadd.f32 %v1532_v27, %v5568_v0  ;;  %v5573_v38 = vld [vmem:[#allocation11_spill] sm:$0xff]  ;;  %v1534_v47 = vpop.f32.mrf.mxu0  ;;  %v5575_v50 = vld [vmem:[#allocation109_spill] sm:$0xff]  ;;  %v5578_v0 = vld [vmem:[#allocation110_spill] sm:$0xff] }
 0x214   : > { %v1872_v1 = vadd.f32 %v1725_v25, %v5569_v2  ;;  %v1859_v61 = vadd.f32 %v1520_v43, %v5570_v3  ;;  %v1861_v6 = vadd.f32 %v1713_v7, %v5571_v44  ;;  %v1868_v18 = vadd.f32 %v1721_v62, %v5572_v55  ;;  %v1727_v41 = vpop.f32.mrf.mxu1  ;;  %v5574_v49 = vld [vmem:[#allocation7_spill] sm:$0xff]  ;;  %v5577_v36 = vld [vmem:[#allocation13_spill] sm:$0xff] }
 0x215   : > { %v1869_v33 = vadd.f32 %v1723_v57, %v5573_v38  ;;  %v1862_v8 = vadd.f32 %v1522_v56, %v5574_v49  ;;  %v1864_v24 = vadd.f32 %v1715_v17, %v5575_v50  ;;  %v1871_v12 = vadd.f32 %v1534_v47, %v5576_v42  ;;  %v1538_v62 = vpop.f32.mrf.mxu0  ;;  %v5579_v3 = vld [vmem:[#allocation115_spill] sm:$0xff] }
 0x216   : > { %v1873_v27 = vadd.f32 %v1727_v41, %v5577_v36  ;;  %v2013_v25 = vadd.f32 %v4130_v21, %v1863_v40  ;;  %v1865_v43 = vadd.f32 %v1717_v53, %v5578_v0  ;;  %v2016_v7 = vadd.f32 %v4126_v48, %v1866_v30  ;;  %v1731_v57 = vpop.f32.mrf.mxu1  ;;  %v5581_v30 = vld [vmem:[#allocation14_spill] sm:$0xff]  ;;  %v5583_v41 = vld [vmem:[#allocation116_spill] sm:$0xff]  ;;  %v5585_v50 = vld [vmem:[#allocation15_spill] sm:$0xff] }
 0x217   : > { %v2020_v44 = vadd.f32 %v4126_v48, %v1870_v34  ;;  %v2017_v2 = vadd.f32 %v4130_v21, %v1867_v35  ;;  %v2022_v49 = vadd.f32 %v4128_v22, %v1872_v1  ;;  %v2021_v56 = vadd.f32 %v4130_v21, %v1871_v12  ;;  %v1540_v34 = vpop.f32.mrf.mxu0 }
 0x218   : > { %v2023_v42 = vadd.f32 %v5566_v60, %v1873_v27  ;;  %v2018_v17 = vadd.f32 %v4128_v22, %v1868_v18  ;;  %v2019_v40 = vadd.f32 %v5566_v60, %v1869_v33  ;;  %v4543_v53 = vadd.f32 %v1538_v62, %v5579_v3  ;;  %v1733_v38 = vpop.f32.mrf.mxu1 }
 0x219   : > { %v4546_v55 = vadd.f32 %v1731_v57, %v5581_v30  ;;  %v2149_v47 = vmax.f32 %v2021_v56, 0.0  ;;  %v4549_v1 = vadd.f32 %v1540_v34, %v5583_v41  ;;  %v4552_v12 = vadd.f32 %v1733_v38, %v5585_v50  ;;  %v1542_v0 = vpop.f32.mrf.mxu0  ;;  %v5587_v30 = vld [vmem:[#allocation117_spill] sm:$0xff] }
 0x21a   : > { %5580 = vst [vmem:[#allocation24_spill] sm:$0xff] %v4543_v53  ;;  %v2151_v35 = vmax.f32 %v2023_v42, 0.0  ;;  %v2012_v18 = vadd.f32 %v4126_v48, %v1862_v8  ;;  %v2014_v33 = vadd.f32 %v4128_v22, %v1864_v24  ;;  %v2015_v36 = vadd.f32 %v5566_v60, %v1865_v43  ;;  %v1735_v62 = vpop.f32.mrf.mxu1  ;;  %v5589_v42 = vld [vmem:[#allocation16_spill] sm:$0xff] }
 0x21b   : > { %5582 = vst [vmem:[#allocation126_spill] sm:$0xff] %v4546_v55  ;;  %5584 = vst [vmem:[#allocation25_spill] sm:$0xff] %v4549_v1  ;;  %v2148_v27 = vmax.f32 %v2020_v44, 0.0  ;;  %v2145_v57 = vmax.f32 %v2017_v2, 0.0  ;;  %v2150_v3 = vmax.f32 %v2022_v49, 0.0  ;;  %v4558_v56 = vadd.f32 %v1542_v0, %v5587_v30  ;;  %2216 = vmatprep.subr.mxu0 %v2149_v47  ;;  %v1544_v43 = vpop.f32.mrf.mxu0  ;;  %v5591_v30 = vld [vmem:[#allocation118_spill] sm:$0xff] }
 0x21c   : > { %5586 = vst [vmem:[#allocation127_spill] sm:$0xff] %v4552_v12  ;;  %v4561_v34 = vadd.f32 %v1735_v62, %v5589_v42  ;;  %v2009_v38 = vadd.f32 %v4130_v21, %v1859_v61  ;;  %v2011_v8 = vadd.f32 %v5566_v60, %v1861_v6  ;;  %v2144_v41 = vmax.f32 %v2016_v7, 0.0  ;;  %2287 = vmatprep.subr.mxu1 %v2151_v35  ;;  %v1737_v44 = vpop.f32.mrf.mxu1  ;;  %v5593_v6 = vld [vmem:[#allocation17_spill] sm:$0xff]  ;;  %v5670_v55 = vld [vmem:[#allocation166_spill] sm:$0xff]  ;;  %v5672_v1 = vld [vmem:[#allocation167_spill] sm:$0xff] }
 0x21d   : > { %5588 = vst [vmem:[#allocation26_spill] sm:$0xff] %v4558_v56  ;;  %v2147_v24 = vmax.f32 %v2019_v40, 0.0  ;;  %2217 = vmatpush1.msra.mxu0 %v2148_v27  ;;  %v2008_v2 = vadd.f32 %v4126_v48, %v1858_v63  ;;  %v2010_v49 = vadd.f32 %v4128_v22, %v1860_v23  ;;  %v2141_v50 = vmax.f32 %v2013_v25, 0.0  ;;  %2288 = vmatpush1.msra.mxu1 %v2150_v3  ;;  %v1548_v40 = vpop.f32.mrf.mxu0  ;;  %v5595_v25 = vld [vmem:[#allocation119_spill] sm:$0xff]  ;;  %v5597_v27 = vld [vmem:[#allocation18_spill] sm:$0xff]  ;;  %v5671_v12 = vld [vmem:[#allocation65_spill] sm:$0xff] }
 0x21e   : > { %5590 = vst [vmem:[#allocation128_spill] sm:$0xff] %v4561_v34  ;;  %v2146_v0 = vmax.f32 %v2018_v17, 0.0  ;;  %2218 = vmatprep.subr.mxu0 %v2145_v57  ;;  %v2140_v62 = vmax.f32 %v2012_v18, 0.0  ;;  %v2143_v47 = vmax.f32 %v2015_v36, 0.0  ;;  %v4568_v61 = vadd.f32 %v1544_v43, %v5591_v30  ;;  %v1741_v35 = vpop.f32.mrf.mxu1  ;;  %v5599_v43 = vld [vmem:[#allocation120_spill] sm:$0xff]  ;;  %v5601_v30 = vld [vmem:[#allocation19_spill] sm:$0xff] }
 0x21f   : > { %v4571_v7 = vadd.f32 %v1737_v44, %v5593_v6  ;;  %2289 = vmatprep.subr.mxu1 %v2147_v24  ;;  %2219 = vmatpush1.msra.mxu0 %v2144_v41  ;;  %v2006_v63 = vadd.f32 %v4128_v22, %v4509_v28  ;;  %v2142_v23 = vmax.f32 %v2014_v33, 0.0  ;;  %v4576_v17 = vadd.f32 %v1548_v40, %v5595_v25  ;;  %v1550_v41 = vpop.f32.mrf.mxu0  ;;  %v5673_v56 = vld [vmem:[#allocation66_spill] sm:$0xff] }
 0x220   : > { %5592 = vst [vmem:[#allocation27_spill] sm:$0xff] %v4568_v61  ;;  %v4579_v18 = vadd.f32 %v1741_v35, %v5597_v27  ;;  %2290 = vmatpush1.msra.mxu1 %v2146_v0  ;;  %2220 = vmatprep.subr.mxu0 %v2141_v50  ;;  %v2001_v36 = vadd.f32 %v4130_v21, %v4495_v58  ;;  %v2137_v3 = vmax.f32 %v2009_v38, 0.0  ;;  %v2139_v42 = vmax.f32 %v2011_v8, 0.0  ;;  %v1743_v28 = vpop.f32.mrf.mxu1 }
 0x221   : > { %5594 = vst [vmem:[#allocation129_spill] sm:$0xff] %v4571_v7  ;;  %5596 = vst [vmem:[#allocation28_spill] sm:$0xff] %v4576_v17  ;;  %v2003_v57 = vadd.f32 %v5566_v60, %v4499_v31  ;;  %2291 = vmatprep.subr.mxu1 %v2143_v47  ;;  %2221 = vmatpush1.msra.mxu0 %v2140_v62  ;;  %v2136_v33 = vmax.f32 %v2008_v2, 0.0  ;;  %v2138_v24 = vmax.f32 %v2010_v49, 0.0  ;;  %v2133_v38 = vmax.f32 %v4513_v39, 0.0  ;;  %v1552_v2 = vpop.f32.mrf.mxu0  ;;  %v5603_v39 = vld [vmem:[#allocation121_spill] sm:$0xff] }
 0x222   : > { %5598 = vst [vmem:[#allocation130_spill] sm:$0xff] %v4579_v18  ;;  %v4586_v44 = vadd.f32 %v1550_v41, %v5599_v43  ;;  %v4589_v0 = vadd.f32 %v1743_v28, %v5601_v30  ;;  %2292 = vmatpush1.msra.mxu1 %v2142_v23  ;;  %v1997_v58 = vadd.f32 %v4130_v21, %v4482_v15  ;;  %v2135_v8 = vmax.f32 %v4519_v54, 0.0  ;;  %v1745_v49 = vpop.f32.mrf.mxu1  ;;  %v5605_v54 = vld [vmem:[#allocation20_spill] sm:$0xff] }
 0x223   : > { %v2002_v31 = vadd.f32 %v4128_v22, %v4491_v52  ;;  %2222 = vmatprep.subr.mxu0 %v2137_v3  ;;  %2293 = vmatprep.subr.mxu1 %v2139_v42  ;;  %v1998_v50 = vadd.f32 %v4128_v22, %v4471_v16  ;;  %v1999_v62 = vadd.f32 %v5566_v60, %v4487_v10  ;;  %v2132_v47 = vmax.f32 %v4505_v4, 0.0  ;;  %v1554_v23 = vpop.f32.mrf.mxu0 }
 0x224   : > { %5600 = vst [vmem:[#allocation29_spill] sm:$0xff] %v4586_v44  ;;  %5602 = vst [vmem:[#allocation131_spill] sm:$0xff] %v4589_v0  ;;  %v2134_v15 = vmax.f32 %v2006_v63, 0.0  ;;  %2223 = vmatpush1.msra.mxu0 %v2136_v33  ;;  %2294 = vmatpush1.msra.mxu1 %v2138_v24  ;;  %v2129_v52 = vmax.f32 %v2001_v36, 0.0  ;;  %v2131_v6 = vmax.f32 %v2003_v57, 0.0  ;;  %v4603_v40 = vadd.f32 %v1552_v2, %v5603_v39  ;;  %v1747_v16 = vpop.f32.mrf.mxu1  ;;  %v5607_v63 = vld [vmem:[#allocation122_spill] sm:$0xff] }
 0x225   : > { %v4606_v35 = vadd.f32 %v1745_v49, %v5605_v54  ;;  %2224 = vmatprep.subr.mxu0 %v2133_v38  ;;  %2295 = vmatprep.subr.mxu1 %v2135_v8  ;;  %v1995_v10 = vadd.f32 %v5566_v60, %v4467_v29  ;;  %v2128_v4 = vmax.f32 %v4502_v32, 0.0  ;;  %v4612_v25 = vadd.f32 %v1554_v23, %v5607_v63  ;;  %v1558_v29 = vpop.f32.mrf.mxu0  ;;  %v5614_v8 = vld [vmem:[#allocation123_spill] sm:$0xff]  ;;  %v5621_v63 = vld [vmem:[#allocation224_spill] sm:$0xff] }
 0x226   : > { %5604 = vst [vmem:[#allocation30_spill] sm:$0xff] %v4603_v40  ;;  %v4615_v27 = vadd.f32 %v1747_v16, %v4392_v9  ;;  %2225 = vmatpush1.msra.mxu0 %v2132_v47  ;;  %2296 = vmatpush1.msra.mxu1 %v2134_v15  ;;  %v1991_v36 = vadd.f32 %v5566_v60, %v4450_v13  ;;  %v2125_v3 = vmax.f32 %v1997_v58, 0.0  ;;  %v2130_v42 = vmax.f32 %v2002_v31, 0.0  ;;  %v1751_v32 = vpop.f32.mrf.mxu1  ;;  %v5618_v47 = vld [vmem:[#allocation225_spill] sm:$0xff]  ;;  %v5690_v40 = vld [vmem:[#allocation175_spill] sm:$0xff] }
 0x227   : > { %5606 = vst [vmem:[#allocation132_spill] sm:$0xff] %v4606_v35  ;;  %5608 = vst [vmem:[#allocation31_spill] sm:$0xff] %v4612_v25  ;;  %v1994_v57 = vadd.f32 %v4128_v22, %v4457_v14  ;;  %2226 = vmatprep.subr.mxu0 %v2129_v52  ;;  %2297 = vmatprep.subr.mxu1 %v2131_v6  ;;  %v2124_v41 = vmax.f32 %v4478_v11, 0.0  ;;  %v2127_v28 = vmax.f32 %v1999_v62, 0.0  ;;  %v2121_v24 = vmax.f32 %v4475_v37, 0.0  ;;  %v1560_v11 = vpop.f32.mrf.mxu0  ;;  %v5612_v37 = vld [vmem:[#allocation21_spill] sm:$0xff] }
 0x228   : > { %5609 = vst [vmem:[#allocation133_spill] sm:$0xff] %v4615_v27  ;;  %v4623_v9 = vadd.f32 %v1558_v29, %v4396_v20  ;;  %v4626_v33 = vadd.f32 %v1751_v32, %v4400_v5  ;;  %2227 = vmatpush1.msra.mxu0 %v2128_v4  ;;  %v1988_v13 = vadd.f32 %v4126_v48, %v4442_v46  ;;  %v2126_v43 = vmax.f32 %v1998_v50, 0.0  ;;  %v1753_v30 = vpop.f32.mrf.mxu1  ;;  %v5617_v50 = vld [vmem:[#allocation124_spill] sm:$0xff]  ;;  %v5619_v52 = vld [vmem:[#allocation226_spill] sm:$0xff]  ;;  %v5689_v35 = vld [vmem:[#allocation73_spill] sm:$0xff] }
 0x229   : > { %v1990_v14 = vadd.f32 %v4128_v22, %v4446_v51  ;;  %2298 = vmatpush1.msra.mxu1 %v2130_v42  ;;  %2228 = vmatprep.subr.mxu0 %v2125_v3  ;;  %v1985_v20 = vadd.f32 %v4130_v21, %v4430_v45  ;;  %v1987_v5 = vadd.f32 %v5566_v60, %v4438_v19  ;;  %v2120_v58 = vmax.f32 %v4463_v26, 0.0  ;;  %v4645_v45 = vpop.f32.mrf.mxu0  ;;  %v5616_v19 = vld [vmem:[#allocation22_spill] sm:$0xff]  ;;  %v5622_v42 = vld [vmem:[#allocation221_spill] sm:$0xff] }
 0x22a   : > { %5610 = vst [vmem:[#allocation32_spill] sm:$0xff] %v4623_v9  ;;  %5611 = vst [vmem:[#allocation134_spill] sm:$0xff] %v4626_v33  ;;  %v2123_v31 = vmax.f32 %v1995_v10, 0.0  ;;  %2299 = vmatprep.subr.mxu1 %v2127_v28  ;;  %2229 = vmatpush1.msra.mxu0 %v2124_v41  ;;  %v2117_v46 = vmax.f32 %v4453_v59, 0.0  ;;  %v2122_v51 = vmax.f32 %v1994_v57, 0.0  ;;  %v4640_v38 = vadd.f32 %v1560_v11, %v5612_v37  ;;  %v4647_v49 = vpop.f32.mrf.mxu1  ;;  %v5620_v10 = vld [vmem:[#allocation223_spill] sm:$0xff] }
 0x22b   : > { %v4643_v2 = vadd.f32 %v1753_v30, %v5614_v8  ;;  %2300 = vmatpush1.msra.mxu1 %v2126_v43  ;;  %2230 = vmatprep.subr.mxu0 %v2121_v24  ;;  %v1981_v26 = vadd.f32 %v4130_v21, %v5616_v19  ;;  %v1983_v62 = vadd.f32 %v5566_v60, %v5617_v50  ;;  %v2119_v59 = vmax.f32 %v1991_v36, 0.0  ;;  %v4657_v23 = vpop.f32.mrf.mxu0  ;;  %v5623_v32 = vld [vmem:[#allocation222_spill] sm:$0xff]  ;;  %v5624_v28 = vld [vmem:[#allocation23_spill] sm:$0xff] }
 0x22c   : > { %5613 = vst [vmem:[#allocation33_spill] sm:$0xff] %v4640_v38  ;;  %2301 = vmatprep.subr.mxu1 %v2123_v31  ;;  %2231 = vmatpush1.msra.mxu0 %v2120_v58  ;;  %v1980_v15 = vadd.f32 %v4126_v48, %v5618_v47  ;;  %v1982_v6 = vadd.f32 %v4128_v22, %v5619_v52  ;;  %v2116_v39 = vmax.f32 %v1988_v13, 0.0  ;;  %v2118_v54 = vmax.f32 %v1990_v14, 0.0  ;;  %v4659_v16 = vpop.f32.mrf.mxu1  ;;  %v5625_v14 = vld [vmem:[#allocation125_spill] sm:$0xff]  ;;  %v5626_v30 = vld [vmem:[#allocation219_spill] sm:$0xff]  ;;  %v5629_v8 = vld [vmem:[#allocation218_spill] sm:$0xff] }
 0x22d   : > { %5615 = vst [vmem:[#allocation135_spill] sm:$0xff] %v4643_v2  ;;  %2302 = vmatpush1.msra.mxu1 %v2122_v51  ;;  %2232 = vmatprep.subr.mxu0 %v2117_v46  ;;  %v1977_v4 = vadd.f32 %v4130_v21, %v5620_v10  ;;  %v1979_v36 = vadd.f32 %v5566_v60, %v5621_v63  ;;  %v2113_v57 = vmax.f32 %v1985_v20, 0.0  ;;  %v2115_v3 = vmax.f32 %v1987_v5, 0.0  ;;  %v4671_v43 = vpop.f32.mrf.mxu0  ;;  %v5627_v5 = vld [vmem:[#allocation220_spill] sm:$0xff]  ;;  %v5628_v51 = vld [vmem:[#allocation217_spill] sm:$0xff]  ;;  %v5691_v25 = vld [vmem:[#allocation74_spill] sm:$0xff] }
 0x22e   : > { %2303 = vmatprep.subr.mxu1 %v2119_v59  ;;  %v1976_v29 = vadd.f32 %v4126_v48, %v5622_v42  ;;  %v1978_v41 = vadd.f32 %v4128_v22, %v5623_v32  ;;  %v2112_v13 = vmax.f32 %v5624_v28, 0.0  ;;  %v2114_v24 = vmax.f32 %v5625_v14, 0.0  ;;  %2233 = vmatpush1.msra.mxu0 %v2116_v39  ;;  %v4673_v11 = vpop.f32.mrf.mxu1  ;;  %v5631_v39 = vld [vmem:[#allocation215_spill] sm:$0xff] }
 0x22f   : > { %2304 = vmatpush1.msra.mxu1 %v2118_v54  ;;  %v1973_v20 = vadd.f32 %v4130_v21, %v5626_v30  ;;  %v1975_v58 = vadd.f32 %v5566_v60, %v5627_v5  ;;  %v2109_v31 = vmax.f32 %v1981_v26, 0.0  ;;  %v2111_v46 = vmax.f32 %v1983_v62, 0.0  ;;  %2234 = vmatprep.subr.mxu0 %v2113_v57  ;;  %v4683_v47 = vpop.f32.mrf.mxu0  ;;  %v5632_v62 = vld [vmem:[#allocation216_spill] sm:$0xff]  ;;  %v5633_v57 = vld [vmem:[#allocation213_spill] sm:$0xff]  ;;  %v5637_v14 = vld [vmem:[#allocation211_spill] sm:$0xff] }
 0x230   : > { %2305 = vmatprep.subr.mxu1 %v2115_v3  ;;  %v1972_v37 = vadd.f32 %v4126_v48, %v5628_v51  ;;  %v1974_v19 = vadd.f32 %v4128_v22, %v5629_v8  ;;  %v2108_v50 = vmax.f32 %v1980_v15, 0.0  ;;  %v2110_v59 = vmax.f32 %v1982_v6, 0.0  ;;  %2235 = vmatpush1.msra.mxu0 %v2112_v13  ;;  %v4685_v52 = vpop.f32.mrf.mxu1  ;;  %v5634_v6 = vld [vmem:[#allocation214_spill] sm:$0xff] }
 0x231   : > { %2306 = vmatpush1.msra.mxu1 %v2114_v24  ;;  %5630 = vst [vmem:[#allocation34_spill] sm:$0xff] %v4685_v52  ;;  %v1969_v26 = vadd.f32 %v4130_v21, %v5631_v39  ;;  %v1971_v54 = vadd.f32 %v5566_v60, %v5632_v62  ;;  %v2105_v10 = vmax.f32 %v1977_v4, 0.0  ;;  %v2107_v63 = vmax.f32 %v1979_v36, 0.0  ;;  %2236 = vmatprep.subr.mxu0 %v2109_v31  ;;  %v4695_v28 = vpop.f32.mrf.mxu0  ;;  %v5638_v36 = vld [vmem:[#allocation212_spill] sm:$0xff]  ;;  %v5639_v31 = vld [vmem:[#allocation209_spill] sm:$0xff]  ;;  %v5643_v39 = vld [vmem:[#allocation207_spill] sm:$0xff] }
 0x232   : > { %2307 = vmatprep.subr.mxu1 %v2111_v46  ;;  %v1968_v15 = vadd.f32 %v4126_v48, %v5633_v57  ;;  %v1970_v3 = vadd.f32 %v4128_v22, %v5634_v6  ;;  %v2104_v42 = vmax.f32 %v1976_v29, 0.0  ;;  %v2106_v32 = vmax.f32 %v1978_v41, 0.0  ;;  %2237 = vmatpush1.msra.mxu0 %v2108_v50  ;;  %5635 = vst [vmem:[#allocation136_spill] sm:$0xff] %v4695_v28  ;;  %v4697_v13 = vpop.f32.mrf.mxu1  ;;  %v5640_v41 = vld [vmem:[#allocation210_spill] sm:$0xff]  ;;  %v5645_v57 = vld [vmem:[#allocation205_spill] sm:$0xff]  ;;  %v5754_v28 = vld [vmem:[#allocation203_spill] sm:$0xff] }
 0x233   : > { %2308 = vmatpush1.msra.mxu1 %v2110_v59  ;;  %5636 = vst [vmem:[#allocation35_spill] sm:$0xff] %v4697_v13  ;;  %v1965_v4 = vadd.f32 %v4130_v21, %v5637_v14  ;;  %v1967_v24 = vadd.f32 %v5566_v60, %v5638_v36  ;;  %v2101_v30 = vmax.f32 %v1973_v20, 0.0  ;;  %v2103_v5 = vmax.f32 %v1975_v58, 0.0  ;;  %2238 = vmatprep.subr.mxu0 %v2105_v10  ;;  %v4707_v50 = vpop.f32.mrf.mxu0  ;;  %v5644_v58 = vld [vmem:[#allocation208_spill] sm:$0xff]  ;;  %v5752_v13 = vld [vmem:[#allocation202_spill] sm:$0xff] }
 0x234   : > { %2309 = vmatprep.subr.mxu1 %v2107_v63  ;;  %v1964_v29 = vadd.f32 %v4126_v48, %v5639_v31  ;;  %v1966_v46 = vadd.f32 %v4128_v22, %v5640_v41  ;;  %v2100_v51 = vmax.f32 %v1972_v37, 0.0  ;;  %v2102_v8 = vmax.f32 %v1974_v19, 0.0  ;;  %2239 = vmatpush1.msra.mxu0 %v2104_v42  ;;  %5641 = vst [vmem:[#allocation137_spill] sm:$0xff] %v4707_v50  ;;  %v4709_v59 = vpop.f32.mrf.mxu1  ;;  %v5646_v19 = vld [vmem:[#allocation206_spill] sm:$0xff]  ;;  %v5750_v50 = vld [vmem:[#allocation201_spill] sm:$0xff]  ;;  %v5756_v52 = vld [vmem:[#allocation204_spill] sm:$0xff] }
 0x235   : > { %2310 = vmatpush1.msra.mxu1 %v2106_v32  ;;  %5642 = vst [vmem:[#allocation36_spill] sm:$0xff] %v4709_v59  ;;  %v1961_v20 = vadd.f32 %v4130_v21, %v5643_v39  ;;  %v1963_v62 = vadd.f32 %v5566_v60, %v5644_v58  ;;  %v2097_v10 = vmax.f32 %v1969_v26, 0.0  ;;  %v2099_v63 = vmax.f32 %v1971_v54, 0.0  ;;  %2240 = vmatprep.subr.mxu0 %v2101_v30  ;;  %v4719_v14 = vpop.f32.mrf.mxu0 }
 0x236   : > { %2311 = vmatprep.subr.mxu1 %v2103_v5  ;;  %v1960_v37 = vadd.f32 %v4126_v48, %v5645_v57  ;;  %v1962_v6 = vadd.f32 %v4128_v22, %v5646_v19  ;;  %v2096_v42 = vmax.f32 %v1968_v15, 0.0  ;;  %v2098_v32 = vmax.f32 %v1970_v3, 0.0  ;;  %2241 = vmatpush1.msra.mxu0 %v2100_v51  ;;  %5647 = vst [vmem:[#allocation138_spill] sm:$0xff] %v4719_v14  ;;  %v4721_v36 = vpop.f32.mrf.mxu1  ;;  %v5662_v19 = vld [vmem:[#allocation162_spill] sm:$0xff]  ;;  %v5707_v22 = vld [vmem:[#allocation81_spill] sm:$0xff]  ;;  %v5708_v48 = vld [vmem:[#allocation183_spill] sm:$0xff] }
 0x237   : > { %2312 = vmatpush1.msra.mxu1 %v2102_v8  ;;  %5648 = vst [vmem:[#allocation37_spill] sm:$0xff] %v4721_v36  ;;  %v2093_v31 = vmax.f32 %v1965_v4, 0.0  ;;  %v2095_v41 = vmax.f32 %v1967_v24, 0.0  ;;  %2242 = vmatprep.subr.mxu0 %v2097_v10  ;;  %v2092_v26 = vmax.f32 %v1964_v29, 0.0  ;;  %v2094_v54 = vmax.f32 %v1966_v46, 0.0  ;;  %v4723_v30 = vpop.f32.mrf.mxu0  ;;  %v5659_v10 = vld [vmem:[#allocation59_spill] sm:$0xff] }
 0x238   : > { %2313 = vmatprep.subr.mxu1 %v2099_v63  ;;  %2243 = vmatpush1.msra.mxu0 %v2096_v42  ;;  %5649 = vst [vmem:[#allocation139_spill] sm:$0xff] %v4723_v30  ;;  %v4725_v5 = vpop.f32.mrf.mxu1  ;;  %v2089_v15 = vmax.f32 %v1961_v20, 0.0  ;;  %v2091_v3 = vmax.f32 %v1963_v62, 0.0  ;;  %v2088_v51 = vmax.f32 %v1960_v37, 0.0  ;;  %v2090_v8 = vmax.f32 %v1962_v6, 0.0  ;;  %v5660_v63 = vld [vmem:[#allocation161_spill] sm:$0xff] }
 0x239   : > { %2314 = vmatpush1.msra.mxu1 %v2098_v32  ;;  %5650 = vst [vmem:[#allocation38_spill] sm:$0xff] %v4725_v5  ;;  %2244 = vmatprep.subr.mxu0 %v2093_v31  ;;  %v4727_v4 = vpop.f32.mrf.mxu0  ;;  %v984_v57 = vadd.f32 %v5660_v63, %v5659_v10  ;;  %v5661_v37 = vld [vmem:[#allocation60_spill] sm:$0xff]  ;;  %v5663_v42 = vld [vmem:[#allocation61_spill] sm:$0xff]  ;;  %v5664_v32 = vld [vmem:[#allocation163_spill] sm:$0xff]  ;;  %v992_v34 = vadd.f32 %v5672_v1, %v5671_v12 }
 0x23a   : > { %2315 = vmatprep.subr.mxu1 %v2095_v41  ;;  %2245 = vmatpush1.msra.mxu0 %v2092_v26  ;;  %5651 = vst [vmem:[#allocation140_spill] sm:$0xff] %v4727_v4  ;;  %v4729_v24 = vpop.f32.mrf.mxu1  ;;  %v1177_v6 = vadd.f32 %v5662_v19, %v5661_v37  ;;  %v986_v31 = vadd.f32 %v5664_v32, %v5663_v42  ;;  %v5665_v41 = vld [vmem:[#allocation62_spill] sm:$0xff]  ;;  %v5666_v26 = vld [vmem:[#allocation164_spill] sm:$0xff]  ;;  %v5677_v19 = vld [vmem:[#allocation67_spill] sm:$0xff] }
 0x23b   : > { %2316 = vmatpush1.msra.mxu1 %v2094_v54  ;;  %5652 = vst [vmem:[#allocation39_spill] sm:$0xff] %v4729_v24  ;;  %2246 = vmatprep.subr.mxu0 %v2089_v15  ;;  %v4731_v29 = vpop.f32.mrf.mxu0  ;;  %v1179_v54 = vadd.f32 %v5666_v26, %v5665_v41  ;;  %v5667_v15 = vld [vmem:[#allocation63_spill] sm:$0xff]  ;;  %v5674_v10 = vld [vmem:[#allocation168_spill] sm:$0xff]  ;;  %v5678_v42 = vld [vmem:[#allocation169_spill] sm:$0xff]  ;;  %v1002_v27 = vadd.f32 %v5690_v40, %v5689_v35 }
 0x23c   : > { %2317 = vmatprep.subr.mxu1 %v2091_v3  ;;  %2247 = vmatpush1.msra.mxu0 %v2088_v51  ;;  %5653 = vst [vmem:[#allocation141_spill] sm:$0xff] %v4731_v29  ;;  %v4733_v46 = vpop.f32.mrf.mxu1  ;;  %v5668_v3 = vld [vmem:[#allocation165_spill] sm:$0xff]  ;;  %v1185_v63 = vadd.f32 %v5674_v10, %v5673_v56  ;;  %v994_v32 = vadd.f32 %v5678_v42, %v5677_v19  ;;  %v5679_v41 = vld [vmem:[#allocation68_spill] sm:$0xff]  ;;  %v5680_v26 = vld [vmem:[#allocation170_spill] sm:$0xff] }
 0x23d   : > { %2318 = vmatpush1.msra.mxu1 %v2090_v8  ;;  %5654 = vst [vmem:[#allocation40_spill] sm:$0xff] %v4733_v46  ;;  %v4735_v39 = vpop.f32.mrf.mxu0  ;;  %v990_v51 = vadd.f32 %v5668_v3, %v5667_v15  ;;  %v5669_v8 = vld [vmem:[#allocation64_spill] sm:$0xff]  ;;  %v1187_v61 = vadd.f32 %v5680_v26, %v5679_v41  ;;  %v5681_v15 = vld [vmem:[#allocation69_spill] sm:$0xff]  ;;  %v5682_v3 = vld [vmem:[#allocation171_spill] sm:$0xff] }
 0x23e   : > { %5655 = vst [vmem:[#allocation142_spill] sm:$0xff] %v4735_v39  ;;  %v4737_v20 = vpop.f32.mrf.mxu1  ;;  %v1183_v53 = vadd.f32 %v5670_v55, %v5669_v8  ;;  %v996_v18 = vadd.f32 %v5682_v3, %v5681_v15  ;;  %v5683_v55 = vld [vmem:[#allocation70_spill] sm:$0xff]  ;;  %v5684_v8 = vld [vmem:[#allocation172_spill] sm:$0xff]  ;;  %v5685_v1 = vld [vmem:[#allocation71_spill] sm:$0xff] }
 0x23f   : > { %5656 = vst [vmem:[#allocation41_spill] sm:$0xff] %v4737_v20  ;;  %v4739_v58 = vpop.f32.mrf.mxu0  ;;  %v1189_v17 = vadd.f32 %v5684_v8, %v5683_v55  ;;  %v5686_v12 = vld [vmem:[#allocation173_spill] sm:$0xff]  ;;  %v5687_v56 = vld [vmem:[#allocation72_spill] sm:$0xff]  ;;  %v5688_v10 = vld [vmem:[#allocation174_spill] sm:$0xff] }
 0x240   : > { %5657 = vst [vmem:[#allocation143_spill] sm:$0xff] %v4739_v58  ;;  %v4741_v62 = vpop.f32.mrf.mxu1  ;;  %v1000_v0 = vadd.f32 %v5686_v12, %v5685_v1  ;;  %v1193_v44 = vadd.f32 %v5688_v10, %v5687_v56  ;;  %v5692_v19 = vld [vmem:[#allocation176_spill] sm:$0xff]  ;;  %v5695_v26 = vld [vmem:[#allocation75_spill] sm:$0xff]  ;;  %v5696_v15 = vld [vmem:[#allocation177_spill] sm:$0xff] }
 0x241   : > { %5658 = vst [vmem:[#allocation42_spill] sm:$0xff] %v4741_v62  ;;  %v4759_v7 = vpop.f32.mrf.mxu0  ;;  %v1195_v42 = vadd.f32 %v5692_v19, %v5691_v25  ;;  %v1004_v3 = vadd.f32 %v5696_v15, %v5695_v26  ;;  %v5697_v55 = vld [vmem:[#allocation76_spill] sm:$0xff]  ;;  %v5698_v8 = vld [vmem:[#allocation178_spill] sm:$0xff]  ;;  %v5699_v1 = vld [vmem:[#allocation77_spill] sm:$0xff] }
 0x242   : > { %5675 = vst [vmem:[#allocation144_spill] sm:$0xff] %v4759_v7  ;;  %v4761_v37 = vpop.f32.mrf.mxu1  ;;  %v1197_v9 = vadd.f32 %v5698_v8, %v5697_v55  ;;  %v5700_v12 = vld [vmem:[#allocation179_spill] sm:$0xff]  ;;  %v5701_v56 = vld [vmem:[#allocation78_spill] sm:$0xff]  ;;  %v5702_v10 = vld [vmem:[#allocation180_spill] sm:$0xff] }
 0x243   : > { %5676 = vst [vmem:[#allocation43_spill] sm:$0xff] %v4761_v37  ;;  %v4779_v33 = vpop.f32.mrf.mxu0  ;;  %v1006_v2 = vadd.f32 %v5700_v12, %v5699_v1  ;;  %v1199_v38 = vadd.f32 %v5702_v10, %v5701_v56  ;;  %v5703_v40 = vld [vmem:[#allocation79_spill] sm:$0xff]  ;;  %v5704_v35 = vld [vmem:[#allocation181_spill] sm:$0xff]  ;;  %v5705_v25 = vld [vmem:[#allocation80_spill] sm:$0xff] }
 0x244   : > { %5693 = vst [vmem:[#allocation145_spill] sm:$0xff] %v4779_v33  ;;  %v4781_v41 = vpop.f32.mrf.mxu1  ;;  %v1010_v60 = vadd.f32 %v5704_v35, %v5703_v40  ;;  %v5706_v19 = vld [vmem:[#allocation182_spill] sm:$0xff]  ;;  %v5710_v26 = vld [vmem:[#allocation184_spill] sm:$0xff]  ;;  %v5713_v8 = vld [vmem:[#allocation83_spill] sm:$0xff] }
 0x245   : > { %5694 = vst [vmem:[#allocation44_spill] sm:$0xff] %v4781_v41  ;;  %v1203_v21 = vadd.f32 %v5706_v19, %v5705_v25  ;;  %v1012_v41 = vadd.f32 %v5708_v48, %v5707_v22  ;;  %v5709_v33 = vld [vmem:[#allocation82_spill] sm:$0xff]  ;;  %v4799_v37 = vpop.f32.mrf.mxu0  ;;  %v5714_v1 = vld [vmem:[#allocation185_spill] sm:$0xff]  ;;  %v5715_v56 = vld [vmem:[#allocation84_spill] sm:$0xff] }
 0x246   : > { %v1205_v15 = vadd.f32 %v5710_v26, %v5709_v33  ;;  %5711 = vst [vmem:[#allocation146_spill] sm:$0xff] %v4799_v37  ;;  %v4801_v55 = vpop.f32.mrf.mxu1  ;;  %v1014_v12 = vadd.f32 %v5714_v1, %v5713_v8  ;;  %v5716_v10 = vld [vmem:[#allocation186_spill] sm:$0xff]  ;;  %v5717_v40 = vld [vmem:[#allocation85_spill] sm:$0xff]  ;;  %v5718_v35 = vld [vmem:[#allocation187_spill] sm:$0xff] }
 0x247   : > { %5712 = vst [vmem:[#allocation45_spill] sm:$0xff] %v4801_v55  ;;  %v1207_v7 = vadd.f32 %v5716_v10, %v5715_v56  ;;  %v1016_v62 = vadd.f32 %v5718_v35, %v5717_v40  ;;  %v5719_v25 = vld [vmem:[#allocation86_spill] sm:$0xff]  ;;  %v5720_v19 = vld [vmem:[#allocation188_spill] sm:$0xff]  ;;  %v5721_v48 = vld [vmem:[#allocation87_spill] sm:$0xff]  ;;  %v1600_v10 = vpop.f32.mrf.mxu0 }
 0x248   : > { %v1209_v58 = vadd.f32 %v5720_v19, %v5719_v25  ;;  %v5722_v22 = vld [vmem:[#allocation189_spill] sm:$0xff]  ;;  %v5724_v33 = vld [vmem:[#allocation88_spill] sm:$0xff]  ;;  %v5725_v26 = vld [vmem:[#allocation190_spill] sm:$0xff]  ;;  %v1793_v29 = vpop.f32.mrf.mxu1 }
 0x249   : > { %v4813_v20 = vadd.f32 %v5722_v22, %v5721_v48  ;;  %v4817_v37 = vadd.f32 %v5725_v26, %v5724_v33  ;;  %v5727_v55 = vld [vmem:[#allocation89_spill] sm:$0xff]  ;;  %v5728_v39 = vld [vmem:[#allocation191_spill] sm:$0xff]  ;;  %v5729_v1 = vld [vmem:[#allocation90_spill] sm:$0xff] }
 0x24a   : > { %v1022_v8 = vadd.f32 %v5728_v39, %v5727_v55  ;;  %v5730_v46 = vld [vmem:[#allocation192_spill] sm:$0xff]  ;;  %v5731_v40 = vld [vmem:[#allocation91_spill] sm:$0xff]  ;;  %v5732_v35 = vld [vmem:[#allocation193_spill] sm:$0xff] }
 0x24b   : > { %5723 = vst [vmem:[#allocation147_spill] sm:$0xff] %v4813_v20  ;;  %5726 = vst [vmem:[#allocation46_spill] sm:$0xff] %v4817_v37  ;;  %v1215_v56 = vadd.f32 %v5730_v46, %v5729_v1  ;;  %v4825_v24 = vadd.f32 %v5732_v35, %v5731_v40  ;;  %v5734_v25 = vld [vmem:[#allocation92_spill] sm:$0xff]  ;;  %v5735_v19 = vld [vmem:[#allocation194_spill] sm:$0xff] }
 0x24c   : > { %v4829_v48 = vadd.f32 %v5735_v19, %v5734_v25  ;;  %v5737_v22 = vld [vmem:[#allocation93_spill] sm:$0xff]  ;;  %v5738_v20 = vld [vmem:[#allocation195_spill] sm:$0xff]  ;;  %v5739_v26 = vld [vmem:[#allocation94_spill] sm:$0xff]  ;;  %v1602_v25 = vpop.f32.mrf.mxu0  ;;  %v1795_v19 = vpop.f32.mrf.mxu1 }
 0x24d   : > { %5733 = vst [vmem:[#allocation148_spill] sm:$0xff] %v4825_v24  ;;  %v1026_v33 = vadd.f32 %v5738_v20, %v5737_v22  ;;  %v5740_v37 = vld [vmem:[#allocation196_spill] sm:$0xff]  ;;  %v5741_v39 = vld [vmem:[#allocation95_spill] sm:$0xff]  ;;  %v5742_v55 = vld [vmem:[#allocation197_spill] sm:$0xff] }
 0x24e   : > { %5736 = vst [vmem:[#allocation47_spill] sm:$0xff] %v4829_v48  ;;  %v1219_v4 = vadd.f32 %v5740_v37, %v5739_v26  ;;  %v1030_v5 = vadd.f32 %v5742_v55, %v5741_v39  ;;  %v5743_v46 = vld [vmem:[#allocation96_spill] sm:$0xff]  ;;  %v5744_v1 = vld [vmem:[#allocation198_spill] sm:$0xff]  ;;  %v5745_v36 = vld [vmem:[#allocation97_spill] sm:$0xff] }
 0x24f   : > { %v1223_v30 = vadd.f32 %v5744_v1, %v5743_v46  ;;  %v5746_v14 = vld [vmem:[#allocation199_spill] sm:$0xff]  ;;  %v5747_v35 = vld [vmem:[#allocation98_spill] sm:$0xff]  ;;  %v5748_v24 = vld [vmem:[#allocation200_spill] sm:$0xff]  ;;  %v4852_v1 = vadd.f32 %v4645_v45, %v984_v57  ;;  %v4870_v45 = vadd.f32 %v4683_v47, %v992_v34 }
 0x250   : > { %v1032_v40 = vadd.f32 %v5746_v14, %v5745_v36  ;;  %v1225_v59 = vadd.f32 %v5748_v24, %v5747_v35  ;;  %v5749_v48 = vld [vmem:[#allocation99_spill] sm:$0xff]  ;;  %v5751_v22 = vld [vmem:[#allocation100_spill] sm:$0xff]  ;;  %v5753_v26 = vld [vmem:[#allocation101_spill] sm:$0xff]  ;;  %v4855_v14 = vadd.f32 %v4647_v49, %v1177_v6  ;;  %v4858_v36 = vadd.f32 %v4657_v23, %v986_v31  ;;  %v1604_v24 = vpop.f32.mrf.mxu0 }
 0x251   : > { %v1034_v20 = vadd.f32 %v5750_v50, %v5749_v48  ;;  %v1227_v37 = vadd.f32 %v5752_v13, %v5751_v22  ;;  %v1036_v39 = vadd.f32 %v5754_v28, %v5753_v26  ;;  %v5755_v55 = vld [vmem:[#allocation102_spill] sm:$0xff]  ;;  %5757 = vst [vmem:[#allocation149_spill] sm:$0xff] %v4852_v1  ;;  %v4861_v50 = vadd.f32 %v4659_v16, %v1179_v54  ;;  %v1797_v13 = vpop.f32.mrf.mxu1  ;;  %v5766_v57 = vld [vmem:[#allocation136_spill] sm:$0xff]  ;;  %v5767_v6 = vld [vmem:[#allocation35_spill] sm:$0xff] }
 0x252   : > { %v1229_v46 = vadd.f32 %v5756_v52, %v5755_v55  ;;  %5758 = vst [vmem:[#allocation48_spill] sm:$0xff] %v4855_v14  ;;  %5759 = vst [vmem:[#allocation150_spill] sm:$0xff] %v4858_v36  ;;  %v4864_v48 = vadd.f32 %v4671_v43, %v990_v51  ;;  %v4867_v28 = vadd.f32 %v4673_v11, %v1183_v53  ;;  %v5764_v52 = vld [vmem:[#allocation34_spill] sm:$0xff]  ;;  %v5768_v31 = vld [vmem:[#allocation137_spill] sm:$0xff]  ;;  %v1608_v53 = vpop.f32.mrf.mxu0 }
 0x253   : > { %5760 = vst [vmem:[#allocation49_spill] sm:$0xff] %v4861_v50  ;;  %5763 = vst [vmem:[#allocation152_spill] sm:$0xff] %v4870_v45  ;;  %v4873_v49 = vadd.f32 %v5764_v52, %v1185_v63  ;;  %v4876_v23 = vadd.f32 %v5766_v57, %v994_v32  ;;  %v4879_v16 = vadd.f32 %v5767_v6, %v1187_v61  ;;  %v5769_v43 = vld [vmem:[#allocation36_spill] sm:$0xff]  ;;  %v1801_v11 = vpop.f32.mrf.mxu1  ;;  %v5770_v35 = vld [vmem:[#allocation138_spill] sm:$0xff] }
 0x254   : > { %5761 = vst [vmem:[#allocation151_spill] sm:$0xff] %v4864_v48  ;;  %5762 = vst [vmem:[#allocation50_spill] sm:$0xff] %v4867_v28  ;;  %v4882_v54 = vadd.f32 %v5768_v31, %v996_v18  ;;  %v4885_v51 = vadd.f32 %v5769_v43, %v1189_v17  ;;  %v4888_v34 = vadd.f32 %v5770_v35, %v1000_v0  ;;  %v5771_v47 = vld [vmem:[#allocation37_spill] sm:$0xff]  ;;  %v5772_v22 = vld [vmem:[#allocation139_spill] sm:$0xff] }
 0x255   : > { %5765 = vst [vmem:[#allocation51_spill] sm:$0xff] %v4873_v49  ;;  %v4891_v63 = vadd.f32 %v5771_v47, %v1193_v44  ;;  %v4894_v32 = vadd.f32 %v5772_v22, %v1002_v27  ;;  %v5773_v26 = vld [vmem:[#allocation38_spill] sm:$0xff]  ;;  %v5774_v55 = vld [vmem:[#allocation140_spill] sm:$0xff]  ;;  %v5775_v52 = vld [vmem:[#allocation39_spill] sm:$0xff]  ;;  %v1610_v44 = vpop.f32.mrf.mxu0  ;;  %v1803_v43 = vpop.f32.mrf.mxu1  ;;  %v1925_v28 = vadd.f32 %v1793_v29, %v1215_v56  ;;  %v1927_v49 = vadd.f32 %v1604_v24, %v1026_v33 }
 0x256   : > { %v4897_v61 = vadd.f32 %v5773_v26, %v1195_v42  ;;  %v4900_v18 = vadd.f32 %v5774_v55, %v1004_v3  ;;  %v4903_v17 = vadd.f32 %v5775_v52, %v1197_v9  ;;  %v5776_v57 = vld [vmem:[#allocation141_spill] sm:$0xff]  ;;  %v5777_v0 = vld [vmem:[#allocation40_spill] sm:$0xff]  ;;  %v5778_v35 = vld [vmem:[#allocation142_spill] sm:$0xff]  ;;  %v1931_v36 = vadd.f32 %v1610_v44, %v1032_v40 }
 0x257   : > { %v4906_v6 = vadd.f32 %v5776_v57, %v1006_v2  ;;  %v4909_v31 = vadd.f32 %v5777_v0, %v1199_v38  ;;  %v4912_v27 = vadd.f32 %v5778_v35, %v1010_v60  ;;  %v5779_v47 = vld [vmem:[#allocation41_spill] sm:$0xff]  ;;  %v5780_v22 = vld [vmem:[#allocation143_spill] sm:$0xff]  ;;  %v5781_v26 = vld [vmem:[#allocation42_spill] sm:$0xff]  ;;  %v1612_v50 = vpop.f32.mrf.mxu0  ;;  %v1805_v60 = vpop.f32.mrf.mxu1  ;;  %v1923_v35 = vadd.f32 %v1600_v10, %v1022_v8 }
 0x258   : > { %v4915_v42 = vadd.f32 %v5779_v47, %v1203_v21  ;;  %v4918_v3 = vadd.f32 %v5780_v22, %v1012_v41  ;;  %v4921_v9 = vadd.f32 %v5781_v26, %v1205_v15  ;;  %v5782_v55 = vld [vmem:[#allocation144_spill] sm:$0xff]  ;;  %v5783_v52 = vld [vmem:[#allocation43_spill] sm:$0xff]  ;;  %v5784_v38 = vld [vmem:[#allocation145_spill] sm:$0xff]  ;;  %v1933_v21 = vadd.f32 %v1803_v43, %v1225_v59 }
 0x259   : > { %v1918_v2 = vadd.f32 %v5782_v55, %v1014_v12  ;;  %v1920_v57 = vadd.f32 %v5783_v52, %v1207_v7  ;;  %v1919_v0 = vadd.f32 %v5784_v38, %v1016_v62  ;;  %v5785_v14 = vld [vmem:[#allocation44_spill] sm:$0xff]  ;;  %v1934_v47 = vadd.f32 %v1612_v50, %v1034_v20  ;;  %v1614_v15 = vpop.f32.mrf.mxu0  ;;  %v1807_v26 = vpop.f32.mrf.mxu1  ;;  %v5787_v38 = vld [vmem:[#allocation47_spill] sm:$0xff]  ;;  %v5790_v59 = vld [vmem:[#allocation229_spill] sm:$0xff] }
 0x25a   : > { %v1921_v1 = vadd.f32 %v5785_v14, %v1209_v58  ;;  %v1930_v41 = vadd.f32 %v1608_v53, %v1030_v5  ;;  %v1932_v22 = vadd.f32 %v1801_v11, %v1223_v30  ;;  %v1936_v48 = vadd.f32 %v1805_v60, %v1227_v37  ;;  %v5786_v52 = vld [vmem:[#allocation148_spill] sm:$0xff]  ;;  %v5788_v14 = vld [vmem:[#allocation227_spill] sm:$0xff]  ;;  %v5791_v29 = vld [vmem:[#allocation230_spill] sm:$0xff] }
 0x25b   : > { %v1929_v12 = vadd.f32 %v1797_v13, %v1219_v4  ;;  %v1935_v55 = vadd.f32 %v1614_v15, %v1036_v39  ;;  %v1937_v7 = vadd.f32 %v1807_v26, %v1229_v46  ;;  %v1926_v62 = vadd.f32 %v1602_v25, %v5786_v52  ;;  %v5789_v8 = vld [vmem:[#allocation228_spill] sm:$0xff]  ;;  %v5792_v33 = vld [vmem:[#allocation147_spill] sm:$0xff]  ;;  %v5793_v4 = vld [vmem:[#allocation146_spill] sm:$0xff] }
 0x25c   : > { %v1928_v58 = vadd.f32 %v1795_v19, %v5787_v38  ;;  %v2084_v45 = vadd.f32 %v5788_v14, %v1934_v47  ;;  %v2086_v10 = vadd.f32 %v5789_v8, %v1936_v48  ;;  %v2081_v40 = vadd.f32 %v5790_v59, %v1931_v36  ;;  %v5794_v37 = vld [vmem:[#allocation46_spill] sm:$0xff]  ;;  %v5795_v39 = vld [vmem:[#allocation45_spill] sm:$0xff] }
 0x25d   : > { %v2083_v5 = vadd.f32 %v5791_v29, %v1933_v21  ;;  %v2085_v30 = vadd.f32 %v5790_v59, %v1935_v55  ;;  %v2087_v56 = vadd.f32 %v5791_v29, %v1937_v7  ;;  %v1922_v20 = vadd.f32 %v5793_v4, %v5792_v33 }
 0x25e   : > { %v1924_v25 = vadd.f32 %v5795_v39, %v5794_v37  ;;  %v2080_v19 = vadd.f32 %v5788_v14, %v1930_v41  ;;  %v2082_v46 = vadd.f32 %v5789_v8, %v1932_v22  ;;  %v2077_v50 = vadd.f32 %v5790_v59, %v1927_v49 }
 0x25f   : > { %v2079_v36 = vadd.f32 %v5791_v29, %v1929_v12  ;;  %v2213_v24 = vmax.f32 %v2085_v30, 0.0  ;;  %v2215_v13 = vmax.f32 %v2087_v56, 0.0  ;;  %v2076_v48 = vadd.f32 %v5788_v14, %v1926_v62 }
 0x260   : > { %v2078_v53 = vadd.f32 %v5789_v8, %v1928_v58  ;;  %v2212_v11 = vmax.f32 %v2084_v45, 0.0  ;;  %v2214_v44 = vmax.f32 %v2086_v10, 0.0  ;;  %v2073_v43 = vadd.f32 %v5790_v59, %v1923_v35 }
 0x261   : > { %v2075_v60 = vadd.f32 %v5791_v29, %v1925_v28  ;;  %v2209_v21 = vmax.f32 %v2081_v40, 0.0  ;;  %v2211_v47 = vmax.f32 %v2083_v5, 0.0  ;;  %2248 = vmatprep.subr.mxu0 %v2213_v24  ;;  %2319 = vmatprep.subr.mxu1 %v2215_v13  ;;  %v2072_v49 = vadd.f32 %v5788_v14, %v1922_v20 }
 0x262   : > { %v2074_v41 = vadd.f32 %v5789_v8, %v1924_v25  ;;  %v2208_v22 = vmax.f32 %v2080_v19, 0.0  ;;  %v2210_v15 = vmax.f32 %v2082_v46, 0.0  ;;  %2249 = vmatpush2.msra.mxu0 %v2212_v11  ;;  %2320 = vmatpush2.msra.mxu1 %v2214_v44  ;;  %v2069_v26 = vadd.f32 %v5790_v59, %v1919_v0 }
 0x263   : > { %v2071_v45 = vadd.f32 %v5791_v29, %v1921_v1  ;;  %v2205_v12 = vmax.f32 %v2077_v50, 0.0  ;;  %v2207_v35 = vmax.f32 %v2079_v36, 0.0  ;;  %2250 = vmatprep.subr.mxu0 %v2209_v21  ;;  %2321 = vmatprep.subr.mxu1 %v2211_v47  ;;  %v2068_v28 = vadd.f32 %v5788_v14, %v1918_v2  ;;  %v5796_v50 = vld [vmem:[#allocation152_spill] sm:$0xff]  ;;  %v5797_v36 = vld [vmem:[#allocation51_spill] sm:$0xff]  ;;  %v5801_v21 = vld [vmem:[#allocation49_spill] sm:$0xff] }
 0x264   : > { %v2070_v55 = vadd.f32 %v5789_v8, %v1920_v57  ;;  %v2204_v7 = vmax.f32 %v2076_v48, 0.0  ;;  %v2206_v52 = vmax.f32 %v2078_v53, 0.0  ;;  %2251 = vmatpush2.msra.mxu0 %v2208_v22  ;;  %2322 = vmatpush2.msra.mxu1 %v2210_v15  ;;  %v2065_v62 = vadd.f32 %v5790_v59, %v4918_v3  ;;  %v5798_v48 = vld [vmem:[#allocation151_spill] sm:$0xff]  ;;  %v5799_v53 = vld [vmem:[#allocation50_spill] sm:$0xff]  ;;  %v5802_v22 = vld [vmem:[#allocation149_spill] sm:$0xff] }
 0x265   : > { %v2067_v0 = vadd.f32 %v5791_v29, %v4921_v9  ;;  %v2201_v38 = vmax.f32 %v2073_v43, 0.0  ;;  %v2203_v1 = vmax.f32 %v2075_v60, 0.0  ;;  %2252 = vmatprep.subr.mxu0 %v2205_v12  ;;  %2323 = vmatprep.subr.mxu1 %v2207_v35  ;;  %v2064_v58 = vadd.f32 %v5788_v14, %v4912_v27  ;;  %v5800_v43 = vld [vmem:[#allocation150_spill] sm:$0xff] }
 0x266   : > { %v2066_v2 = vadd.f32 %v5789_v8, %v4915_v42  ;;  %v2200_v57 = vmax.f32 %v2072_v49, 0.0  ;;  %v2202_v10 = vmax.f32 %v2074_v41, 0.0  ;;  %2253 = vmatpush2.msra.mxu0 %v2204_v7  ;;  %2324 = vmatpush2.msra.mxu1 %v2206_v52  ;;  %v2061_v3 = vadd.f32 %v5790_v59, %v4906_v6  ;;  %v5805_v7 = vld [vmem:[#allocation135_spill] sm:$0xff] }
 0x267   : > { %v2063_v9 = vadd.f32 %v5791_v29, %v4909_v31  ;;  %v2197_v40 = vmax.f32 %v2069_v26, 0.0  ;;  %v2199_v5 = vmax.f32 %v2071_v45, 0.0  ;;  %2254 = vmatprep.subr.mxu0 %v2201_v38  ;;  %2325 = vmatprep.subr.mxu1 %v2203_v1  ;;  %v2060_v27 = vadd.f32 %v5788_v14, %v4900_v18  ;;  %v5803_v26 = vld [vmem:[#allocation48_spill] sm:$0xff] }
 0x268   : > { %v2062_v42 = vadd.f32 %v5789_v8, %v4903_v17  ;;  %v2196_v30 = vmax.f32 %v2068_v28, 0.0  ;;  %v2198_v56 = vmax.f32 %v2070_v55, 0.0  ;;  %2255 = vmatpush2.msra.mxu0 %v2200_v57  ;;  %2326 = vmatpush2.msra.mxu1 %v2202_v10  ;;  %v2057_v6 = vadd.f32 %v5790_v59, %v4894_v32  ;;  %v5804_v28 = vld [vmem:[#allocation33_spill] sm:$0xff]  ;;  %v5806_v38 = vld [vmem:[#allocation32_spill] sm:$0xff] }
 0x269   : > { %v2059_v31 = vadd.f32 %v5791_v29, %v4897_v61  ;;  %v2193_v33 = vmax.f32 %v2065_v62, 0.0  ;;  %v2195_v4 = vmax.f32 %v2067_v0, 0.0  ;;  %2256 = vmatprep.subr.mxu0 %v2197_v40  ;;  %2327 = vmatprep.subr.mxu1 %v2199_v5  ;;  %v2056_v18 = vadd.f32 %v5788_v14, %v4888_v34  ;;  %v5809_v40 = vld [vmem:[#allocation133_spill] sm:$0xff] }
 0x26a   : > { %v2058_v17 = vadd.f32 %v5789_v8, %v4891_v63  ;;  %v2192_v20 = vmax.f32 %v2064_v58, 0.0  ;;  %v2194_v37 = vmax.f32 %v2066_v2, 0.0  ;;  %2257 = vmatpush2.msra.mxu0 %v2196_v30  ;;  %2328 = vmatpush2.msra.mxu1 %v2198_v56  ;;  %v2053_v32 = vadd.f32 %v5790_v59, %v4882_v54  ;;  %v5807_v58 = vld [vmem:[#allocation134_spill] sm:$0xff] }
 0x26b   : > { %v2055_v61 = vadd.f32 %v5791_v29, %v4885_v51  ;;  %v2189_v39 = vmax.f32 %v2061_v3, 0.0  ;;  %v2191_v25 = vmax.f32 %v2063_v9, 0.0  ;;  %2258 = vmatprep.subr.mxu0 %v2193_v33  ;;  %2329 = vmatprep.subr.mxu1 %v2195_v4  ;;  %v2052_v34 = vadd.f32 %v5788_v14, %v4876_v23  ;;  %v5808_v3 = vld [vmem:[#allocation31_spill] sm:$0xff]  ;;  %v5810_v30 = vld [vmem:[#allocation30_spill] sm:$0xff] }
 0x26c   : > { %v2054_v63 = vadd.f32 %v5789_v8, %v4879_v16  ;;  %v2188_v19 = vmax.f32 %v2060_v27, 0.0  ;;  %v2190_v46 = vmax.f32 %v2062_v42, 0.0  ;;  %2259 = vmatpush2.msra.mxu0 %v2192_v20  ;;  %2330 = vmatpush2.msra.mxu1 %v2194_v37  ;;  %v2049_v54 = vadd.f32 %v5790_v59, %v5796_v50  ;;  %v5813_v20 = vld [vmem:[#allocation131_spill] sm:$0xff] }
 0x26d   : > { %v2051_v51 = vadd.f32 %v5791_v29, %v5797_v36  ;;  %v2185_v24 = vmax.f32 %v2057_v6, 0.0  ;;  %v2187_v13 = vmax.f32 %v2059_v31, 0.0  ;;  %2260 = vmatprep.subr.mxu0 %v2189_v39  ;;  %2331 = vmatprep.subr.mxu1 %v2191_v25  ;;  %v2048_v23 = vadd.f32 %v5788_v14, %v5798_v48  ;;  %v5811_v6 = vld [vmem:[#allocation132_spill] sm:$0xff]  ;;  %v5816_v50 = vld [vmem:[#allocation27_spill] sm:$0xff]  ;;  %v5817_v36 = vld [vmem:[#allocation129_spill] sm:$0xff] }
 0x26e   : > { %v2050_v16 = vadd.f32 %v5789_v8, %v5799_v53  ;;  %v2184_v11 = vmax.f32 %v2056_v18, 0.0  ;;  %v2186_v44 = vmax.f32 %v2058_v17, 0.0  ;;  %2261 = vmatpush2.msra.mxu0 %v2188_v19  ;;  %2332 = vmatpush2.msra.mxu1 %v2190_v46  ;;  %v2045_v60 = vadd.f32 %v5790_v59, %v5800_v43  ;;  %v5812_v18 = vld [vmem:[#allocation29_spill] sm:$0xff]  ;;  %v5814_v39 = vld [vmem:[#allocation28_spill] sm:$0xff]  ;;  %v5818_v48 = vld [vmem:[#allocation26_spill] sm:$0xff] }
 0x26f   : > { %v2047_v47 = vadd.f32 %v5791_v29, %v5801_v21  ;;  %v2181_v49 = vmax.f32 %v2053_v32, 0.0  ;;  %v2183_v41 = vmax.f32 %v2055_v61, 0.0  ;;  %2262 = vmatprep.subr.mxu0 %v2185_v24  ;;  %2333 = vmatprep.subr.mxu1 %v2187_v13  ;;  %v2044_v15 = vadd.f32 %v5788_v14, %v5802_v22  ;;  %v5819_v53 = vld [vmem:[#allocation128_spill] sm:$0xff]  ;;  %v5820_v43 = vld [vmem:[#allocation25_spill] sm:$0xff]  ;;  %v5821_v21 = vld [vmem:[#allocation127_spill] sm:$0xff] }
 0x270   : > { %v2046_v45 = vadd.f32 %v5789_v8, %v5803_v26  ;;  %v2180_v12 = vmax.f32 %v2052_v34, 0.0  ;;  %v2182_v35 = vmax.f32 %v2054_v63, 0.0  ;;  %2263 = vmatpush2.msra.mxu0 %v2184_v11  ;;  %2334 = vmatpush2.msra.mxu1 %v2186_v44  ;;  %v2041_v55 = vadd.f32 %v5790_v59, %v5804_v28  ;;  %v5815_v34 = vld [vmem:[#allocation130_spill] sm:$0xff]  ;;  %v5822_v22 = vld [vmem:[#allocation24_spill] sm:$0xff] }
 0x271   : > { %v2043_v52 = vadd.f32 %v5791_v29, %v5805_v7  ;;  %v2177_v62 = vmax.f32 %v2049_v54, 0.0  ;;  %v2179_v0 = vmax.f32 %v2051_v51, 0.0  ;;  %2264 = vmatprep.subr.mxu0 %v2181_v49  ;;  %2335 = vmatprep.subr.mxu1 %v2183_v41  ;;  %v2040_v1 = vadd.f32 %v5788_v14, %v5806_v38  ;;  %v5823_v26 = vld [vmem:[#allocation126_spill] sm:$0xff]  ;;  %v3049_v38 = vld [vmem:[%s5152_s3 + $0x38] sm:$0xff]  }
 0x272   : > { %v2042_v2 = vadd.f32 %v5789_v8, %v5807_v58  ;;  %v2176_v57 = vmax.f32 %v2048_v23, 0.0  ;;  %v2178_v10 = vmax.f32 %v2050_v16, 0.0  ;;  %2265 = vmatpush2.msra.mxu0 %v2180_v12  ;;  %2336 = vmatpush2.msra.mxu1 %v2182_v35  ;;  %v2037_v9 = vadd.f32 %v5790_v59, %v5808_v3  ;;  %v3052_v58 = vld [vmem:[%s5152_s3 + $0x70] sm:$0xff]  }
 0x273   : > { %v2039_v5 = vadd.f32 %v5791_v29, %v5809_v40  ;;  %v2173_v27 = vmax.f32 %v2045_v60, 0.0  ;;  %v2175_v42 = vmax.f32 %v2047_v47, 0.0  ;;  %2266 = vmatprep.subr.mxu0 %v2177_v62  ;;  %2337 = vmatprep.subr.mxu1 %v2179_v0  ;;  %v2036_v56 = vadd.f32 %v5788_v14, %v5810_v30  ;;  %v3050_v0 = vld [vmem:[%s5152_s3 + $0xf8] sm:$0xff]   ;;  %v3055_v3 = vld [vmem:[%s5152_s3 + $0xb0] sm:$0xff]   ;;  %v3058_v40 = vld [vmem:[%s5152_s3 + $0xe8] sm:$0xff]  }
 0x274   : > { %v2038_v31 = vadd.f32 %v5789_v8, %v5811_v6  ;;  %v2172_v33 = vmax.f32 %v2044_v15, 0.0  ;;  %v2174_v4 = vmax.f32 %v2046_v45, 0.0  ;;  %2267 = vmatpush2.msra.mxu0 %v2176_v57  ;;  %2338 = vmatpush2.msra.mxu1 %v2178_v10  ;;  %v2033_v17 = vadd.f32 %v5790_v59, %v5812_v18  ;;  %v3053_v10 = vld [vmem:[%s5152_s3 + $0x30] sm:$0xff]   ;;  %v3062_v30 = vld [vmem:[%s5152_s3 + $0xe0] sm:$0xff]   ;;  %v3067_v18 = vld [vmem:[%s5152_s3 + $0x98] sm:$0xff]  }
 0x275   : > { %v2035_v37 = vadd.f32 %v5791_v29, %v5813_v20  ;;  %v2169_v32 = vmax.f32 %v2041_v55, 0.0  ;;  %v2171_v61 = vmax.f32 %v2043_v52, 0.0  ;;  %2268 = vmatprep.subr.mxu0 %v2173_v27  ;;  %2339 = vmatprep.subr.mxu1 %v2175_v42  ;;  %v2032_v25 = vadd.f32 %v5788_v14, %v5814_v39  ;;  %v3059_v27 = vld [vmem:[%s5152_s3 + $0xa8] sm:$0xff]   ;;  %v3060_v42 = vld [vmem:[%s5152_s3 + $0x60] sm:$0xff]   ;;  %v3070_v20 = vld [vmem:[%s5152_s3 + $0xd0] sm:$0xff]  }
 0x276   : > { %v2034_v63 = vadd.f32 %v5789_v8, %v5815_v34  ;;  %v2168_v19 = vmax.f32 %v2040_v1, 0.0  ;;  %v2170_v46 = vmax.f32 %v2042_v2, 0.0  ;;  %2269 = vmatpush2.msra.mxu0 %v2172_v33  ;;  %2340 = vmatpush2.msra.mxu1 %v2174_v4  ;;  %v2029_v54 = vadd.f32 %v5790_v59, %v5816_v50  ;;  %v3051_v1 = vld [vmem:[%s5152_s3 + $0xb8] sm:$0xff]   ;;  %v3054_v2 = vld [vmem:[%s5152_s3 + $0xf0] sm:$0xff]   ;;  %v3063_v6 = vld [vmem:[%s5152_s3 + $0xa0] sm:$0xff]  }
 0x277   : > { %v2031_v51 = vadd.f32 %v5791_v29, %v5817_v36  ;;  %v2165_v24 = vmax.f32 %v2037_v9, 0.0  ;;  %v2167_v13 = vmax.f32 %v2039_v5, 0.0  ;;  %2270 = vmatprep.subr.mxu0 %v2169_v32  ;;  %2341 = vmatprep.subr.mxu1 %v2171_v61  ;;  %v2028_v23 = vadd.f32 %v5788_v14, %v5818_v48  ;;  %v3056_v9 = vld [vmem:[%s5152_s3 + $0x68] sm:$0xff]   ;;  %v3066_v33 = vld [vmem:[%s5152_s3 + $0xd8] sm:$0xff]   ;;  %v3071_v32 = vld [vmem:[%s5152_s3 + $0x90] sm:$0xff]  }
 0x278   : > { %v2030_v16 = vadd.f32 %v5789_v8, %v5819_v53  ;;  %v2164_v11 = vmax.f32 %v2036_v56, 0.0  ;;  %v2166_v44 = vmax.f32 %v2038_v31, 0.0  ;;  %2271 = vmatpush2.msra.mxu0 %v2168_v19  ;;  %2342 = vmatpush2.msra.mxu1 %v2170_v46  ;;  %v2025_v60 = vadd.f32 %v5790_v59, %v5820_v43  ;;  %v3057_v5 = vld [vmem:[%s5152_s3 + $0x28] sm:$0xff]   ;;  %v3061_v56 = vld [vmem:[%s5152_s3 + $0x20] sm:$0xff]   ;;  %v3064_v31 = vld [vmem:[%s5152_s3 + $0x58] sm:$0xff]  }
 0x279   : > { %v2027_v47 = vadd.f32 %v5791_v29, %v5821_v21  ;;  %v2161_v49 = vmax.f32 %v2033_v17, 0.0  ;;  %v2163_v41 = vmax.f32 %v2035_v37, 0.0  ;;  %2272 = vmatprep.subr.mxu0 %v2165_v24  ;;  %2343 = vmatprep.subr.mxu1 %v2167_v13  ;;  %v2024_v15 = vadd.f32 %v5788_v14, %v5822_v22  ;;  %v3065_v4 = vld [vmem:[%s5152_s3 + $0x18] sm:$0xff]   ;;  %v3068_v17 = vld [vmem:[%s5152_s3 + $0x50] sm:$0xff]   ;;  %v3072_v61 = vld [vmem:[%s5152_s3 + $0x48] sm:$0xff]  }
 0x27a   : > { %v2026_v45 = vadd.f32 %v5789_v8, %v5823_v26  ;;  %v2160_v12 = vmax.f32 %v2032_v25, 0.0  ;;  %v2162_v35 = vmax.f32 %v2034_v63, 0.0  ;;  %2273 = vmatpush2.msra.mxu0 %v2164_v11  ;;  %2344 = vmatpush2.msra.mxu1 %v2166_v44  ;;  %v2157_v28 = vmax.f32 %v2029_v54, 0.0  ;;  %v3048_v8 = vld [vmem:[%s5152_s3 + $0x78] sm:$0xff]   ;;  %v3069_v37 = vld [vmem:[%s5152_s3 + $0x10] sm:$0xff]   ;;  %v3073_v39 = vld [vmem:[%s5152_s3 + $0x8] sm:$0xff]  }
 0x27b   : > { %v2159_v55 = vmax.f32 %v2031_v51, 0.0  ;;  %2274 = vmatprep.subr.mxu0 %v2161_v49  ;;  %2345 = vmatprep.subr.mxu1 %v2163_v41  ;;  %v2156_v59 = vmax.f32 %v2028_v23, 0.0  ;;  %v2158_v29 = vmax.f32 %v2030_v16, 0.0  ;;  %v2153_v7 = vmax.f32 %v2025_v60, 0.0  ;;  %v3074_v25 = vld [vmem:[%s5152_s3 + $0xc8] sm:$0xff]   ;;  %v3076_v63 = vld [vmem:[%s5152_s3 + $0x40] sm:$0xff]  }
 0x27c   : > { %2275 = vmatpush2.msra.mxu0 %v2160_v12  ;;  %2346 = vmatpush2.msra.mxu1 %v2162_v35  ;;  %v2155_v52 = vmax.f32 %v2027_v47, 0.0  ;;  %v2152_v14 = vmax.f32 %v2024_v15, 0.0  ;;  %v2154_v62 = vmax.f32 %v2026_v45, 0.0  ;;  %v5824_v57 = vmov 0.00390625   ;;  %v3075_v34 = vld [vmem:[%s5152_s3 + $0x88] sm:$0xff]   ;;  %v3078_v19 = vld [vmem:[%s5152_s3 + $0xc0] sm:$0xff]  }
 0x27d   : > { %2276 = vmatprep.subr.mxu0 %v2157_v28  ;;  %2347 = vmatprep.subr.mxu1 %v2159_v55  ;;  %v3077_v46 = vld [vmem:[%s5152_s3] sm:$0xff]  }
 0x27e   : > { %2277 = vmatpush2.msra.mxu0 %v2156_v59  ;;  %2348 = vmatpush2.msra.mxu1 %v2158_v29  ;;  %v3079_v50 = vld [vmem:[%s5152_s3 + $0x80] sm:$0xff]  }
 0x27f   : > { %2278 = vmatprep.subr.mxu0 %v2153_v7  ;;  %2349 = vmatprep.subr.mxu1 %v2155_v52  ;;  %v2426_v44 = vld [vmem:[%s5153_s4] sm:$0x1] }
 0x280   : > { %2279 = vmatpush2.msra.mxu0 %v2152_v14  ;;  %2350 = vmatpush2.msra.mxu1 %v2154_v62 }
 0x281   : > { %2281 = vmatmul.mubr.f32.vlgmr.msra.gmra.mxu0 %v5824_v57  ;;  %2352 = vmatmul.mubr.f32.vlgmr.msra.gmra.mxu1 %v5824_v57 }
 0x282   : > { %2942 = vmatprep.subr.bf16.mxu0 %v3048_v8  ;;  %2964 = vmatprep.subr.bf16.mxu1 %v3050_v0 }
 0x283   : > { %2943 = vmatpush3.bf16.msra.mxu0 %v3049_v38  ;;  %2965 = vmatpush3.bf16.msra.mxu1 %v3051_v1 }
 0x284   : > { %2944 = vmatprep.subr.bf16.mxu0 %v3052_v58  ;;  %2966 = vmatprep.subr.bf16.mxu1 %v3054_v2 }
 0x287   : > { %2945 = vmatpush3.bf16.msra.mxu0 %v3053_v10  ;;  %2967 = vmatpush3.bf16.msra.mxu1 %v3055_v3 }
 0x288   : > { %2946 = vmatprep.subr.bf16.mxu0 %v3056_v9  ;;  %2968 = vmatprep.subr.bf16.mxu1 %v3058_v40 }
 0x28b   : > { %2947 = vmatpush3.bf16.msra.mxu0 %v3057_v5  ;;  %2969 = vmatpush3.bf16.msra.mxu1 %v3059_v27 }
 0x28c   : > { %2948 = vmatprep.subr.bf16.mxu0 %v3060_v42  ;;  %2970 = vmatprep.subr.bf16.mxu1 %v3062_v30 }
 0x28f   : > { %2949 = vmatpush3.bf16.msra.mxu0 %v3061_v56  ;;  %2971 = vmatpush3.bf16.msra.mxu1 %v3063_v6 }
 0x290   : > { %2950 = vmatprep.subr.bf16.mxu0 %v3064_v31  ;;  %2972 = vmatprep.subr.bf16.mxu1 %v3066_v33 }
 0x293   : > { %2951 = vmatpush3.bf16.msra.mxu0 %v3065_v4  ;;  %2973 = vmatpush3.bf16.msra.mxu1 %v3067_v18 }
 0x294   : > { %2952 = vmatprep.subr.bf16.mxu0 %v3068_v17  ;;  %2974 = vmatprep.subr.bf16.mxu1 %v3070_v20 }
 0x297   : > { %2953 = vmatpush3.bf16.msra.mxu0 %v3069_v37  ;;  %2975 = vmatpush3.bf16.msra.mxu1 %v3071_v32 }
 0x298   : > { %2954 = vmatprep.subr.bf16.mxu0 %v3072_v61  ;;  %2976 = vmatprep.subr.bf16.mxu1 %v3074_v25 }
 0x29b   : > { %2955 = vmatpush3.bf16.msra.mxu0 %v3073_v39  ;;  %2977 = vmatpush3.bf16.msra.mxu1 %v3075_v34 }
 0x29c   : > { %2956 = vmatprep.subr.bf16.mxu0 %v3076_v63  ;;  %2978 = vmatprep.subr.bf16.mxu1 %v3078_v19 }
 0x29f   : > { %2957 = vmatpush3.bf16.msra.mxu0 %v3077_v46  ;;  %2979 = vmatpush3.bf16.msra.mxu1 %v3079_v50 }
 0x341   : > { %v2282_v54 = vpop.f32.mrf.mxu0  ;;  %v2353_v36 = vpop.f32.mrf.mxu1 }
 0x342   : > { %v2360_v24 = vpack.c.bf16 %v2353_v36, %v2353_v36  ;;  %v2358_v53 = vpack.c.bf16 %v2282_v54, %v2282_v54 }
 0x343   : > { %v2284_v51 = vpop.f32.mrf.mxu0  ;;  %v2355_v13 = vpop.f32.mrf.mxu1 }
 0x344   : > { %v2359_v48 = vpack.c.bf16 %v2284_v51, %v2284_v51  ;;  %v2361_v23 = vpack.c.bf16 %v2355_v13, %v2355_v13 }
 0x346   : > { %2651 = vmatprep.mubr.bf16.mxu0 %v2359_v48  ;;  %2691 = vmatprep.mubr.bf16.mxu1 %v2361_v23 }
 0x347   : > { %2652 = vmatmul.mubr.bf16.vlgmr.msra.gmra.mxu0 %v2358_v53  ;;  %2692 = vmatmul.mubr.bf16.vlgmr.msra.gmra.mxu1 %v2360_v24 }
 0x407   : > { %v2958_v16 = vpop.f32.mrf.mxu0  ;;  %v2980_v11 = vpop.f32.mrf.mxu1 }
 0x409   : > { %v2959_v43 = vpop.f32.mrf.mxu0  ;;  %v2981_v60 = vpop.f32.mrf.mxu1 }
 0x40a   : > { %v2960_v21 = vadd.f32 %v2959_v43, %v2958_v16  ;;  %v2982_v22 = vadd.f32 %v2981_v60, %v2980_v11 }
 0x40b   : > { %v2961_v47 = vpop.f32.mrf.mxu0  ;;  %v2983_v49 = vpop.f32.mrf.mxu1 }
 0x40c   : > { %v2654_v41 = vadd.f32 %v2960_v21, %v2426_v44 }
 0x40d   : > { %v2962_v15 = vpop.f32.mrf.mxu0  ;;  %v2984_v26 = vpop.f32.mrf.mxu1 }
 0x40e   : > { %v2694_v45 = vadd.f32 %v2982_v22, %v2654_v41 }
 0x410   : > { %2699 = vst [vmem:[%s220_s26] sm:$0x1] %v2694_v45 }
 0x411 PF: > { %s15_s18 = sadd.s32 1, %s3086_s18  }
 0x412   : > { %p12_p4 = scmp.ge.s32.totalorder %s15_s18, 4  }
 0x414   :  { %14 = sbr.rel (!%p12_p4) target bundleno = 1 (0x1), region = 72 }

</bundles_post_ra>
